<compile_context>
chip_gen: v6e
topology: v6e:2x2x1
jax: 0.10.0
libtpu: 0.0.40
codegen_flags: <defaults>
</compile_context>

<pallas_src>
import functools
import math
from typing import NamedTuple

import jax
import jax.numpy as jnp
from jax import lax
from jax.experimental import pallas as pl
from jax.experimental.pallas import tpu as pltpu

FEATURE_NUM = 512
CLS_NUM = 12
BACKBONE_OUT = 1000

# Lane-aligned (padded) sizes used inside the kernel.
_BACKBONE_PAD = 1024   # 1000 -> 1024 (multiple of 128)
_CLS_PAD = 128         # 12   -> 128  (multiple of 128)


def _round_up(x, m):
    return (x + m - 1) // m * m


class FaceNetParams(NamedTuple):
    """Padded / cast / pre-normalized weights (computed once at init)."""
    wbp: jax.Array   # (k_pad, 1024)  matmul dtype (bf16)   backbone stand-in
    wfp: jax.Array   # (1024, 512)    f32                   feature_net linear
    wap: jax.Array   # (512, 128)     f32, column-normalized + zero-padded
    in_dim: int      # original C*H*W
    tk: int          # K tile used by the kernel


def prepare_facenet_params(w_backbone, w_feature, w_arc, *,
                           tk=2048, matmul_dtype=jnp.bfloat16):
    """One-time weight preprocessing (pad, cast, normalize). Do NOT call per-step."""
    in_dim = w_backbone.shape[0]
    assert w_backbone.shape == (in_dim, BACKBONE_OUT)
    assert w_feature.shape == (BACKBONE_OUT, FEATURE_NUM)
    assert w_arc.shape == (FEATURE_NUM, CLS_NUM)
    assert tk % 128 == 0, "K tile must be a multiple of 128 lanes"

    # Don't use a K tile bigger than the (padded) contraction dim itself.
    tk_eff = min(tk, _round_up(in_dim, 128))
    k_pad = _round_up(in_dim, tk_eff)

    # Backbone weight: pad + cast to bf16 once (dominant HBM stream).
    wbp = jnp.zeros((k_pad, _BACKBONE_PAD), jnp.float32)
    wbp = wbp.at[:in_dim, :BACKBONE_OUT].set(w_backbone.astype(jnp.float32))
    wbp = wbp.astype(matmul_dtype)

    # feature_net weight: small -> keep f32 for parity with the reference.
    wfp = jnp.zeros((_BACKBONE_PAD, FEATURE_NUM), jnp.float32)
    wfp = wfp.at[:BACKBONE_OUT, :].set(w_feature.astype(jnp.float32))

    # Arcsoftmax weight: F.normalize(w, dim=0) is input-independent -> hoist.
    w_arc32 = w_arc.astype(jnp.float32)
    w_norm = w_arc32 / jnp.maximum(
        jnp.sqrt(jnp.sum(w_arc32 * w_arc32, axis=0, keepdims=True)), 1e-12)
    wap = jnp.zeros((FEATURE_NUM, _CLS_PAD), jnp.float32)
    wap = wap.at[:, :CLS_NUM].set(w_norm)

    return FaceNetParams(wbp=wbp, wfp=wfp, wap=wap, in_dim=in_dim, tk=tk_eff)


def _facenet_kernel(x_ref, wb_ref, wf_ref, wa_ref, feat_ref, arc_ref, acc_ref,
                    *, s, cos_m, sin_m, cls_num):
    """Grid = (batch tiles, K tiles). Each K step accumulates a K-slice of the
    backbone matmul; the last K step runs the feature_net + Arcsoftmax epilogue."""
    k = pl.program_id(1)

    @pl.when(k == 0)
    def _init():
        acc_ref[...] = jnp.zeros_like(acc_ref)

    # Backbone stand-in: y += x[:, k*tk:(k+1)*tk] @ Wb[k*tk:(k+1)*tk, :]
    acc_ref[...] += jnp.dot(x_ref[...], wb_ref[...],
                            preferred_element_type=jnp.float32)

    @pl.when(k == pl.num_programs(1) - 1)
    def _epilogue():
        # feature_net: LeakyReLU(0.1) -> Linear(1000, 512, bias=False), f32.
        y = acc_ref[...]
        y = jnp.where(y >= 0.0, y, 0.1 * y)
        feat = jnp.dot(y, wf_ref[...], preferred_element_type=jnp.float32)
        feat_ref[...] = feat

        # Arcsoftmax(512, 12). wa_ref already holds F.normalize(w, dim=0)
        # (precomputed once in prepare_facenet_params), zero-padded to 128 cols.
        inv_norm = lax.rsqrt(
            jnp.maximum(jnp.sum(feat * feat, axis=1, keepdims=True), 1e-24))
        x_norm = feat * inv_norm                                   # F.normalize(x, dim=1)
        cosa = jnp.dot(x_norm, wa_ref[...],
                       preferred_element_type=jnp.float32) * 0.1   # matmul / 10
        # cos(acos(cosa) + m) == cosa*cos(m) - sqrt(1 - cosa^2)*sin(m)
        # (|cosa| <= 0.1 after the /10, so no clamp is needed)
        sina = jnp.sqrt(jnp.maximum(1.0 - cosa * cosa, 0.0))
        cos_am = cosa * cos_m - sina * sin_m

        e_am = jnp.exp((s * 10.0) * cos_am)
        e_a = jnp.exp((s * 10.0) * cosa)
        # Padded class columns (>= cls_num) must not contribute to the row sum.
        col = lax.broadcasted_iota(jnp.int32, e_a.shape, 1)
        e_a_valid = jnp.where(col < cls_num, e_a, 0.0)
        denom = jnp.sum(e_a_valid, axis=1, keepdims=True) - e_a + e_am
        # Exact division: the epilogue tile is tiny, parity > approx speed.
        arc_ref[...] = e_am / denom


def facenet_forward(x, params: FaceNetParams, s=1.0, m=1.0):
    """Returns (feature, arcsoftmax) just like FaceNet.forward(x)."""
    B = x.shape[0]
    x_flat = x.reshape(B, -1)
    assert x_flat.shape[1] == params.in_dim, "input spatial size mismatch"

    tk = params.tk
    k_pad = params.wbp.shape[0]
    k_tiles = k_pad // tk
    matmul_dtype = params.wbp.dtype

    # Batch padding / tiling: full sublane tiles, and batch tiles of <= 256
    # rows so the batch axis can be sharded across TensorCores (v7x megacore).
    b_pad = max(16, _round_up(B, 16))
    if b_pad > 256:
        b_pad = _round_up(b_pad, 256)
        tb = 256
    else:
        tb = b_pad
    b_tiles = b_pad // tb

    # Pad the activation directly in the matmul dtype (single copy, no f32
    # intermediate).
    xp = jnp.zeros((b_pad, k_pad), matmul_dtype)
    xp = xp.at[:B, :params.in_dim].set(x_flat.astype(matmul_dtype))

    kernel = functools.partial(
        _facenet_kernel,
        s=float(s),
        cos_m=float(math.cos(m)),
        sin_m=float(math.sin(m)),
        cls_num=CLS_NUM,
    )

    # Advisory cost estimate so XLA overlaps the wrapper-side padding with the
    # kernel's weight stream.
    itemsize = jnp.dtype(matmul_dtype).itemsize
    flops = (2 * b_pad * k_pad * _BACKBONE_PAD
             + 2 * b_pad * _BACKBONE_PAD * FEATURE_NUM
             + 2 * b_pad * FEATURE_NUM * _CLS_PAD)
    bytes_accessed = (b_pad * k_pad * itemsize                     # activations
                      + b_tiles * k_pad * _BACKBONE_PAD * itemsize  # wb (re-streamed per batch tile)
                      + _BACKBONE_PAD * FEATURE_NUM * 4             # wf
                      + FEATURE_NUM * _CLS_PAD * 4                  # wa
                      + b_pad * FEATURE_NUM * 4                     # feature out
                      + b_pad * _CLS_PAD * 4)                       # arcsoftmax out
    transcendentals = 2 * b_pad * _CLS_PAD
    cost = pl.CostEstimate(flops=flops, transcendentals=transcendentals,
                           bytes_accessed=bytes_accessed)

    feat_p, arc_p = pl.pallas_call(
        kernel,
        out_shape=(
            jax.ShapeDtypeStruct((b_pad, FEATURE_NUM), jnp.float32),
            jax.ShapeDtypeStruct((b_pad, _CLS_PAD), jnp.float32),
        ),
        grid_spec=pltpu.PrefetchScalarGridSpec(
            num_scalar_prefetch=0,
            grid=(b_tiles, k_tiles),
            in_specs=[
                pl.BlockSpec((tb, tk), lambda i, k: (i, k)),
                pl.BlockSpec((tk, _BACKBONE_PAD), lambda i, k: (k, 0)),
                pl.BlockSpec((_BACKBONE_PAD, FEATURE_NUM), lambda i, k: (0, 0)),
                pl.BlockSpec((FEATURE_NUM, _CLS_PAD), lambda i, k: (0, 0)),
            ],
            out_specs=(
                pl.BlockSpec((tb, FEATURE_NUM), lambda i, k: (i, 0)),
                pl.BlockSpec((tb, _CLS_PAD), lambda i, k: (i, 0)),
            ),
            scratch_shapes=[pltpu.VMEM((tb, _BACKBONE_PAD), jnp.float32)],
        ),
        compiler_params=pltpu.CompilerParams(
            # batch axis parallel (engages the 2nd TC on v7x for big batches),
            # K axis is the reduction.
            dimension_semantics=("parallel", "arbitrary"),
            # Explicit limit: needed on v5e (16 MiB default scoped VMEM),
            # leaves slack under v7x's 64 MiB physical VMEM even at tk=4096.
            vmem_limit_bytes=48 * 1024 * 1024,
        ),
        cost_estimate=cost,
    )(xp, params.wbp, params.wfp, params.wap)

    # Slice padding back off (padded class columns / batch rows are invalid).
    return feat_p[:B], arc_p[:B, :CLS_NUM]


def _reference_forward(x, w_backbone, w_feature, w_arc, s=1.0, m=1.0):
    """Pure-JAX f32 reference mirroring the PyTorch module (with the linear
    backbone stand-in)."""
    B = x.shape[0]
    xf = x.reshape(B, -1).astype(jnp.float32)
    y = xf @ w_backbone.astype(jnp.float32)
    y = jnp.where(y >= 0.0, y, 0.1 * y)
    feat = y @ w_feature.astype(jnp.float32)

    x_norm = feat / jnp.maximum(
        jnp.linalg.norm(feat, axis=1, keepdims=True), 1e-12)
    w32 = w_arc.astype(jnp.float32)
    w_norm = w32 / jnp.maximum(jnp.linalg.norm(w32, axis=0, keepdims=True), 1e-12)
    cosa = (x_norm @ w_norm) / 10.0
    a = jnp.arccos(cosa)
    e_am = jnp.exp(s * jnp.cos(a + m) * 10.0)
    e_a = jnp.exp(s * cosa * 10.0)
    arc = e_am / (jnp.sum(e_a, axis=1, keepdims=True) - e_a + e_am)
    return feat, arc


if __name__ == "__main__":
    key = jax.random.PRNGKey(0)
    k_x, k_wb, k_wf, k_wa = jax.random.split(key, 4)

    # Small input consistent with an NCHW image batch.
    B, C, H, W = 2, 4, 16, 16
    x = jax.random.normal(k_x, (B, C, H, W), dtype=jnp.float32)

    in_dim = C * H * W
    # Deterministic synthetic parameters (shapes follow the module __init__).
    w_backbone = 0.02 * jax.random.normal(k_wb, (in_dim, BACKBONE_OUT), jnp.float32)
    w_feature = 0.02 * jax.random.normal(k_wf, (BACKBONE_OUT, FEATURE_NUM), jnp.float32)
    # Arcsoftmax.w = torch.randn((feature_num, cls_num))
    w_arc = jax.random.normal(k_wa, (FEATURE_NUM, CLS_NUM), jnp.float32)

    # One-time weight preprocessing (pad / cast / normalize), then forward.
    params = prepare_facenet_params(w_backbone, w_feature, w_arc)
    feature, arcsoftmax = facenet_forward(x, params, s=1.0, m=1.0)
    jax.block_until_ready((feature, arcsoftmax))

    assert feature.shape == (B, FEATURE_NUM)
    assert arcsoftmax.shape == (B, CLS_NUM)
    assert bool(jnp.all(jnp.isfinite(feature)))
    assert bool(jnp.all(jnp.isfinite(arcsoftmax)))

    # Loose-tolerance parity check against the f32 reference (backbone operands
    # are bf16 in the kernel).
    feat_ref, arc_ref = _reference_forward(x, w_backbone, w_feature, w_arc,
                                           s=1.0, m=1.0)
    assert float(jnp.max(jnp.abs(feature - feat_ref))) < 1e-1
    assert float(jnp.max(jnp.abs(arcsoftmax - arc_ref))) < 1e-1

    print("KERNEL_OK")
</pallas_src>

<mosaic_0001>
module attributes {stable_mosaic.version = 11 : i64} {
  func.func @_facenet_kernel(%arg0: i32, %arg1: i32, %arg2: memref<16x1024xbf16, #tpu.memory_space<vmem>>, %arg3: memref<1024x1024xbf16, #tpu.memory_space<vmem>>, %arg4: memref<1024x512xf32, #tpu.memory_space<vmem>>, %arg5: memref<512x128xf32, #tpu.memory_space<vmem>>, %arg6: memref<16x512xf32, #tpu.memory_space<vmem>>, %arg7: memref<16x128xf32, #tpu.memory_space<vmem>>, %arg8: memref<16x1024xf32, #tpu.memory_space<vmem>>) attributes {dimension_semantics = [#tpu.dimension_semantics<parallel>, #tpu.dimension_semantics<arbitrary>], iteration_bounds = array<i64: 1, 1>, scalar_prefetch = 0 : i64, scratch_operands = 1 : i64, tpu.core_type = #tpu.core_type<tc>, window_params = [{transform_indices = @transform_0, window_bounds = array<i64: 16, 1024>}, {transform_indices = @transform_1, window_bounds = array<i64: 1024, 1024>}, {pipeline_mode = #tpu.pipeline_mode<synchronous>, transform_indices = @transform_2, window_bounds = array<i64: 1024, 512>}, {pipeline_mode = #tpu.pipeline_mode<synchronous>, transform_indices = @transform_3, window_bounds = array<i64: 512, 128>}, {transform_indices = @transform_4, window_bounds = array<i64: 16, 512>}, {transform_indices = @transform_5, window_bounds = array<i64: 16, 128>}]} {
    %c0_i32 = arith.constant 0 : i32
    %0 = arith.cmpi eq, %arg1, %c0_i32 : i32
    %1 = arith.extui %0 : i1 to i32
    %c0_i32_0 = arith.constant 0 : i32
    %2 = arith.cmpi ne, %1, %c0_i32_0 : i32
    scf.if %2 {
      %cst_10 = arith.constant 0.000000e+00 : f32
      %12 = vector.broadcast %cst_10 : f32 to vector<16x1024xf32>
      %c0_11 = arith.constant 0 : index
      %c0_12 = arith.constant 0 : index
      %13 = vector.load %arg8[%c0_11, %c0_12] : memref<16x1024xf32, #tpu.memory_space<vmem>>, vector<16x1024xf32>
      tpu.vector_store %arg8[%c0_11, %c0_12], %12 {strides = array<i32>} : memref<16x1024xf32, #tpu.memory_space<vmem>>, vector<16x1024xf32>,
    } else {
    }
    %c0 = arith.constant 0 : index
    %c0_1 = arith.constant 0 : index
    %3 = vector.load %arg8[%c0, %c0_1] : memref<16x1024xf32, #tpu.memory_space<vmem>>, vector<16x1024xf32>
    %c0_2 = arith.constant 0 : index
    %c0_3 = arith.constant 0 : index
    %4 = vector.load %arg2[%c0_2, %c0_3] : memref<16x1024xbf16, #tpu.memory_space<vmem>>, vector<16x1024xbf16>
    %c0_4 = arith.constant 0 : index
    %c0_5 = arith.constant 0 : index
    %5 = vector.load %arg3[%c0_4, %c0_5] : memref<1024x1024xbf16, #tpu.memory_space<vmem>>, vector<1024x1024xbf16>
    %cst = arith.constant dense<0.000000e+00> : vector<16x1024xf32>
    %6 = tpu.matmul %4, %5, %cst {dimension_numbers = #tpu.dot_dimension_numbers<[1], [0], [0], [1], [0, 0, 1, 1], [], []>} : vector<16x1024xbf16>, vector<1024x1024xbf16>, vector<16x1024xf32> -> vector<16x1024xf32>
    %7 = arith.addf %3, %6 : vector<16x1024xf32>
    %c0_6 = arith.constant 0 : index
    %c0_7 = arith.constant 0 : index
    %8 = vector.load %arg8[%c0_6, %c0_7] : memref<16x1024xf32, #tpu.memory_space<vmem>>, vector<16x1024xf32>
    tpu.vector_store %arg8[%c0_6, %c0_7], %7 {strides = array<i32>} : memref<16x1024xf32, #tpu.memory_space<vmem>>, vector<16x1024xf32>,
    %c0_i32_8 = arith.constant 0 : i32
    %9 = arith.cmpi eq, %arg1, %c0_i32_8 : i32
    %10 = arith.extui %9 : i1 to i32
    %c0_i32_9 = arith.constant 0 : i32
    %11 = arith.cmpi ne, %10, %c0_i32_9 : i32
    scf.if %11 {
      %c0_10 = arith.constant 0 : index
      %c0_11 = arith.constant 0 : index
      %12 = vector.load %arg8[%c0_10, %c0_11] : memref<16x1024xf32, #tpu.memory_space<vmem>>, vector<16x1024xf32>
      %cst_12 = arith.constant 0.000000e+00 : f32
      %13 = vector.broadcast %cst_12 : f32 to vector<16x1024xf32>
      %14 = arith.cmpf oge, %12, %13 : vector<16x1024xf32>
      %cst_13 = arith.constant 1.000000e-01 : f32
      %15 = vector.broadcast %cst_13 : f32 to vector<16x1024xf32>
      %16 = arith.mulf %15, %12 : vector<16x1024xf32>
      %17 = arith.select %14, %12, %16 : vector<16x1024xi1>, vector<16x1024xf32>
      %c0_14 = arith.constant 0 : index
      %c0_15 = arith.constant 0 : index
      %18 = vector.load %arg4[%c0_14, %c0_15] : memref<1024x512xf32, #tpu.memory_space<vmem>>, vector<1024x512xf32>
      %cst_16 = arith.constant dense<0.000000e+00> : vector<16x512xf32>
      %19 = tpu.matmul %17, %18, %cst_16 {dimension_numbers = #tpu.dot_dimension_numbers<[1], [0], [0], [1], [0, 0, 1, 1], [], []>} : vector<16x1024xf32>, vector<1024x512xf32>, vector<16x512xf32> -> vector<16x512xf32>
      %c0_17 = arith.constant 0 : index
      %c0_18 = arith.constant 0 : index
      %20 = vector.load %arg6[%c0_17, %c0_18] : memref<16x512xf32, #tpu.memory_space<vmem>>, vector<16x512xf32>
      tpu.vector_store %arg6[%c0_17, %c0_18], %19 {strides = array<i32>} : memref<16x512xf32, #tpu.memory_space<vmem>>, vector<16x512xf32>,
      %21 = arith.mulf %19, %19 : vector<16x512xf32>
      %cst_19 = arith.constant dense<0.000000e+00> : vector<16xf32>
      %22 = vector.multi_reduction <add>, %21, %cst_19 [1] : vector<16x512xf32> to vector<16xf32>
      %23 = vector.shape_cast %22 : vector<16xf32> to vector<16x1xf32>
      %cst_20 = arith.constant 1.000000e-24 : f32
      %24 = vector.broadcast %cst_20 : f32 to vector<16x1xf32>
      %25 = arith.maximumf %23, %24 : vector<16x1xf32>
      %26 = math.rsqrt %25 : vector<16x1xf32>
      %27 = vector.broadcast %26 : vector<16x1xf32> to vector<16x512xf32>
      %28 = arith.mulf %19, %27 : vector<16x512xf32>
      %c0_21 = arith.constant 0 : index
      %c0_22 = arith.constant 0 : index
      %29 = vector.load %arg5[%c0_21, %c0_22] : memref<512x128xf32, #tpu.memory_space<vmem>>, vector<512x128xf32>
      %cst_23 = arith.constant dense<0.000000e+00> : vector<16x128xf32>
      %30 = tpu.matmul %28, %29, %cst_23 {dimension_numbers = #tpu.dot_dimension_numbers<[1], [0], [0], [1], [0, 0, 1, 1], [], []>} : vector<16x512xf32>, vector<512x128xf32>, vector<16x128xf32> -> vector<16x128xf32>
      %cst_24 = arith.constant 1.000000e-01 : f32
      %31 = vector.broadcast %cst_24 : f32 to vector<16x128xf32>
      %32 = arith.mulf %30, %31 : vector<16x128xf32>
      %33 = arith.mulf %32, %32 : vector<16x128xf32>
      %cst_25 = arith.constant 1.000000e+00 : f32
      %34 = vector.broadcast %cst_25 : f32 to vector<16x128xf32>
      %35 = arith.subf %34, %33 : vector<16x128xf32>
      %cst_26 = arith.constant 0.000000e+00 : f32
      %36 = vector.broadcast %cst_26 : f32 to vector<16x128xf32>
      %37 = arith.maximumf %35, %36 : vector<16x128xf32>
      %38 = math.sqrt %37 : vector<16x128xf32>
      %cst_27 = arith.constant 0.540302277 : f32
      %39 = vector.broadcast %cst_27 : f32 to vector<16x128xf32>
      %40 = arith.mulf %32, %39 : vector<16x128xf32>
      %cst_28 = arith.constant 0.841470957 : f32
      %41 = vector.broadcast %cst_28 : f32 to vector<16x128xf32>
      %42 = arith.mulf %38, %41 : vector<16x128xf32>
      %43 = arith.subf %40, %42 : vector<16x128xf32>
      %cst_29 = arith.constant 1.000000e+01 : f32
      %44 = vector.broadcast %cst_29 : f32 to vector<16x128xf32>
      %45 = arith.mulf %44, %43 : vector<16x128xf32>
      %46 = math.exp %45 : vector<16x128xf32>
      %cst_30 = arith.constant 1.000000e+01 : f32
      %47 = vector.broadcast %cst_30 : f32 to vector<16x128xf32>
      %48 = arith.mulf %47, %32 : vector<16x128xf32>
      %49 = math.exp %48 : vector<16x128xf32>
      %50 = tpu.iota {dimensions = array<i32: 1>} : vector<16x128xi32>
      %c12_i32 = arith.constant 12 : i32
      %51 = vector.broadcast %c12_i32 : i32 to vector<16x128xi32>
      %52 = arith.cmpi slt, %50, %51 : vector<16x128xi32>
      %cst_31 = arith.constant 0.000000e+00 : f32
      %53 = vector.broadcast %cst_31 : f32 to vector<16x128xf32>
      %54 = arith.select %52, %49, %53 : vector<16x128xi1>, vector<16x128xf32>
      %cst_32 = arith.constant dense<0.000000e+00> : vector<16xf32>
      %55 = vector.multi_reduction <add>, %54, %cst_32 [1] : vector<16x128xf32> to vector<16xf32>
      %56 = vector.shape_cast %55 : vector<16xf32> to vector<16x1xf32>
      %57 = vector.broadcast %56 : vector<16x1xf32> to vector<16x128xf32>
      %58 = arith.subf %57, %49 : vector<16x128xf32>
      %59 = arith.addf %58, %46 : vector<16x128xf32>
      %60 = arith.divf %46, %59 : vector<16x128xf32>
      %c0_33 = arith.constant 0 : index
      %c0_34 = arith.constant 0 : index
      %61 = vector.load %arg7[%c0_33, %c0_34] : memref<16x128xf32, #tpu.memory_space<vmem>>, vector<16x128xf32>
      tpu.vector_store %arg7[%c0_33, %c0_34], %60 {strides = array<i32>} : memref<16x128xf32, #tpu.memory_space<vmem>>, vector<16x128xf32>,
    } else {
    }
    return
  }
  func.func @transform_0(%arg0: i32, %arg1: i32) -> (i32, i32) {
    %c0_i32 = arith.constant 0 : i32
    return %arg0, %arg1 : i32, i32
  }
  func.func @transform_1(%arg0: i32, %arg1: i32) -> (i32, i32) {
    %c0_i32 = arith.constant 0 : i32
    %c0_i32_0 = arith.constant 0 : i32
    return %arg1, %c0_i32 : i32, i32
  }
  func.func @transform_2(%arg0: i32, %arg1: i32) -> (i32, i32) {
    %c0_i32 = arith.constant 0 : i32
    %c0_i32_0 = arith.constant 0 : i32
    %c0_i32_1 = arith.constant 0 : i32
    return %c0_i32, %c0_i32_0 : i32, i32
  }
  func.func @transform_3(%arg0: i32, %arg1: i32) -> (i32, i32) {
    %c0_i32 = arith.constant 0 : i32
    %c0_i32_0 = arith.constant 0 : i32
    %c0_i32_1 = arith.constant 0 : i32
    return %c0_i32, %c0_i32_0 : i32, i32
  }
  func.func @transform_4(%arg0: i32, %arg1: i32) -> (i32, i32) {
    %c0_i32 = arith.constant 0 : i32
    %c0_i32_0 = arith.constant 0 : i32
    return %arg0, %c0_i32 : i32, i32
  }
  func.func @transform_5(%arg0: i32, %arg1: i32) -> (i32, i32) {
    %c0_i32 = arith.constant 0 : i32
    %c0_i32_0 = arith.constant 0 : i32
    return %arg0, %c0_i32 : i32, i32
  }
}

</mosaic_0001>

<bundles_post_ra>
// kernel: tpu_custom_call.1
= control target key start
LH: loop header
LB: loop body
LE: loop exit
PB: predicated region body
PF: predicated region fallthrough
CT: control target
= control target key end

     0   :  { %11 = vsyncpa [#allocation4], 0  ;;  %s6608_s0 = inlined_call_operand.hbm [shape: bf16[16,1024], index: 0, kind: input, shape index: {}]   ;;  %s6609_s1 = inlined_call_operand.hbm [shape: bf16[1024,1024], index: 1, kind: input, shape index: {}]   ;;  %s6610_s2 = inlined_call_operand.hbm [shape: f32[1024,512], index: 2, kind: input, shape index: {}]   ;;  %s6611_s3 = inlined_call_operand.hbm [shape: f32[512,128], index: 3, kind: input, shape index: {}]   ;;  %s6612_s4 = inlined_call_operand.hbm [shape: f32[16,512], index: 4, kind: output, shape index: {0}]   ;;  %s6613_s5 = inlined_call_operand.hbm [shape: f32[16,128], index: 5, kind: output, shape index: {1}]  }
   0x1   :  { %12 = vsyncpa [#allocation7], 0 }
   0x2   :  { %13 = vsyncpa [#allocation10], 0 }
   0x3   :  { %14 = vsyncpa [#allocation5], 0 }
   0x4   :  { %15 = vsyncpa [#allocation13], 0  ;;  %s6249_s18 = smov [#allocation6]   ;;  %s6250_s20 = smov [#allocation3]  }
   0x5   :  { %s33_s19 = sshll.u32 %s6249_s18, 4  ;;  %s21_s21 = sshll.u32 %s6250_s20, 4  ;;  %s34_s19 = int_to_ptr.vmem [resolvable:$true] %s33_s19  ;;  %s22_s21 = int_to_ptr.vmem [resolvable:$true] %s21_s21 }
   0x6   :  { %s6127_s22 = scalar_lea.vmem %s34_s19, 65536  ;;  %p6132_p1 = scmp.lt.s32.totalorder %s34_s19, %s34_s19 }
   0x7   :  { %p6128_p0 = scmp.ne.s32.totalorder %s34_s19, %s6127_s22  ;;  %p6133_p2 = scmp.lt.s32.totalorder %s6127_s22, %s6127_s22 }
   0x9   :  { %p6134_p3 = por %p6133_p2, %p6132_p1 }
   0xb   :  { %p6135_p4 = pnand %p6134_p3, %p6128_p0 }
   0xd   :  { %6138 = shalt.err (!%p6135_p4)
}
   0xe   :  { %s6251_s23 = smov 512   ;;  %s6252_s24 = smov 32  }
   0xf   :  { %39 = dma.hbm_to_vmem [thread:$0]  %s6609_s1, 65536, %s34_s19, [#allocation7], %s6251_s23, %s6251_s23, %s6252_s24  }
  0x10   :  { %s6147_s27 = scalar_lea.vmem %s22_s21, 1024  ;;  %p6152_p6 = scmp.lt.s32.totalorder %s22_s21, %s22_s21 }
  0x11   :  { %p6148_p5 = scmp.ne.s32.totalorder %s22_s21, %s6147_s27  ;;  %p6153_p7 = scmp.lt.s32.totalorder %s6147_s27, %s6147_s27 }
  0x13   :  { %p6154_p8 = por %p6153_p7, %p6152_p6 }
  0x15   :  { %p6155_p9 = pnand %p6154_p8, %p6148_p5 }
  0x17   :  { %6158 = shalt.err (!%p6155_p9)
}
  0x18   :  { %27 = dma.hbm_to_vmem [thread:$0]  %s6608_s0, 1024, %s22_s21, [#allocation4], %s6251_s23, %s6251_s23, %s6252_s24  }
  0x19   :  { %s6253_s30 = smov [#allocation8]   ;;  %s6254_s7 = smov [#allocation9]  }
  0x1a   :  { %s45_s6 = sshll.u32 %s6253_s30, 4  ;;  %s57_s8 = sshll.u32 %s6254_s7, 4  ;;  %s46_s6 = int_to_ptr.vmem [resolvable:$true] %s45_s6  ;;  %s58_s8 = int_to_ptr.vmem [resolvable:$true] %s57_s8 }
  0x1b   :  { %s6167_s1 = scalar_lea.vmem %s46_s6, 65536  ;;  %p6172_p11 = scmp.lt.s32.totalorder %s46_s6, %s46_s6 }
  0x1c   :  { %p6168_p10 = scmp.ne.s32.totalorder %s46_s6, %s6167_s1  ;;  %p6173_p12 = scmp.lt.s32.totalorder %s6167_s1, %s6167_s1 }
  0x1e   :  { %p6174_p13 = por %p6173_p12, %p6172_p11 }
  0x20   :  { %p6175_p0 = pnand %p6174_p13, %p6168_p10 }
  0x22   :  { %6178 = shalt.err (!%p6175_p0)
}
  0x23   :  { %51 = dma.hbm_to_vmem [thread:$0]  %s6610_s2, 65536, %s46_s6, [#allocation7], %s6251_s23, %s6251_s23, %s6252_s24  }
  0x24   :  { %s6187_s0 = scalar_lea.vmem %s58_s8, 8192  ;;  %p6192_p2 = scmp.lt.s32.totalorder %s58_s8, %s58_s8 }
  0x25   :  { %p6188_p1 = scmp.ne.s32.totalorder %s58_s8, %s6187_s0  ;;  %p6193_p3 = scmp.lt.s32.totalorder %s6187_s0, %s6187_s0 }
  0x27   :  { %p6194_p4 = por %p6193_p3, %p6192_p2 }
  0x29   :  { %p6195_p5 = pnand %p6194_p4, %p6188_p1 }
  0x2b   :  { %6198 = shalt.err (!%p6195_p5)
}
  0x2c   :  { %s6255_s11 = smov 128   ;;  %s6256_s12 = smov 8  }
  0x2d   :  { %63 = dma.hbm_to_vmem [thread:$0]  %s6611_s3, 8192, %s58_s8, [#allocation10], %s6255_s11, %s6255_s11, %s6256_s12  }
  0x2e   :  { %6239 = dma.done.wait [#allocation4], 1024  }
  0x2f   :  { %6240 = vsyncadd [#allocation4], 4294966272 }
  0x30   :  { %6241 = dma.done.wait [#allocation7], 131072  }
  0x31   :  { %6242 = vsyncadd [#allocation7], 4294836224 }
  0x32   :  { %6243 = dma.done.wait [#allocation10], 8192  }
  0x33   :  { %6244 = vsyncadd [#allocation10], 4294959104  ;;  %v176_v0 = vld [vmem:[#allocation6 + $0x1c0] sm:$0xff]  ;;  %v6321_v59 = vld [vmem:[#allocation3 + $0x8] sm:$0xff]  ;;  %s6257_s2 = smov [#allocation11]  }
  0x34   :  { %v180_v1 = vld [vmem:[#allocation6 + $0x1e0] sm:$0xff]  ;;  %v6323_v60 = vld [vmem:[#allocation3 + $0x28] sm:$0xff]  ;;  %s5463_s3 = sshll.u32 %s6257_s2, 4  ;;  %s5464_s3 = int_to_ptr.vmem [resolvable:$true] %s5463_s3 }
  0x35   :  { %v304_v2 = vld [vmem:[#allocation6 + $0x5c0] sm:$0xff]  ;;  %v5558_v3 = vcombine.high %v176_v0, %v180_v1  ;;  %v5557_v5 = vcombine.low %v176_v0, %v180_v1  ;;  %v6327_v63 = vcombine.high %v6321_v59, %v6323_v60  ;;  %s6199_s15 = scalar_lea.vmem %s5464_s3, 1024  ;;  %p6204_p7 = scmp.lt.s32.totalorder %s5464_s3, %s5464_s3 }
  0x36   :  { %v308_v4 = vld [vmem:[#allocation6 + $0x5e0] sm:$0xff]  ;;  %p6200_p6 = scmp.ne.s32.totalorder %s5464_s3, %s6199_s15  ;;  %p6205_p8 = scmp.lt.s32.totalorder %s6199_s15, %s6199_s15 }
  0x37   :  { %v168_v6 = vld [vmem:[#allocation6 + $0x180] sm:$0xff]  ;;  %v5686_v8 = vcombine.high %v304_v2, %v308_v4  ;;  %v5685_v9 = vcombine.low %v304_v2, %v308_v4  ;;  %3232 = vmatprep.subr.bf16.mxu0 %v5558_v3  ;;  %3307 = vmatprep.mubr.bf16.mxu1 %v6327_v63 }
  0x38   :  { %v172_v7 = vld [vmem:[#allocation6 + $0x1a0] sm:$0xff]  ;;  %3233 = vmatpush1.bf16.msra.mxu0 %v5557_v5  ;;  %p6206_p9 = por %p6205_p8, %p6204_p7 }
  0x39   :  { %v5550_v10 = vcombine.high %v168_v6, %v172_v7  ;;  %v296_v11 = vld [vmem:[#allocation6 + $0x580] sm:$0xff]  ;;  %3275 = vmatprep.subr.bf16.mxu1 %v5686_v8  ;;  %v5549_v18 = vcombine.low %v168_v6, %v172_v7 }
  0x3a   :  { %v300_v12 = vld [vmem:[#allocation6 + $0x5a0] sm:$0xff]  ;;  %3276 = vmatpush1.bf16.msra.mxu1 %v5685_v9  ;;  %p6207_p10 = pnand %p6206_p9, %p6200_p6 }
  0x3b   :  { %v160_v13 = vld [vmem:[#allocation6 + $0x140] sm:$0xff]  ;;  %v5678_v14 = vcombine.high %v296_v11, %v300_v12  ;;  %3234 = vmatprep.subr.bf16.mxu0 %v5550_v10  ;;  %v5677_v19 = vcombine.low %v296_v11, %v300_v12 }
  0x3c   :  { %v164_v15 = vld [vmem:[#allocation6 + $0x160] sm:$0xff]  ;;  %3235 = vmatpush1.bf16.msra.mxu0 %v5549_v18 }
  0x3d   :  { %v288_v16 = vld [vmem:[#allocation6 + $0x540] sm:$0xff]  ;;  %v5542_v20 = vcombine.high %v160_v13, %v164_v15  ;;  %3277 = vmatprep.subr.bf16.mxu1 %v5678_v14  ;;  %v5541_v26 = vcombine.low %v160_v13, %v164_v15 }
  0x3e   :  { %v292_v17 = vld [vmem:[#allocation6 + $0x560] sm:$0xff]  ;;  %3278 = vmatpush1.bf16.msra.mxu1 %v5677_v19 }
  0x3f   :  { %v5670_v21 = vcombine.high %v288_v16, %v292_v17  ;;  %v152_v22 = vld [vmem:[#allocation6 + $0x100] sm:$0xff]  ;;  %3236 = vmatprep.subr.bf16.mxu0 %v5542_v20  ;;  %v5669_v27 = vcombine.low %v288_v16, %v292_v17 }
  0x40   :  { %v156_v23 = vld [vmem:[#allocation6 + $0x120] sm:$0xff]  ;;  %3237 = vmatpush1.bf16.msra.mxu0 %v5541_v26 }
  0x41   :  { %v280_v24 = vld [vmem:[#allocation6 + $0x500] sm:$0xff]  ;;  %v5534_v28 = vcombine.high %v152_v22, %v156_v23  ;;  %3279 = vmatprep.subr.bf16.mxu1 %v5670_v21  ;;  %v5533_v34 = vcombine.low %v152_v22, %v156_v23 }
  0x42   :  { %v284_v25 = vld [vmem:[#allocation6 + $0x520] sm:$0xff]  ;;  %3280 = vmatpush1.bf16.msra.mxu1 %v5669_v27 }
  0x43   :  { %v5662_v29 = vcombine.high %v280_v24, %v284_v25  ;;  %v144_v30 = vld [vmem:[#allocation6 + $0xc0] sm:$0xff]  ;;  %3238 = vmatprep.subr.bf16.mxu0 %v5534_v28  ;;  %v5661_v35 = vcombine.low %v280_v24, %v284_v25 }
  0x44   :  { %v148_v31 = vld [vmem:[#allocation6 + $0xe0] sm:$0xff]  ;;  %3239 = vmatpush1.bf16.msra.mxu0 %v5533_v34 }
  0x45   :  { %v272_v32 = vld [vmem:[#allocation6 + $0x4c0] sm:$0xff]  ;;  %v5526_v36 = vcombine.high %v144_v30, %v148_v31  ;;  %3281 = vmatprep.subr.bf16.mxu1 %v5662_v29  ;;  %v5525_v42 = vcombine.low %v144_v30, %v148_v31 }
  0x46   :  { %v276_v33 = vld [vmem:[#allocation6 + $0x4e0] sm:$0xff]  ;;  %3282 = vmatpush1.bf16.msra.mxu1 %v5661_v35 }
  0x47   :  { %v5654_v37 = vcombine.high %v272_v32, %v276_v33  ;;  %v136_v38 = vld [vmem:[#allocation6 + $0x80] sm:$0xff]  ;;  %3240 = vmatprep.subr.bf16.mxu0 %v5526_v36  ;;  %v5653_v43 = vcombine.low %v272_v32, %v276_v33 }
  0x48   :  { %v140_v39 = vld [vmem:[#allocation6 + $0xa0] sm:$0xff]  ;;  %3241 = vmatpush1.bf16.msra.mxu0 %v5525_v42 }
  0x49   :  { %v264_v40 = vld [vmem:[#allocation6 + $0x480] sm:$0xff]  ;;  %v5518_v44 = vcombine.high %v136_v38, %v140_v39  ;;  %3283 = vmatprep.subr.bf16.mxu1 %v5654_v37  ;;  %v5517_v50 = vcombine.low %v136_v38, %v140_v39 }
  0x4a   :  { %v268_v41 = vld [vmem:[#allocation6 + $0x4a0] sm:$0xff]  ;;  %3284 = vmatpush1.bf16.msra.mxu1 %v5653_v43 }
  0x4b   :  { %v5646_v45 = vcombine.high %v264_v40, %v268_v41  ;;  %v128_v46 = vld [vmem:[#allocation6 + $0x40] sm:$0xff]  ;;  %3242 = vmatprep.subr.bf16.mxu0 %v5518_v44  ;;  %v5645_v51 = vcombine.low %v264_v40, %v268_v41 }
  0x4c   :  { %v132_v47 = vld [vmem:[#allocation6 + $0x60] sm:$0xff]  ;;  %3243 = vmatpush1.bf16.msra.mxu0 %v5517_v50 }
  0x4d   :  { %v256_v48 = vld [vmem:[#allocation6 + $0x440] sm:$0xff]  ;;  %v5510_v52 = vcombine.high %v128_v46, %v132_v47  ;;  %3285 = vmatprep.subr.bf16.mxu1 %v5646_v45  ;;  %v5509_v0 = vcombine.low %v128_v46, %v132_v47 }
  0x4e   :  { %v260_v49 = vld [vmem:[#allocation6 + $0x460] sm:$0xff]  ;;  %3286 = vmatpush1.bf16.msra.mxu1 %v5645_v51 }
  0x4f   :  { %v120_v53 = vld [vmem:[#allocation6] sm:$0xff]  ;;  %v5638_v56 = vcombine.high %v256_v48, %v260_v49  ;;  %3244 = vmatprep.subr.bf16.mxu0 %v5510_v52  ;;  %v5637_v1 = vcombine.low %v256_v48, %v260_v49 }
  0x50   :  { %v6313_v54 = vld [vmem:[#allocation3] sm:$0xff]  ;;  %3245 = vmatpush1.bf16.msra.mxu0 %v5509_v0 }
  0x51   :  { %v6315_v55 = vld [vmem:[#allocation3 + $0x20] sm:$0xff]  ;;  %3287 = vmatprep.subr.bf16.mxu1 %v5638_v56 }
  0x52   :  { %v124_v57 = vld [vmem:[#allocation6 + $0x20] sm:$0xff]  ;;  %v6319_v58 = vcombine.high %v6313_v54, %v6315_v55  ;;  %3288 = vmatpush1.bf16.msra.mxu1 %v5637_v1 }
  0x53   :  { %v248_v61 = vld [vmem:[#allocation6 + $0x400] sm:$0xff]  ;;  %v5502_v2 = vcombine.high %v120_v53, %v124_v57  ;;  %v5501_v8 = vcombine.low %v120_v53, %v124_v57 }
  0x54   :  { %v252_v62 = vld [vmem:[#allocation6 + $0x420] sm:$0xff]  ;;  %3264 = vmatprep.mubr.bf16.mxu0 %v6319_v58 }
  0x55   :  { %v5630_v3 = vcombine.high %v248_v61, %v252_v62  ;;  %v240_v4 = vld [vmem:[#allocation6 + $0x3c0] sm:$0xff]  ;;  %3246 = vmatprep.subr.bf16.mxu0 %v5502_v2  ;;  %v5629_v9 = vcombine.low %v248_v61, %v252_v62 }
  0x56   :  { %v244_v5 = vld [vmem:[#allocation6 + $0x3e0] sm:$0xff]  ;;  %3247 = vmatpush1.bf16.msra.mxu0 %v5501_v8 }
  0x57   :  { %v368_v6 = vld [vmem:[#allocation6 + $0x7c0] sm:$0xff]  ;;  %v5622_v10 = vcombine.high %v240_v4, %v244_v5  ;;  %3289 = vmatprep.subr.bf16.mxu1 %v5630_v3  ;;  %v5621_v16 = vcombine.low %v240_v4, %v244_v5 }
  0x58   :  { %v372_v7 = vld [vmem:[#allocation6 + $0x7e0] sm:$0xff]  ;;  %3290 = vmatpush1.bf16.msra.mxu1 %v5629_v9 }
  0x59   :  { %v5750_v11 = vcombine.high %v368_v6, %v372_v7  ;;  %v232_v12 = vld [vmem:[#allocation6 + $0x380] sm:$0xff]  ;;  %3248 = vmatprep.subr.bf16.mxu0 %v5622_v10  ;;  %v5749_v17 = vcombine.low %v368_v6, %v372_v7 }
  0x5a   :  { %v236_v13 = vld [vmem:[#allocation6 + $0x3a0] sm:$0xff]  ;;  %3249 = vmatpush2.bf16.msra.mxu0 %v5621_v16 }
  0x5b   :  { %v360_v14 = vld [vmem:[#allocation6 + $0x780] sm:$0xff]  ;;  %v5614_v18 = vcombine.high %v232_v12, %v236_v13  ;;  %3291 = vmatprep.subr.bf16.mxu1 %v5750_v11  ;;  %v5613_v24 = vcombine.low %v232_v12, %v236_v13 }
  0x5c   :  { %v364_v15 = vld [vmem:[#allocation6 + $0x7a0] sm:$0xff]  ;;  %3292 = vmatpush2.bf16.msra.mxu1 %v5749_v17 }
  0x5d   :  { %v5742_v19 = vcombine.high %v360_v14, %v364_v15  ;;  %v224_v20 = vld [vmem:[#allocation6 + $0x340] sm:$0xff]  ;;  %3250 = vmatprep.subr.bf16.mxu0 %v5614_v18  ;;  %v5741_v25 = vcombine.low %v360_v14, %v364_v15 }
  0x5e   :  { %v228_v21 = vld [vmem:[#allocation6 + $0x360] sm:$0xff]  ;;  %3251 = vmatpush2.bf16.msra.mxu0 %v5613_v24  ;;  %v6337_v24 = vld [vmem:[#allocation3 + $0x30] sm:$0xff] }
  0x5f   :  { %v352_v22 = vld [vmem:[#allocation6 + $0x740] sm:$0xff]  ;;  %v5606_v26 = vcombine.high %v224_v20, %v228_v21  ;;  %3293 = vmatprep.subr.bf16.mxu1 %v5742_v19  ;;  %v5605_v32 = vcombine.low %v224_v20, %v228_v21  ;;  %v6333_v21 = vcombine.low %v6313_v54, %v6315_v55 }
  0x60   :  { %v356_v23 = vld [vmem:[#allocation6 + $0x760] sm:$0xff]  ;;  %3294 = vmatpush2.bf16.msra.mxu1 %v5741_v25  ;;  %v6341_v25 = vcombine.low %v6321_v59, %v6323_v60 }
  0x61   :  { %v5734_v27 = vcombine.high %v352_v22, %v356_v23  ;;  %v216_v28 = vld [vmem:[#allocation6 + $0x300] sm:$0xff]  ;;  %3252 = vmatprep.subr.bf16.mxu0 %v5606_v26  ;;  %v5733_v33 = vcombine.low %v352_v22, %v356_v23  ;;  %v6335_v23 = vld [vmem:[#allocation3 + $0x10] sm:$0xff] }
  0x62   :  { %v220_v29 = vld [vmem:[#allocation6 + $0x320] sm:$0xff]  ;;  %3253 = vmatpush2.bf16.msra.mxu0 %v5605_v32  ;;  %v6349_v32 = vcombine.high %v6335_v23, %v6337_v24 }
  0x63   :  { %v344_v30 = vld [vmem:[#allocation6 + $0x700] sm:$0xff]  ;;  %v5598_v34 = vcombine.high %v216_v28, %v220_v29  ;;  %3295 = vmatprep.subr.bf16.mxu1 %v5734_v27  ;;  %v5597_v40 = vcombine.low %v216_v28, %v220_v29  ;;  %v6343_v27 = vld [vmem:[#allocation3 + $0x18] sm:$0xff] }
  0x64   :  { %v348_v31 = vld [vmem:[#allocation6 + $0x720] sm:$0xff]  ;;  %3296 = vmatpush2.bf16.msra.mxu1 %v5733_v33  ;;  %v6345_v28 = vld [vmem:[#allocation3 + $0x38] sm:$0xff] }
  0x65   :  { %v5726_v35 = vcombine.high %v344_v30, %v348_v31  ;;  %v208_v36 = vld [vmem:[#allocation6 + $0x2c0] sm:$0xff]  ;;  %3254 = vmatprep.subr.bf16.mxu0 %v5598_v34  ;;  %v5725_v41 = vcombine.low %v344_v30, %v348_v31  ;;  %v6354_v33 = vcombine.high %v6343_v27, %v6345_v28 }
  0x66   :  { %v212_v37 = vld [vmem:[#allocation6 + $0x2e0] sm:$0xff]  ;;  %3255 = vmatpush2.bf16.msra.mxu0 %v5597_v40 }
  0x67   :  { %v336_v38 = vld [vmem:[#allocation6 + $0x6c0] sm:$0xff]  ;;  %v5590_v42 = vcombine.high %v208_v36, %v212_v37  ;;  %3297 = vmatprep.subr.bf16.mxu1 %v5726_v35  ;;  %v5589_v48 = vcombine.low %v208_v36, %v212_v37 }
  0x68   :  { %v340_v39 = vld [vmem:[#allocation6 + $0x6e0] sm:$0xff]  ;;  %3298 = vmatpush2.bf16.msra.mxu1 %v5725_v41 }
  0x69   :  { %v5718_v43 = vcombine.high %v336_v38, %v340_v39  ;;  %v200_v44 = vld [vmem:[#allocation6 + $0x280] sm:$0xff]  ;;  %3256 = vmatprep.subr.bf16.mxu0 %v5590_v42  ;;  %v5717_v49 = vcombine.low %v336_v38, %v340_v39 }
  0x6a   :  { %v204_v45 = vld [vmem:[#allocation6 + $0x2a0] sm:$0xff]  ;;  %3257 = vmatpush2.bf16.msra.mxu0 %v5589_v48 }
  0x6b   :  { %v328_v46 = vld [vmem:[#allocation6 + $0x680] sm:$0xff]  ;;  %v5582_v50 = vcombine.high %v200_v44, %v204_v45  ;;  %3299 = vmatprep.subr.bf16.mxu1 %v5718_v43  ;;  %v5581_v61 = vcombine.low %v200_v44, %v204_v45 }
  0x6c   :  { %v332_v47 = vld [vmem:[#allocation6 + $0x6a0] sm:$0xff]  ;;  %3300 = vmatpush2.bf16.msra.mxu1 %v5717_v49 }
  0x6d   :  { %v5710_v51 = vcombine.high %v328_v46, %v332_v47  ;;  %v192_v52 = vld [vmem:[#allocation6 + $0x240] sm:$0xff]  ;;  %3258 = vmatprep.subr.bf16.mxu0 %v5582_v50  ;;  %v5709_v62 = vcombine.low %v328_v46, %v332_v47 }
  0x6e   :  { %v196_v53 = vld [vmem:[#allocation6 + $0x260] sm:$0xff]  ;;  %3259 = vmatpush2.bf16.msra.mxu0 %v5581_v61 }
  0x6f   :  { %v320_v56 = vld [vmem:[#allocation6 + $0x640] sm:$0xff]  ;;  %v5574_v0 = vcombine.high %v192_v52, %v196_v53  ;;  %3301 = vmatprep.subr.bf16.mxu1 %v5710_v51  ;;  %v5573_v6 = vcombine.low %v192_v52, %v196_v53 }
  0x70   :  { %v324_v57 = vld [vmem:[#allocation6 + $0x660] sm:$0xff]  ;;  %3302 = vmatpush2.bf16.msra.mxu1 %v5709_v62 }
  0x71   :  { %v5702_v1 = vcombine.high %v320_v56, %v324_v57  ;;  %v184_v2 = vld [vmem:[#allocation6 + $0x200] sm:$0xff]  ;;  %3260 = vmatprep.subr.bf16.mxu0 %v5574_v0  ;;  %v5701_v7 = vcombine.low %v320_v56, %v324_v57 }
  0x72   :  { %v188_v3 = vld [vmem:[#allocation6 + $0x220] sm:$0xff]  ;;  %3261 = vmatpush2.bf16.msra.mxu0 %v5573_v6 }
  0x73   :  { %v312_v4 = vld [vmem:[#allocation6 + $0x600] sm:$0xff]  ;;  %v5566_v8 = vcombine.high %v184_v2, %v188_v3  ;;  %3303 = vmatprep.subr.bf16.mxu1 %v5702_v1  ;;  %v5565_v14 = vcombine.low %v184_v2, %v188_v3 }
  0x74   :  { %v316_v5 = vld [vmem:[#allocation6 + $0x620] sm:$0xff]  ;;  %3304 = vmatpush2.bf16.msra.mxu1 %v5701_v7 }
  0x75   :  { %v5694_v9 = vcombine.high %v312_v4, %v316_v5  ;;  %v432_v10 = vld [vmem:[#allocation6 + $0x9c0] sm:$0xff]  ;;  %3262 = vmatprep.subr.bf16.mxu0 %v5566_v8  ;;  %v5693_v15 = vcombine.low %v312_v4, %v316_v5 }
  0x76   :  { %v436_v11 = vld [vmem:[#allocation6 + $0x9e0] sm:$0xff]  ;;  %3263 = vmatpush2.bf16.msra.mxu0 %v5565_v14 }
  0x77   :  { %v560_v12 = vld [vmem:[#allocation6 + $0xdc0] sm:$0xff]  ;;  %v5814_v16 = vcombine.high %v432_v10, %v436_v11  ;;  %3305 = vmatprep.subr.bf16.mxu1 %v5694_v9  ;;  %v5813_v26 = vcombine.low %v432_v10, %v436_v11 }
  0x78   :  { %v564_v13 = vld [vmem:[#allocation6 + $0xde0] sm:$0xff]  ;;  %3306 = vmatpush2.bf16.msra.mxu1 %v5693_v15 }
  0x79   :  { %v5942_v17 = vcombine.high %v560_v12, %v564_v13  ;;  %v424_v18 = vld [vmem:[#allocation6 + $0x980] sm:$0xff]  ;;  %3318 = vmatprep.subr.bf16.mxu0 %v5814_v16  ;;  %v5941_v29 = vcombine.low %v560_v12, %v564_v13  ;;  %3265 = vmatmul.mubr.bf16.vlgmr.msra.gmra.mxu0 %v6333_v21 }
  0x7a   :  { %v428_v19 = vld [vmem:[#allocation6 + $0x9a0] sm:$0xff]  ;;  %3319 = vmatpush1.bf16.msra.mxu0 %v5813_v26  ;;  %3350 = vmatprep.mubr.bf16.mxu0 %v6349_v32 }
  0x7b   :  { %v552_v20 = vld [vmem:[#allocation6 + $0xd80] sm:$0xff]  ;;  %v5806_v54 = vcombine.high %v424_v18, %v428_v19  ;;  %3361 = vmatprep.subr.bf16.mxu1 %v5942_v17  ;;  %3308 = vmatmul.mubr.bf16.vlgmr.msra.gmra.mxu1 %v6341_v25  ;;  %v5805_v34 = vcombine.low %v424_v18, %v428_v19 }
  0x7c   :  { %v556_v22 = vld [vmem:[#allocation6 + $0xda0] sm:$0xff]  ;;  %3362 = vmatpush1.bf16.msra.mxu1 %v5941_v29  ;;  %3393 = vmatprep.mubr.bf16.mxu1 %v6354_v33 }
  0x7d   :  { %v5934_v55 = vcombine.high %v552_v20, %v556_v22  ;;  %v416_v30 = vld [vmem:[#allocation6 + $0x940] sm:$0xff]  ;;  %3320 = vmatprep.subr.bf16.mxu0 %v5806_v54  ;;  %v5933_v35 = vcombine.low %v552_v20, %v556_v22 }
  0x7e   :  { %v420_v31 = vld [vmem:[#allocation6 + $0x960] sm:$0xff]  ;;  %3321 = vmatpush1.bf16.msra.mxu0 %v5805_v34 }
  0x7f   :  { %v544_v59 = vld [vmem:[#allocation6 + $0xd40] sm:$0xff]  ;;  %v5798_v36 = vcombine.high %v416_v30, %v420_v31  ;;  %3363 = vmatprep.subr.bf16.mxu1 %v5934_v55  ;;  %v5797_v42 = vcombine.low %v416_v30, %v420_v31 }
  0x80   :  { %v548_v60 = vld [vmem:[#allocation6 + $0xd60] sm:$0xff]  ;;  %3364 = vmatpush1.bf16.msra.mxu1 %v5933_v35 }
  0x81   :  { %v5926_v37 = vcombine.high %v544_v59, %v548_v60  ;;  %v408_v38 = vld [vmem:[#allocation6 + $0x900] sm:$0xff]  ;;  %3322 = vmatprep.subr.bf16.mxu0 %v5798_v36  ;;  %v5925_v43 = vcombine.low %v544_v59, %v548_v60 }
  0x82   :  { %v412_v39 = vld [vmem:[#allocation6 + $0x920] sm:$0xff]  ;;  %3323 = vmatpush1.bf16.msra.mxu0 %v5797_v42 }
  0x83   :  { %v536_v40 = vld [vmem:[#allocation6 + $0xd00] sm:$0xff]  ;;  %v5790_v44 = vcombine.high %v408_v38, %v412_v39  ;;  %3365 = vmatprep.subr.bf16.mxu1 %v5926_v37  ;;  %v5789_v50 = vcombine.low %v408_v38, %v412_v39 }
  0x84   :  { %v540_v41 = vld [vmem:[#allocation6 + $0xd20] sm:$0xff]  ;;  %3366 = vmatpush1.bf16.msra.mxu1 %v5925_v43 }
  0x85   :  { %v5918_v45 = vcombine.high %v536_v40, %v540_v41  ;;  %v400_v46 = vld [vmem:[#allocation6 + $0x8c0] sm:$0xff]  ;;  %3324 = vmatprep.subr.bf16.mxu0 %v5790_v44  ;;  %v5917_v51 = vcombine.low %v536_v40, %v540_v41 }
  0x86   :  { %v404_v47 = vld [vmem:[#allocation6 + $0x8e0] sm:$0xff]  ;;  %3325 = vmatpush1.bf16.msra.mxu0 %v5789_v50 }
  0x87   :  { %v528_v48 = vld [vmem:[#allocation6 + $0xcc0] sm:$0xff]  ;;  %v5782_v52 = vcombine.high %v400_v46, %v404_v47  ;;  %3367 = vmatprep.subr.bf16.mxu1 %v5918_v45  ;;  %v5781_v0 = vcombine.low %v400_v46, %v404_v47 }
  0x88   :  { %v532_v49 = vld [vmem:[#allocation6 + $0xce0] sm:$0xff]  ;;  %3368 = vmatpush1.bf16.msra.mxu1 %v5917_v51 }
  0x89   :  { %v5910_v53 = vcombine.high %v528_v48, %v532_v49  ;;  %v392_v56 = vld [vmem:[#allocation6 + $0x880] sm:$0xff]  ;;  %3326 = vmatprep.subr.bf16.mxu0 %v5782_v52  ;;  %v5909_v1 = vcombine.low %v528_v48, %v532_v49 }
  0x8a   :  { %v396_v57 = vld [vmem:[#allocation6 + $0x8a0] sm:$0xff]  ;;  %3327 = vmatpush1.bf16.msra.mxu0 %v5781_v0 }
  0x8b   :  { %v520_v61 = vld [vmem:[#allocation6 + $0xc80] sm:$0xff]  ;;  %v5774_v2 = vcombine.high %v392_v56, %v396_v57  ;;  %3369 = vmatprep.subr.bf16.mxu1 %v5910_v53  ;;  %v5773_v8 = vcombine.low %v392_v56, %v396_v57 }
  0x8c   :  { %v524_v62 = vld [vmem:[#allocation6 + $0xca0] sm:$0xff]  ;;  %3370 = vmatpush1.bf16.msra.mxu1 %v5909_v1 }
  0x8d   :  { %v5902_v3 = vcombine.high %v520_v61, %v524_v62  ;;  %v384_v4 = vld [vmem:[#allocation6 + $0x840] sm:$0xff]  ;;  %3328 = vmatprep.subr.bf16.mxu0 %v5774_v2  ;;  %v5901_v9 = vcombine.low %v520_v61, %v524_v62 }
  0x8e   :  { %v388_v5 = vld [vmem:[#allocation6 + $0x860] sm:$0xff]  ;;  %3329 = vmatpush1.bf16.msra.mxu0 %v5773_v8 }
  0x8f   :  { %v512_v6 = vld [vmem:[#allocation6 + $0xc40] sm:$0xff]  ;;  %v5766_v10 = vcombine.high %v384_v4, %v388_v5  ;;  %3371 = vmatprep.subr.bf16.mxu1 %v5902_v3  ;;  %v5765_v16 = vcombine.low %v384_v4, %v388_v5 }
  0x90   :  { %v516_v7 = vld [vmem:[#allocation6 + $0xc60] sm:$0xff]  ;;  %3372 = vmatpush1.bf16.msra.mxu1 %v5901_v9 }
  0x91   :  { %v5894_v11 = vcombine.high %v512_v6, %v516_v7  ;;  %v376_v12 = vld [vmem:[#allocation6 + $0x800] sm:$0xff]  ;;  %3330 = vmatprep.subr.bf16.mxu0 %v5766_v10  ;;  %v5893_v17 = vcombine.low %v512_v6, %v516_v7 }
  0x92   :  { %v380_v13 = vld [vmem:[#allocation6 + $0x820] sm:$0xff]  ;;  %3331 = vmatpush1.bf16.msra.mxu0 %v5765_v16 }
  0x93   :  { %v504_v14 = vld [vmem:[#allocation6 + $0xc00] sm:$0xff]  ;;  %v5758_v18 = vcombine.high %v376_v12, %v380_v13  ;;  %3373 = vmatprep.subr.bf16.mxu1 %v5894_v11  ;;  %v5757_v54 = vcombine.low %v376_v12, %v380_v13 }
  0x94   :  { %v508_v15 = vld [vmem:[#allocation6 + $0xc20] sm:$0xff]  ;;  %3374 = vmatpush1.bf16.msra.mxu1 %v5893_v17 }
  0x95   :  { %v5886_v19 = vcombine.high %v504_v14, %v508_v15  ;;  %v496_v20 = vld [vmem:[#allocation6 + $0xbc0] sm:$0xff]  ;;  %3332 = vmatprep.subr.bf16.mxu0 %v5758_v18  ;;  %v5885_v55 = vcombine.low %v504_v14, %v508_v15 }
  0x96   :  { %v500_v22 = vld [vmem:[#allocation6 + $0xbe0] sm:$0xff]  ;;  %3333 = vmatpush1.bf16.msra.mxu0 %v5757_v54 }
  0x97   :  { %v624_v26 = vld [vmem:[#allocation6 + $0xfc0] sm:$0xff]  ;;  %v5878_v30 = vcombine.high %v496_v20, %v500_v22  ;;  %3375 = vmatprep.subr.bf16.mxu1 %v5886_v19  ;;  %v5877_v36 = vcombine.low %v496_v20, %v500_v22 }
  0x98   :  { %v628_v29 = vld [vmem:[#allocation6 + $0xfe0] sm:$0xff]  ;;  %3376 = vmatpush1.bf16.msra.mxu1 %v5885_v55 }
  0x99   :  { %v6006_v31 = vcombine.high %v624_v26, %v628_v29  ;;  %v488_v59 = vld [vmem:[#allocation6 + $0xb80] sm:$0xff]  ;;  %3334 = vmatprep.subr.bf16.mxu0 %v5878_v30  ;;  %v6005_v37 = vcombine.low %v624_v26, %v628_v29 }
  0x9a   :  { %v492_v60 = vld [vmem:[#allocation6 + $0xba0] sm:$0xff]  ;;  %3335 = vmatpush2.bf16.msra.mxu0 %v5877_v36  ;;  %v305_v36 = vld [vmem:[#allocation6 + $0x5c8] sm:$0xff] }
  0x9b   :  { %v616_v34 = vld [vmem:[#allocation6 + $0xf80] sm:$0xff]  ;;  %v5870_v38 = vcombine.high %v488_v59, %v492_v60  ;;  %3377 = vmatprep.subr.bf16.mxu1 %v6006_v31  ;;  %v5869_v44 = vcombine.low %v488_v59, %v492_v60 }
  0x9c   :  { %v620_v35 = vld [vmem:[#allocation6 + $0xfa0] sm:$0xff]  ;;  %3378 = vmatpush2.bf16.msra.mxu1 %v6005_v37  ;;  %v309_v37 = vld [vmem:[#allocation6 + $0x5e8] sm:$0xff] }
  0x9d   :  { %v5998_v39 = vcombine.high %v616_v34, %v620_v35  ;;  %v480_v40 = vld [vmem:[#allocation6 + $0xb40] sm:$0xff]  ;;  %3336 = vmatprep.subr.bf16.mxu0 %v5870_v38  ;;  %v5997_v45 = vcombine.low %v616_v34, %v620_v35  ;;  %v177_v34 = vld [vmem:[#allocation6 + $0x1c8] sm:$0xff] }
  0x9e   :  { %v484_v41 = vld [vmem:[#allocation6 + $0xb60] sm:$0xff]  ;;  %3337 = vmatpush2.bf16.msra.mxu0 %v5869_v44  ;;  %v181_v35 = vld [vmem:[#allocation6 + $0x1e8] sm:$0xff]  ;;  %v6361_v44 = vcombine.low %v6335_v23, %v6337_v24 }
  0x9f   :  { %v608_v42 = vld [vmem:[#allocation6 + $0xf40] sm:$0xff]  ;;  %v5862_v46 = vcombine.high %v480_v40, %v484_v41  ;;  %3379 = vmatprep.subr.bf16.mxu1 %v5998_v39  ;;  %v5861_v52 = vcombine.low %v480_v40, %v484_v41  ;;  %v5560_v40 = vcombine.high %v177_v34, %v181_v35  ;;  %v5688_v41 = vcombine.high %v305_v36, %v309_v37  ;;  %v289_v23 = vld [vmem:[#allocation6 + $0x548] sm:$0xff] }
  0xa0   :  { %v612_v43 = vld [vmem:[#allocation6 + $0xf60] sm:$0xff]  ;;  %3380 = vmatpush2.bf16.msra.mxu1 %v5997_v45  ;;  %v297_v45 = vld [vmem:[#allocation6 + $0x588] sm:$0xff] }
  0xa1   :  { %v5990_v47 = vcombine.high %v608_v42, %v612_v43  ;;  %v472_v48 = vld [vmem:[#allocation6 + $0xb00] sm:$0xff]  ;;  %3338 = vmatprep.subr.bf16.mxu0 %v5862_v46  ;;  %v5989_v53 = vcombine.low %v608_v42, %v612_v43  ;;  %v169_v42 = vld [vmem:[#allocation6 + $0x188] sm:$0xff] }
  0xa2   :  { %v476_v49 = vld [vmem:[#allocation6 + $0xb20] sm:$0xff]  ;;  %3339 = vmatpush2.bf16.msra.mxu0 %v5861_v52  ;;  %v173_v43 = vld [vmem:[#allocation6 + $0x1a8] sm:$0xff] }
  0xa3   :  { %v600_v50 = vld [vmem:[#allocation6 + $0xf00] sm:$0xff]  ;;  %v5854_v56 = vcombine.high %v472_v48, %v476_v49  ;;  %3381 = vmatprep.subr.bf16.mxu1 %v5990_v47  ;;  %v5853_v2 = vcombine.low %v472_v48, %v476_v49  ;;  %v301_v46 = vld [vmem:[#allocation6 + $0x5a8] sm:$0xff]  ;;  %v6365_v47 = vcombine.low %v6343_v27, %v6345_v28  ;;  %v5559_v48 = vcombine.low %v177_v34, %v181_v35 }
  0xa4   :  { %v604_v51 = vld [vmem:[#allocation6 + $0xf20] sm:$0xff]  ;;  %3382 = vmatpush2.bf16.msra.mxu1 %v5989_v53  ;;  %v5687_v49 = vcombine.low %v305_v36, %v309_v37  ;;  %v161_v52 = vld [vmem:[#allocation6 + $0x148] sm:$0xff]  ;;  %v5679_v27 = vcombine.low %v297_v45, %v301_v46 }
  0xa5   :  { %v5982_v57 = vcombine.high %v600_v50, %v604_v51  ;;  %v464_v61 = vld [vmem:[#allocation6 + $0xac0] sm:$0xff]  ;;  %3340 = vmatprep.subr.bf16.mxu0 %v5854_v56  ;;  %v5981_v3 = vcombine.low %v600_v50, %v604_v51  ;;  %v5552_v50 = vcombine.high %v169_v42, %v173_v43  ;;  %v5680_v51 = vcombine.high %v297_v45, %v301_v46  ;;  %v165_v53 = vld [vmem:[#allocation6 + $0x168] sm:$0xff] }
  0xa6   :  { %v468_v62 = vld [vmem:[#allocation6 + $0xae0] sm:$0xff]  ;;  %3341 = vmatpush2.bf16.msra.mxu0 %v5853_v2  ;;  %v293_v24 = vld [vmem:[#allocation6 + $0x568] sm:$0xff]  ;;  %v5551_v56 = vcombine.low %v169_v42, %v173_v43  ;;  %v5544_v28 = vcombine.high %v161_v52, %v165_v53  ;;  %v5543_v2 = vcombine.low %v161_v52, %v165_v53 }
  0xa7   :  { %v592_v0 = vld [vmem:[#allocation6 + $0xec0] sm:$0xff]  ;;  %v5846_v4 = vcombine.high %v464_v61, %v468_v62  ;;  %3383 = vmatprep.subr.bf16.mxu1 %v5982_v57  ;;  %v5845_v10 = vcombine.low %v464_v61, %v468_v62  ;;  %v5672_v57 = vcombine.high %v289_v23, %v293_v24  ;;  %v153_v61 = vld [vmem:[#allocation6 + $0x108] sm:$0xff] }
  0xa8   :  { %v596_v1 = vld [vmem:[#allocation6 + $0xee0] sm:$0xff]  ;;  %3384 = vmatpush2.bf16.msra.mxu1 %v5981_v3  ;;  %v157_v62 = vld [vmem:[#allocation6 + $0x128] sm:$0xff]  ;;  %v5671_v3 = vcombine.low %v289_v23, %v293_v24 }
  0xa9   :  { %v5974_v5 = vcombine.high %v592_v0, %v596_v1  ;;  %v456_v6 = vld [vmem:[#allocation6 + $0xa80] sm:$0xff]  ;;  %3342 = vmatprep.subr.bf16.mxu0 %v5846_v4  ;;  %v5973_v11 = vcombine.low %v592_v0, %v596_v1  ;;  %v281_v0 = vld [vmem:[#allocation6 + $0x508] sm:$0xff]  ;;  %v5536_v4 = vcombine.high %v153_v61, %v157_v62 }
  0xaa   :  { %v460_v7 = vld [vmem:[#allocation6 + $0xaa0] sm:$0xff]  ;;  %3343 = vmatpush2.bf16.msra.mxu0 %v5845_v10  ;;  %v285_v1 = vld [vmem:[#allocation6 + $0x528] sm:$0xff]  ;;  %v5535_v10 = vcombine.low %v153_v61, %v157_v62 }
  0xab   :  { %v584_v8 = vld [vmem:[#allocation6 + $0xe80] sm:$0xff]  ;;  %v5838_v12 = vcombine.high %v456_v6, %v460_v7  ;;  %3385 = vmatprep.subr.bf16.mxu1 %v5974_v5  ;;  %v5837_v18 = vcombine.low %v456_v6, %v460_v7  ;;  %v5664_v5 = vcombine.high %v281_v0, %v285_v1  ;;  %v145_v6 = vld [vmem:[#allocation6 + $0xc8] sm:$0xff] }
  0xac   :  { %v588_v9 = vld [vmem:[#allocation6 + $0xea0] sm:$0xff]  ;;  %3386 = vmatpush2.bf16.msra.mxu1 %v5973_v11  ;;  %v149_v7 = vld [vmem:[#allocation6 + $0xe8] sm:$0xff]  ;;  %v5663_v11 = vcombine.low %v281_v0, %v285_v1 }
  0xad   :  { %v5966_v13 = vcombine.high %v584_v8, %v588_v9  ;;  %v448_v14 = vld [vmem:[#allocation6 + $0xa40] sm:$0xff]  ;;  %3344 = vmatprep.subr.bf16.mxu0 %v5838_v12  ;;  %v5965_v19 = vcombine.low %v584_v8, %v588_v9  ;;  %v273_v8 = vld [vmem:[#allocation6 + $0x4c8] sm:$0xff]  ;;  %v5528_v12 = vcombine.high %v145_v6, %v149_v7 }
  0xae   :  { %v452_v15 = vld [vmem:[#allocation6 + $0xa60] sm:$0xff]  ;;  %3345 = vmatpush2.bf16.msra.mxu0 %v5837_v18  ;;  %v277_v9 = vld [vmem:[#allocation6 + $0x4e8] sm:$0xff]  ;;  %v5527_v18 = vcombine.low %v145_v6, %v149_v7 }
  0xaf   :  { %v576_v16 = vld [vmem:[#allocation6 + $0xe40] sm:$0xff]  ;;  %v5830_v20 = vcombine.high %v448_v14, %v452_v15  ;;  %3387 = vmatprep.subr.bf16.mxu1 %v5966_v13  ;;  %v5829_v30 = vcombine.low %v448_v14, %v452_v15  ;;  %v5656_v13 = vcombine.high %v273_v8, %v277_v9  ;;  %v137_v14 = vld [vmem:[#allocation6 + $0x88] sm:$0xff] }
  0xb0   :  { %v580_v17 = vld [vmem:[#allocation6 + $0xe60] sm:$0xff]  ;;  %3388 = vmatpush2.bf16.msra.mxu1 %v5965_v19  ;;  %v141_v15 = vld [vmem:[#allocation6 + $0xa8] sm:$0xff]  ;;  %v5655_v19 = vcombine.low %v273_v8, %v277_v9 }
  0xb1   :  { %v5958_v22 = vcombine.high %v576_v16, %v580_v17  ;;  %v440_v26 = vld [vmem:[#allocation6 + $0xa00] sm:$0xff]  ;;  %3346 = vmatprep.subr.bf16.mxu0 %v5830_v20  ;;  %v5957_v31 = vcombine.low %v576_v16, %v580_v17  ;;  %v265_v16 = vld [vmem:[#allocation6 + $0x488] sm:$0xff]  ;;  %v5520_v20 = vcombine.high %v137_v14, %v141_v15 }
  0xb2   :  { %v444_v29 = vld [vmem:[#allocation6 + $0xa20] sm:$0xff]  ;;  %3347 = vmatpush2.bf16.msra.mxu0 %v5829_v30  ;;  %v269_v17 = vld [vmem:[#allocation6 + $0x4a8] sm:$0xff]  ;;  %v5519_v30 = vcombine.low %v137_v14, %v141_v15 }
  0xb3   :  { %v568_v54 = vld [vmem:[#allocation6 + $0xe00] sm:$0xff]  ;;  %v5822_v59 = vcombine.high %v440_v26, %v444_v29  ;;  %3389 = vmatprep.subr.bf16.mxu1 %v5958_v22  ;;  %v5821_v38 = vcombine.low %v440_v26, %v444_v29  ;;  %v5648_v22 = vcombine.high %v265_v16, %v269_v17  ;;  %v129_v26 = vld [vmem:[#allocation6 + $0x48] sm:$0xff] }
  0xb4   :  { %v572_v55 = vld [vmem:[#allocation6 + $0xe20] sm:$0xff]  ;;  %3390 = vmatpush2.bf16.msra.mxu1 %v5957_v31  ;;  %v133_v29 = vld [vmem:[#allocation6 + $0x68] sm:$0xff]  ;;  %v5647_v31 = vcombine.low %v265_v16, %v269_v17 }
  0xb5   :  { %v5950_v60 = vcombine.high %v568_v54, %v572_v55  ;;  %3348 = vmatprep.subr.bf16.mxu0 %v5822_v59  ;;  %v5949_v39 = vcombine.low %v568_v54, %v572_v55  ;;  %v257_v54 = vld [vmem:[#allocation6 + $0x448] sm:$0xff]  ;;  %v5512_v59 = vcombine.high %v129_v26, %v133_v29 }
  0xb6   :  { %3349 = vmatpush2.bf16.msra.mxu0 %v5821_v38  ;;  %v261_v55 = vld [vmem:[#allocation6 + $0x468] sm:$0xff]  ;;  %v5511_v38 = vcombine.low %v129_v26, %v133_v29 }
  0xb7   :  { %3391 = vmatprep.subr.bf16.mxu1 %v5950_v60  ;;  %3404 = vmatprep.subr.bf16.mxu0 %v5560_v40  ;;  %v5640_v60 = vcombine.high %v257_v54, %v261_v55  ;;  %v121_v34 = vld [vmem:[#allocation6 + $0x8] sm:$0xff] }
  0xb8   :  { %3392 = vmatpush2.bf16.msra.mxu1 %v5949_v39  ;;  %v125_v35 = vld [vmem:[#allocation6 + $0x28] sm:$0xff]  ;;  %v5639_v39 = vcombine.low %v257_v54, %v261_v55 }
  0xb9   :  { %3447 = vmatprep.subr.bf16.mxu1 %v5688_v41  ;;  %3351 = vmatmul.mubr.bf16.vlgmr.msra.gmra.mxu0 %v6361_v44  ;;  %v249_v36 = vld [vmem:[#allocation6 + $0x408] sm:$0xff]  ;;  %v5504_v40 = vcombine.high %v121_v34, %v125_v35 }
  0xba   :  { %3405 = vmatpush1.bf16.msra.mxu0 %v5559_v48  ;;  %3436 = vmatprep.mubr.bf16.mxu0 %v6319_v58  ;;  %v253_v37 = vld [vmem:[#allocation6 + $0x428] sm:$0xff]  ;;  %v5503_v48 = vcombine.low %v121_v34, %v125_v35 }
  0xbb   :  { %3394 = vmatmul.mubr.bf16.vlgmr.msra.gmra.mxu1 %v6365_v47  ;;  %3406 = vmatprep.subr.bf16.mxu0 %v5552_v50  ;;  %v5632_v41 = vcombine.high %v249_v36, %v253_v37  ;;  %v241_v42 = vld [vmem:[#allocation6 + $0x3c8] sm:$0xff] }
  0xbc   :  { %3448 = vmatpush1.bf16.msra.mxu1 %v5687_v49  ;;  %3479 = vmatprep.mubr.bf16.mxu1 %v6327_v63  ;;  %v245_v43 = vld [vmem:[#allocation6 + $0x3e8] sm:$0xff]  ;;  %v5631_v49 = vcombine.low %v249_v36, %v253_v37 }
  0xbd   :  { %3449 = vmatprep.subr.bf16.mxu1 %v5680_v51  ;;  %v369_v45 = vld [vmem:[#allocation6 + $0x7c8] sm:$0xff]  ;;  %v5624_v50 = vcombine.high %v241_v42, %v245_v43 }
  0xbe   :  { %3407 = vmatpush1.bf16.msra.mxu0 %v5551_v56  ;;  %v373_v46 = vld [vmem:[#allocation6 + $0x7e8] sm:$0xff]  ;;  %v5623_v56 = vcombine.low %v241_v42, %v245_v43 }
  0xbf   :  { %3408 = vmatprep.subr.bf16.mxu0 %v5544_v28  ;;  %v5752_v51 = vcombine.high %v369_v45, %v373_v46  ;;  %v233_v52 = vld [vmem:[#allocation6 + $0x388] sm:$0xff] }
  0xc0   :  { %3450 = vmatpush1.bf16.msra.mxu1 %v5679_v27  ;;  %v237_v53 = vld [vmem:[#allocation6 + $0x3a8] sm:$0xff]  ;;  %v5751_v27 = vcombine.low %v369_v45, %v373_v46 }
  0xc1   :  { %3451 = vmatprep.subr.bf16.mxu1 %v5672_v57  ;;  %v361_v23 = vld [vmem:[#allocation6 + $0x788] sm:$0xff]  ;;  %v5616_v28 = vcombine.high %v233_v52, %v237_v53 }
  0xc2   :  { %3409 = vmatpush1.bf16.msra.mxu0 %v5543_v2  ;;  %v365_v24 = vld [vmem:[#allocation6 + $0x7a8] sm:$0xff]  ;;  %v5615_v2 = vcombine.low %v233_v52, %v237_v53 }
  0xc3   :  { %3410 = vmatprep.subr.bf16.mxu0 %v5536_v4  ;;  %v5744_v57 = vcombine.high %v361_v23, %v365_v24  ;;  %v225_v61 = vld [vmem:[#allocation6 + $0x348] sm:$0xff] }
  0xc4   :  { %3452 = vmatpush1.bf16.msra.mxu1 %v5671_v3  ;;  %v229_v62 = vld [vmem:[#allocation6 + $0x368] sm:$0xff]  ;;  %v5743_v3 = vcombine.low %v361_v23, %v365_v24 }
  0xc5   :  { %3453 = vmatprep.subr.bf16.mxu1 %v5664_v5  ;;  %v353_v0 = vld [vmem:[#allocation6 + $0x748] sm:$0xff]  ;;  %v5608_v4 = vcombine.high %v225_v61, %v229_v62 }
  0xc6   :  { %3411 = vmatpush1.bf16.msra.mxu0 %v5535_v10  ;;  %v357_v1 = vld [vmem:[#allocation6 + $0x768] sm:$0xff]  ;;  %v5607_v10 = vcombine.low %v225_v61, %v229_v62 }
  0xc7   :  { %3412 = vmatprep.subr.bf16.mxu0 %v5528_v12  ;;  %v5736_v5 = vcombine.high %v353_v0, %v357_v1  ;;  %v217_v6 = vld [vmem:[#allocation6 + $0x308] sm:$0xff] }
  0xc8   :  { %3454 = vmatpush1.bf16.msra.mxu1 %v5663_v11  ;;  %v221_v7 = vld [vmem:[#allocation6 + $0x328] sm:$0xff]  ;;  %v5735_v11 = vcombine.low %v353_v0, %v357_v1 }
  0xc9   :  { %3455 = vmatprep.subr.bf16.mxu1 %v5656_v13  ;;  %v345_v8 = vld [vmem:[#allocation6 + $0x708] sm:$0xff]  ;;  %v5600_v12 = vcombine.high %v217_v6, %v221_v7 }
  0xca   :  { %3413 = vmatpush1.bf16.msra.mxu0 %v5527_v18  ;;  %v349_v9 = vld [vmem:[#allocation6 + $0x728] sm:$0xff]  ;;  %v5599_v18 = vcombine.low %v217_v6, %v221_v7 }
  0xcb   :  { %3414 = vmatprep.subr.bf16.mxu0 %v5520_v20  ;;  %v5728_v13 = vcombine.high %v345_v8, %v349_v9  ;;  %v209_v14 = vld [vmem:[#allocation6 + $0x2c8] sm:$0xff] }
  0xcc   :  { %3456 = vmatpush1.bf16.msra.mxu1 %v5655_v19  ;;  %v213_v15 = vld [vmem:[#allocation6 + $0x2e8] sm:$0xff]  ;;  %v5727_v19 = vcombine.low %v345_v8, %v349_v9 }
  0xcd   :  { %3457 = vmatprep.subr.bf16.mxu1 %v5648_v22  ;;  %v337_v16 = vld [vmem:[#allocation6 + $0x6c8] sm:$0xff]  ;;  %v5592_v20 = vcombine.high %v209_v14, %v213_v15 }
  0xce   :  { %3415 = vmatpush1.bf16.msra.mxu0 %v5519_v30  ;;  %v341_v17 = vld [vmem:[#allocation6 + $0x6e8] sm:$0xff]  ;;  %v5591_v30 = vcombine.low %v209_v14, %v213_v15 }
  0xcf   :  { %3416 = vmatprep.subr.bf16.mxu0 %v5512_v59  ;;  %v5720_v22 = vcombine.high %v337_v16, %v341_v17  ;;  %v201_v26 = vld [vmem:[#allocation6 + $0x288] sm:$0xff] }
  0xd0   :  { %3458 = vmatpush1.bf16.msra.mxu1 %v5647_v31  ;;  %v205_v29 = vld [vmem:[#allocation6 + $0x2a8] sm:$0xff]  ;;  %v5719_v31 = vcombine.low %v337_v16, %v341_v17 }
  0xd1   :  { %3459 = vmatprep.subr.bf16.mxu1 %v5640_v60  ;;  %v329_v54 = vld [vmem:[#allocation6 + $0x688] sm:$0xff]  ;;  %v5584_v59 = vcombine.high %v201_v26, %v205_v29 }
  0xd2   :  { %3417 = vmatpush1.bf16.msra.mxu0 %v5511_v38  ;;  %v333_v55 = vld [vmem:[#allocation6 + $0x6a8] sm:$0xff]  ;;  %v5583_v38 = vcombine.low %v201_v26, %v205_v29 }
  0xd3   :  { %3418 = vmatprep.subr.bf16.mxu0 %v5504_v40  ;;  %v5712_v60 = vcombine.high %v329_v54, %v333_v55  ;;  %v193_v34 = vld [vmem:[#allocation6 + $0x248] sm:$0xff] }
  0xd4   :  { %3460 = vmatpush1.bf16.msra.mxu1 %v5639_v39  ;;  %v197_v35 = vld [vmem:[#allocation6 + $0x268] sm:$0xff]  ;;  %v5711_v39 = vcombine.low %v329_v54, %v333_v55 }
  0xd5   :  { %3461 = vmatprep.subr.bf16.mxu1 %v5632_v41  ;;  %v321_v36 = vld [vmem:[#allocation6 + $0x648] sm:$0xff]  ;;  %v5576_v40 = vcombine.high %v193_v34, %v197_v35 }
  0xd6   :  { %3419 = vmatpush1.bf16.msra.mxu0 %v5503_v48  ;;  %v325_v37 = vld [vmem:[#allocation6 + $0x668] sm:$0xff]  ;;  %v5575_v48 = vcombine.low %v193_v34, %v197_v35 }
  0xd7   :  { %3420 = vmatprep.subr.bf16.mxu0 %v5624_v50  ;;  %v5704_v41 = vcombine.high %v321_v36, %v325_v37  ;;  %v185_v42 = vld [vmem:[#allocation6 + $0x208] sm:$0xff] }
  0xd8   :  { %3462 = vmatpush1.bf16.msra.mxu1 %v5631_v49  ;;  %v189_v43 = vld [vmem:[#allocation6 + $0x228] sm:$0xff]  ;;  %v5703_v49 = vcombine.low %v321_v36, %v325_v37 }
  0xd9   :  { %3463 = vmatprep.subr.bf16.mxu1 %v5752_v51  ;;  %v313_v45 = vld [vmem:[#allocation6 + $0x608] sm:$0xff]  ;;  %v5568_v50 = vcombine.high %v185_v42, %v189_v43 }
  0xda   :  { %3421 = vmatpush2.bf16.msra.mxu0 %v5623_v56  ;;  %v317_v46 = vld [vmem:[#allocation6 + $0x628] sm:$0xff]  ;;  %v5567_v56 = vcombine.low %v185_v42, %v189_v43 }
  0xdb   :  { %3422 = vmatprep.subr.bf16.mxu0 %v5616_v28  ;;  %v5696_v51 = vcombine.high %v313_v45, %v317_v46  ;;  %v433_v52 = vld [vmem:[#allocation6 + $0x9c8] sm:$0xff] }
  0xdc   :  { %3464 = vmatpush2.bf16.msra.mxu1 %v5751_v27  ;;  %v437_v53 = vld [vmem:[#allocation6 + $0x9e8] sm:$0xff]  ;;  %v5695_v27 = vcombine.low %v313_v45, %v317_v46 }
  0xdd   :  { %3465 = vmatprep.subr.bf16.mxu1 %v5744_v57  ;;  %v561_v23 = vld [vmem:[#allocation6 + $0xdc8] sm:$0xff]  ;;  %v5816_v28 = vcombine.high %v433_v52, %v437_v53 }
  0xde   :  { %3423 = vmatpush2.bf16.msra.mxu0 %v5615_v2  ;;  %v565_v24 = vld [vmem:[#allocation6 + $0xde8] sm:$0xff]  ;;  %v5815_v2 = vcombine.low %v433_v52, %v437_v53 }
  0xdf   :  { %3424 = vmatprep.subr.bf16.mxu0 %v5608_v4  ;;  %v5944_v57 = vcombine.high %v561_v23, %v565_v24  ;;  %v425_v61 = vld [vmem:[#allocation6 + $0x988] sm:$0xff] }
  0xe0   :  { %3466 = vmatpush2.bf16.msra.mxu1 %v5743_v3  ;;  %v429_v62 = vld [vmem:[#allocation6 + $0x9a8] sm:$0xff]  ;;  %v5943_v3 = vcombine.low %v561_v23, %v565_v24 }
  0xe1   :  { %3467 = vmatprep.subr.bf16.mxu1 %v5736_v5  ;;  %v553_v0 = vld [vmem:[#allocation6 + $0xd88] sm:$0xff]  ;;  %v5808_v4 = vcombine.high %v425_v61, %v429_v62 }
  0xe2   :  { %3425 = vmatpush2.bf16.msra.mxu0 %v5607_v10  ;;  %v557_v1 = vld [vmem:[#allocation6 + $0xda8] sm:$0xff]  ;;  %v5807_v10 = vcombine.low %v425_v61, %v429_v62 }
  0xe3   :  { %3426 = vmatprep.subr.bf16.mxu0 %v5600_v12  ;;  %v5936_v5 = vcombine.high %v553_v0, %v557_v1  ;;  %v417_v6 = vld [vmem:[#allocation6 + $0x948] sm:$0xff] }
  0xe4   :  { %3468 = vmatpush2.bf16.msra.mxu1 %v5735_v11  ;;  %v421_v7 = vld [vmem:[#allocation6 + $0x968] sm:$0xff]  ;;  %v5935_v11 = vcombine.low %v553_v0, %v557_v1 }
  0xe5   :  { %3469 = vmatprep.subr.bf16.mxu1 %v5728_v13  ;;  %v545_v8 = vld [vmem:[#allocation6 + $0xd48] sm:$0xff]  ;;  %v5800_v12 = vcombine.high %v417_v6, %v421_v7 }
  0xe6   :  { %3427 = vmatpush2.bf16.msra.mxu0 %v5599_v18  ;;  %v549_v9 = vld [vmem:[#allocation6 + $0xd68] sm:$0xff]  ;;  %v5799_v18 = vcombine.low %v417_v6, %v421_v7 }
  0xe7   :  { %3428 = vmatprep.subr.bf16.mxu0 %v5592_v20  ;;  %v5928_v13 = vcombine.high %v545_v8, %v549_v9  ;;  %v409_v14 = vld [vmem:[#allocation6 + $0x908] sm:$0xff] }
  0xe8   :  { %3470 = vmatpush2.bf16.msra.mxu1 %v5727_v19  ;;  %v413_v15 = vld [vmem:[#allocation6 + $0x928] sm:$0xff]  ;;  %v5927_v19 = vcombine.low %v545_v8, %v549_v9 }
  0xe9   :  { %3471 = vmatprep.subr.bf16.mxu1 %v5720_v22  ;;  %v537_v16 = vld [vmem:[#allocation6 + $0xd08] sm:$0xff]  ;;  %v5792_v20 = vcombine.high %v409_v14, %v413_v15 }
  0xea   :  { %3429 = vmatpush2.bf16.msra.mxu0 %v5591_v30  ;;  %v541_v17 = vld [vmem:[#allocation6 + $0xd28] sm:$0xff]  ;;  %v5791_v30 = vcombine.low %v409_v14, %v413_v15 }
  0xeb   :  { %3430 = vmatprep.subr.bf16.mxu0 %v5584_v59  ;;  %v5920_v22 = vcombine.high %v537_v16, %v541_v17  ;;  %v401_v26 = vld [vmem:[#allocation6 + $0x8c8] sm:$0xff] }
  0xec   :  { %3472 = vmatpush2.bf16.msra.mxu1 %v5719_v31  ;;  %v405_v29 = vld [vmem:[#allocation6 + $0x8e8] sm:$0xff]  ;;  %v5919_v31 = vcombine.low %v537_v16, %v541_v17 }
  0xed   :  { %3473 = vmatprep.subr.bf16.mxu1 %v5712_v60  ;;  %v529_v54 = vld [vmem:[#allocation6 + $0xcc8] sm:$0xff]  ;;  %v5784_v59 = vcombine.high %v401_v26, %v405_v29 }
  0xee   :  { %3431 = vmatpush2.bf16.msra.mxu0 %v5583_v38  ;;  %v533_v55 = vld [vmem:[#allocation6 + $0xce8] sm:$0xff]  ;;  %v5783_v38 = vcombine.low %v401_v26, %v405_v29 }
  0xef   :  { %3432 = vmatprep.subr.bf16.mxu0 %v5576_v40  ;;  %v5912_v60 = vcombine.high %v529_v54, %v533_v55  ;;  %v393_v34 = vld [vmem:[#allocation6 + $0x888] sm:$0xff] }
  0xf0   :  { %3474 = vmatpush2.bf16.msra.mxu1 %v5711_v39  ;;  %v397_v35 = vld [vmem:[#allocation6 + $0x8a8] sm:$0xff]  ;;  %v5911_v39 = vcombine.low %v529_v54, %v533_v55 }
  0xf1   :  { %3475 = vmatprep.subr.bf16.mxu1 %v5704_v41  ;;  %v521_v36 = vld [vmem:[#allocation6 + $0xc88] sm:$0xff]  ;;  %v5776_v40 = vcombine.high %v393_v34, %v397_v35 }
  0xf2   :  { %3433 = vmatpush2.bf16.msra.mxu0 %v5575_v48  ;;  %v525_v37 = vld [vmem:[#allocation6 + $0xca8] sm:$0xff]  ;;  %v5775_v48 = vcombine.low %v393_v34, %v397_v35 }
  0xf3   :  { %3434 = vmatprep.subr.bf16.mxu0 %v5568_v50  ;;  %v5904_v41 = vcombine.high %v521_v36, %v525_v37  ;;  %v385_v42 = vld [vmem:[#allocation6 + $0x848] sm:$0xff] }
  0xf4   :  { %3476 = vmatpush2.bf16.msra.mxu1 %v5703_v49  ;;  %v389_v43 = vld [vmem:[#allocation6 + $0x868] sm:$0xff]  ;;  %v5903_v49 = vcombine.low %v521_v36, %v525_v37 }
  0xf5   :  { %3477 = vmatprep.subr.bf16.mxu1 %v5696_v51  ;;  %v513_v45 = vld [vmem:[#allocation6 + $0xc48] sm:$0xff]  ;;  %v5768_v50 = vcombine.high %v385_v42, %v389_v43 }
  0xf6   :  { %3435 = vmatpush2.bf16.msra.mxu0 %v5567_v56  ;;  %v517_v46 = vld [vmem:[#allocation6 + $0xc68] sm:$0xff]  ;;  %v5767_v56 = vcombine.low %v385_v42, %v389_v43 }
  0xf7   :  { %3490 = vmatprep.subr.bf16.mxu0 %v5816_v28  ;;  %v5896_v51 = vcombine.high %v513_v45, %v517_v46  ;;  %v377_v52 = vld [vmem:[#allocation6 + $0x808] sm:$0xff] }
  0xf8   :  { %3478 = vmatpush2.bf16.msra.mxu1 %v5695_v27  ;;  %v381_v53 = vld [vmem:[#allocation6 + $0x828] sm:$0xff]  ;;  %v5895_v27 = vcombine.low %v513_v45, %v517_v46 }
  0xf9   :  { %3533 = vmatprep.subr.bf16.mxu1 %v5944_v57  ;;  %3437 = vmatmul.mubr.bf16.vlgmr.msra.gmra.mxu0 %v6333_v21  ;;  %v505_v23 = vld [vmem:[#allocation6 + $0xc08] sm:$0xff]  ;;  %v5760_v28 = vcombine.high %v377_v52, %v381_v53 }
  0xfa   :  { %3491 = vmatpush1.bf16.msra.mxu0 %v5815_v2  ;;  %3522 = vmatprep.mubr.bf16.mxu0 %v6349_v32  ;;  %v509_v24 = vld [vmem:[#allocation6 + $0xc28] sm:$0xff]  ;;  %v5759_v2 = vcombine.low %v377_v52, %v381_v53 }
  0xfb   :  { %3480 = vmatmul.mubr.bf16.vlgmr.msra.gmra.mxu1 %v6341_v25  ;;  %3492 = vmatprep.subr.bf16.mxu0 %v5808_v4  ;;  %v5888_v57 = vcombine.high %v505_v23, %v509_v24  ;;  %v497_v61 = vld [vmem:[#allocation6 + $0xbc8] sm:$0xff] }
  0xfc   :  { %3534 = vmatpush1.bf16.msra.mxu1 %v5943_v3  ;;  %3565 = vmatprep.mubr.bf16.mxu1 %v6354_v33  ;;  %v501_v62 = vld [vmem:[#allocation6 + $0xbe8] sm:$0xff]  ;;  %v5887_v3 = vcombine.low %v505_v23, %v509_v24 }
  0xfd   :  { %3535 = vmatprep.subr.bf16.mxu1 %v5936_v5  ;;  %v625_v0 = vld [vmem:[#allocation6 + $0xfc8] sm:$0xff]  ;;  %v5880_v4 = vcombine.high %v497_v61, %v501_v62 }
  0xfe   :  { %3493 = vmatpush1.bf16.msra.mxu0 %v5807_v10  ;;  %v629_v1 = vld [vmem:[#allocation6 + $0xfe8] sm:$0xff]  ;;  %v5879_v10 = vcombine.low %v497_v61, %v501_v62 }
  0xff   :  { %3494 = vmatprep.subr.bf16.mxu0 %v5800_v12  ;;  %v6008_v5 = vcombine.high %v625_v0, %v629_v1  ;;  %v489_v6 = vld [vmem:[#allocation6 + $0xb88] sm:$0xff] }
 0x100   :  { %3536 = vmatpush1.bf16.msra.mxu1 %v5935_v11  ;;  %v493_v7 = vld [vmem:[#allocation6 + $0xba8] sm:$0xff]  ;;  %v6007_v11 = vcombine.low %v625_v0, %v629_v1 }
 0x101   :  { %3537 = vmatprep.subr.bf16.mxu1 %v5928_v13  ;;  %v617_v8 = vld [vmem:[#allocation6 + $0xf88] sm:$0xff]  ;;  %v5872_v12 = vcombine.high %v489_v6, %v493_v7 }
 0x102   :  { %3495 = vmatpush1.bf16.msra.mxu0 %v5799_v18  ;;  %v621_v9 = vld [vmem:[#allocation6 + $0xfa8] sm:$0xff]  ;;  %v5871_v18 = vcombine.low %v489_v6, %v493_v7  ;;  %v178_v6 = vld [vmem:[#allocation6 + $0x1d0] sm:$0xff] }
 0x103   :  { %3496 = vmatprep.subr.bf16.mxu0 %v5792_v20  ;;  %v6000_v13 = vcombine.high %v617_v8, %v621_v9  ;;  %v481_v14 = vld [vmem:[#allocation6 + $0xb48] sm:$0xff]  ;;  %v182_v7 = vld [vmem:[#allocation6 + $0x1f0] sm:$0xff] }
 0x104   :  { %3538 = vmatpush1.bf16.msra.mxu1 %v5927_v19  ;;  %v485_v15 = vld [vmem:[#allocation6 + $0xb68] sm:$0xff]  ;;  %v5999_v19 = vcombine.low %v617_v8, %v621_v9  ;;  %v306_v8 = vld [vmem:[#allocation6 + $0x5d0] sm:$0xff] }
 0x105   :  { %3539 = vmatprep.subr.bf16.mxu1 %v5920_v22  ;;  %v609_v16 = vld [vmem:[#allocation6 + $0xf48] sm:$0xff]  ;;  %v5864_v20 = vcombine.high %v481_v14, %v485_v15  ;;  %v310_v9 = vld [vmem:[#allocation6 + $0x5f0] sm:$0xff] }
 0x106   :  { %3497 = vmatpush1.bf16.msra.mxu0 %v5791_v30  ;;  %v613_v17 = vld [vmem:[#allocation6 + $0xf68] sm:$0xff]  ;;  %v5863_v30 = vcombine.low %v481_v14, %v485_v15  ;;  %v170_v14 = vld [vmem:[#allocation6 + $0x190] sm:$0xff] }
 0x107   :  { %3498 = vmatprep.subr.bf16.mxu0 %v5784_v59  ;;  %v5992_v22 = vcombine.high %v609_v16, %v613_v17  ;;  %v473_v26 = vld [vmem:[#allocation6 + $0xb08] sm:$0xff]  ;;  %v174_v15 = vld [vmem:[#allocation6 + $0x1b0] sm:$0xff] }
 0x108   :  { %3540 = vmatpush1.bf16.msra.mxu1 %v5919_v31  ;;  %v477_v29 = vld [vmem:[#allocation6 + $0xb28] sm:$0xff]  ;;  %v5991_v31 = vcombine.low %v609_v16, %v613_v17  ;;  %v298_v16 = vld [vmem:[#allocation6 + $0x590] sm:$0xff] }
 0x109   :  { %3541 = vmatprep.subr.bf16.mxu1 %v5912_v60  ;;  %v601_v54 = vld [vmem:[#allocation6 + $0xf08] sm:$0xff]  ;;  %v5856_v59 = vcombine.high %v473_v26, %v477_v29  ;;  %v302_v17 = vld [vmem:[#allocation6 + $0x5b0] sm:$0xff] }
 0x10a   :  { %3499 = vmatpush1.bf16.msra.mxu0 %v5783_v38  ;;  %v605_v55 = vld [vmem:[#allocation6 + $0xf28] sm:$0xff]  ;;  %v5855_v38 = vcombine.low %v473_v26, %v477_v29  ;;  %v162_v26 = vld [vmem:[#allocation6 + $0x150] sm:$0xff] }
 0x10b   :  { %3500 = vmatprep.subr.bf16.mxu0 %v5776_v40  ;;  %v5984_v60 = vcombine.high %v601_v54, %v605_v55  ;;  %v465_v34 = vld [vmem:[#allocation6 + $0xac8] sm:$0xff]  ;;  %v166_v29 = vld [vmem:[#allocation6 + $0x170] sm:$0xff] }
 0x10c   :  { %3542 = vmatpush1.bf16.msra.mxu1 %v5911_v39  ;;  %v469_v35 = vld [vmem:[#allocation6 + $0xae8] sm:$0xff]  ;;  %v5983_v39 = vcombine.low %v601_v54, %v605_v55  ;;  %v290_v55 = vld [vmem:[#allocation6 + $0x550] sm:$0xff] }
 0x10d   :  { %3543 = vmatprep.subr.bf16.mxu1 %v5904_v41  ;;  %v593_v36 = vld [vmem:[#allocation6 + $0xec8] sm:$0xff]  ;;  %v5848_v40 = vcombine.high %v465_v34, %v469_v35 }
 0x10e   :  { %3501 = vmatpush1.bf16.msra.mxu0 %v5775_v48  ;;  %v597_v37 = vld [vmem:[#allocation6 + $0xee8] sm:$0xff]  ;;  %v5847_v48 = vcombine.low %v465_v34, %v469_v35  ;;  %v5681_v35 = vcombine.low %v298_v16, %v302_v17 }
 0x10f   :  { %3502 = vmatprep.subr.bf16.mxu0 %v5768_v50  ;;  %v5976_v41 = vcombine.high %v593_v36, %v597_v37  ;;  %v457_v42 = vld [vmem:[#allocation6 + $0xa88] sm:$0xff] }
 0x110   :  { %3544 = vmatpush1.bf16.msra.mxu1 %v5903_v49  ;;  %v461_v43 = vld [vmem:[#allocation6 + $0xaa8] sm:$0xff]  ;;  %v5975_v49 = vcombine.low %v593_v36, %v597_v37  ;;  %v5546_v36 = vcombine.high %v162_v26, %v166_v29 }
 0x111   :  { %3545 = vmatprep.subr.bf16.mxu1 %v5896_v51  ;;  %v585_v45 = vld [vmem:[#allocation6 + $0xe88] sm:$0xff]  ;;  %v5840_v50 = vcombine.high %v457_v42, %v461_v43 }
 0x112   :  { %3503 = vmatpush1.bf16.msra.mxu0 %v5767_v56  ;;  %v589_v46 = vld [vmem:[#allocation6 + $0xea8] sm:$0xff]  ;;  %v5839_v56 = vcombine.low %v457_v42, %v461_v43  ;;  %v282_v42 = vld [vmem:[#allocation6 + $0x510] sm:$0xff] }
 0x113   :  { %3504 = vmatprep.subr.bf16.mxu0 %v5760_v28  ;;  %v5968_v51 = vcombine.high %v585_v45, %v589_v46  ;;  %v449_v52 = vld [vmem:[#allocation6 + $0xa48] sm:$0xff]  ;;  %v286_v43 = vld [vmem:[#allocation6 + $0x530] sm:$0xff] }
 0x114   :  { %3546 = vmatpush1.bf16.msra.mxu1 %v5895_v27  ;;  %v453_v53 = vld [vmem:[#allocation6 + $0xa68] sm:$0xff]  ;;  %v5967_v27 = vcombine.low %v585_v45, %v589_v46  ;;  %v5545_v46 = vcombine.low %v162_v26, %v166_v29 }
 0x115   :  { %3547 = vmatprep.subr.bf16.mxu1 %v5888_v57  ;;  %v577_v23 = vld [vmem:[#allocation6 + $0xe48] sm:$0xff]  ;;  %v5832_v28 = vcombine.high %v449_v52, %v453_v53 }
 0x116   :  { %3505 = vmatpush1.bf16.msra.mxu0 %v5759_v2  ;;  %v581_v24 = vld [vmem:[#allocation6 + $0xe68] sm:$0xff]  ;;  %v5831_v2 = vcombine.low %v449_v52, %v453_v53  ;;  %v5666_v53 = vcombine.high %v282_v42, %v286_v43 }
 0x117   :  { %3506 = vmatprep.subr.bf16.mxu0 %v5880_v4  ;;  %v5960_v57 = vcombine.high %v577_v23, %v581_v24  ;;  %v441_v61 = vld [vmem:[#allocation6 + $0xa08] sm:$0xff] }
 0x118   :  { %3548 = vmatpush1.bf16.msra.mxu1 %v5887_v3  ;;  %v445_v62 = vld [vmem:[#allocation6 + $0xa28] sm:$0xff]  ;;  %v5959_v3 = vcombine.low %v577_v23, %v581_v24  ;;  %v146_v23 = vld [vmem:[#allocation6 + $0xd0] sm:$0xff] }
 0x119   :  { %3549 = vmatprep.subr.bf16.mxu1 %v6008_v5  ;;  %v569_v0 = vld [vmem:[#allocation6 + $0xe08] sm:$0xff]  ;;  %v5824_v4 = vcombine.high %v441_v61, %v445_v62  ;;  %v150_v24 = vld [vmem:[#allocation6 + $0xf0] sm:$0xff] }
 0x11a   :  { %3507 = vmatpush2.bf16.msra.mxu0 %v5879_v10  ;;  %v573_v1 = vld [vmem:[#allocation6 + $0xe28] sm:$0xff]  ;;  %v5823_v10 = vcombine.low %v441_v61, %v445_v62  ;;  %v5665_v61 = vcombine.low %v282_v42, %v286_v43  ;;  %v5530_v62 = vcombine.high %v146_v23, %v150_v24  ;;  %v362_v42 = vld [vmem:[#allocation6 + $0x790] sm:$0xff] }
 0x11b   :  { %3508 = vmatprep.subr.bf16.mxu0 %v5872_v12  ;;  %v5952_v5 = vcombine.high %v569_v0, %v573_v1  ;;  %v5562_v12 = vcombine.high %v178_v6, %v182_v7  ;;  %v366_v43 = vld [vmem:[#allocation6 + $0x7b0] sm:$0xff] }
 0x11c   :  { %3550 = vmatpush2.bf16.msra.mxu1 %v6007_v11  ;;  %v5951_v11 = vcombine.low %v569_v0, %v573_v1  ;;  %v138_v1 = vld [vmem:[#allocation6 + $0x90] sm:$0xff] }
 0x11d   :  { %3551 = vmatprep.subr.bf16.mxu1 %v6000_v13  ;;  %v5690_v13 = vcombine.high %v306_v8, %v310_v9 }
 0x11e   :  { %3509 = vmatpush2.bf16.msra.mxu0 %v5871_v18  ;;  %v5561_v18 = vcombine.low %v178_v6, %v182_v7 }
 0x11f   :  { %3510 = vmatprep.subr.bf16.mxu0 %v5864_v20  ;;  %v5554_v20 = vcombine.high %v170_v14, %v174_v15 }
 0x120   :  { %3552 = vmatpush2.bf16.msra.mxu1 %v5999_v19  ;;  %v5689_v19 = vcombine.low %v306_v8, %v310_v9  ;;  %v130_v9 = vld [vmem:[#allocation6 + $0x50] sm:$0xff] }
 0x121   :  { %3553 = vmatprep.subr.bf16.mxu1 %v5992_v22  ;;  %v5682_v22 = vcombine.high %v298_v16, %v302_v17  ;;  %v122_v17 = vld [vmem:[#allocation6 + $0x10] sm:$0xff] }
 0x122   :  { %3511 = vmatpush2.bf16.msra.mxu0 %v5863_v30  ;;  %v294_v30 = vld [vmem:[#allocation6 + $0x570] sm:$0xff] }
 0x123   :  { %3512 = vmatprep.subr.bf16.mxu0 %v5856_v59  ;;  %v5553_v59 = vcombine.low %v170_v14, %v174_v15 }
 0x124   :  { %3554 = vmatpush2.bf16.msra.mxu1 %v5991_v31 }
 0x125   :  { %3555 = vmatprep.subr.bf16.mxu1 %v5984_v60 }
 0x126   :  { %3513 = vmatpush2.bf16.msra.mxu0 %v5855_v38  ;;  %v5674_v38 = vcombine.high %v290_v55, %v294_v30 }
 0x127   :  { %3514 = vmatprep.subr.bf16.mxu0 %v5848_v40  ;;  %v158_v40 = vld [vmem:[#allocation6 + $0x130] sm:$0xff] }
 0x128   :  { %3556 = vmatpush2.bf16.msra.mxu1 %v5983_v39  ;;  %v154_v39 = vld [vmem:[#allocation6 + $0x110] sm:$0xff] }
 0x129   :  { %3557 = vmatprep.subr.bf16.mxu1 %v5976_v41 }
 0x12a   :  { %3515 = vmatpush2.bf16.msra.mxu0 %v5847_v48 }
 0x12b   :  { %3516 = vmatprep.subr.bf16.mxu0 %v5840_v50  ;;  %v5673_v50 = vcombine.low %v290_v55, %v294_v30  ;;  %v242_v55 = vld [vmem:[#allocation6 + $0x3d0] sm:$0xff] }
 0x12c   :  { %3558 = vmatpush2.bf16.msra.mxu1 %v5975_v49  ;;  %v246_v30 = vld [vmem:[#allocation6 + $0x3f0] sm:$0xff] }
 0x12d   :  { %3559 = vmatprep.subr.bf16.mxu1 %v5968_v51  ;;  %v5538_v51 = vcombine.high %v154_v39, %v158_v40 }
 0x12e   :  { %3517 = vmatpush2.bf16.msra.mxu0 %v5839_v56 }
 0x12f   :  { %3518 = vmatprep.subr.bf16.mxu0 %v5832_v28  ;;  %v278_v28 = vld [vmem:[#allocation6 + $0x4f0] sm:$0xff] }
 0x130   :  { %3560 = vmatpush2.bf16.msra.mxu1 %v5967_v27  ;;  %v274_v27 = vld [vmem:[#allocation6 + $0x4d0] sm:$0xff] }
 0x131   :  { %3561 = vmatprep.subr.bf16.mxu1 %v5960_v57  ;;  %v5537_v57 = vcombine.low %v154_v39, %v158_v40  ;;  %v5658_v0 = vcombine.high %v274_v27, %v278_v28  ;;  %v5657_v6 = vcombine.low %v274_v27, %v278_v28  ;;  %v234_v40 = vld [vmem:[#allocation6 + $0x390] sm:$0xff]  ;;  %v5745_v27 = vcombine.low %v362_v42, %v366_v43 }
 0x132   :  { %3519 = vmatpush2.bf16.msra.mxu0 %v5831_v2  ;;  %v142_v2 = vld [vmem:[#allocation6 + $0xb0] sm:$0xff] }
 0x133   :  { %3520 = vmatprep.subr.bf16.mxu0 %v5824_v4  ;;  %v270_v4 = vld [vmem:[#allocation6 + $0x4b0] sm:$0xff]  ;;  %v5522_v7 = vcombine.high %v138_v1, %v142_v2 }
 0x134   :  { %3562 = vmatpush2.bf16.msra.mxu1 %v5959_v3  ;;  %v266_v3 = vld [vmem:[#allocation6 + $0x490] sm:$0xff] }
 0x135   :  { %3563 = vmatprep.subr.bf16.mxu1 %v5952_v5  ;;  %v5529_v5 = vcombine.low %v146_v23, %v150_v24  ;;  %v5650_v8 = vcombine.high %v266_v3, %v270_v4  ;;  %v5649_v14 = vcombine.low %v266_v3, %v270_v4  ;;  %v358_v23 = vld [vmem:[#allocation6 + $0x770] sm:$0xff] }
 0x136   :  { %3521 = vmatpush2.bf16.msra.mxu0 %v5823_v10  ;;  %v134_v10 = vld [vmem:[#allocation6 + $0x70] sm:$0xff] }
 0x137   :  { %3576 = vmatprep.subr.bf16.mxu0 %v5562_v12  ;;  %v262_v12 = vld [vmem:[#allocation6 + $0x470] sm:$0xff]  ;;  %v5514_v15 = vcombine.high %v130_v9, %v134_v10 }
 0x138   :  { %3564 = vmatpush2.bf16.msra.mxu1 %v5951_v11  ;;  %v258_v11 = vld [vmem:[#allocation6 + $0x450] sm:$0xff] }
 0x139   :  { %3619 = vmatprep.subr.bf16.mxu1 %v5690_v13  ;;  %v3266_v54 = vpop.f32.mrf.mxu0  ;;  %3523 = vmatmul.mubr.bf16.vlgmr.msra.gmra.mxu0 %v6361_v44  ;;  %v5521_v13 = vcombine.low %v138_v1, %v142_v2  ;;  %v5642_v16 = vcombine.high %v258_v11, %v262_v12  ;;  %v5641_v26 = vcombine.low %v258_v11, %v262_v12  ;;  %v350_v1 = vld [vmem:[#allocation6 + $0x730] sm:$0xff] }
 0x13a   :  { %3577 = vmatpush1.bf16.msra.mxu0 %v5561_v18  ;;  %3608 = vmatprep.mubr.bf16.mxu0 %v6319_v58  ;;  %v126_v18 = vld [vmem:[#allocation6 + $0x30] sm:$0xff] }
 0x13b   :  { %v3309_v31 = vpop.f32.mrf.mxu1  ;;  %3566 = vmatmul.mubr.bf16.vlgmr.msra.gmra.mxu1 %v6365_v47  ;;  %v6379_v34 = vpop.f32.mrf.mxu0  ;;  %3578 = vmatprep.subr.bf16.mxu0 %v5554_v20  ;;  %v254_v20 = vld [vmem:[#allocation6 + $0x430] sm:$0xff]  ;;  %v5506_v29 = vcombine.high %v122_v17, %v126_v18 }
 0x13c   :  { %v6377_v60 = vadd.f32 %v3309_v31, %v3266_v54  ;;  %3620 = vmatpush1.bf16.msra.mxu1 %v5689_v19  ;;  %3651 = vmatprep.mubr.bf16.mxu1 %v6327_v63  ;;  %v250_v19 = vld [vmem:[#allocation6 + $0x410] sm:$0xff] }
 0x13d   :  { %v6381_v37 = vpop.f32.mrf.mxu1  ;;  %3621 = vmatprep.subr.bf16.mxu1 %v5682_v22  ;;  %v3270_v41 = vpop.f32.mrf.mxu0  ;;  %v5513_v22 = vcombine.low %v130_v9, %v134_v10  ;;  %v5634_v54 = vcombine.high %v250_v19, %v254_v20  ;;  %v370_v31 = vld [vmem:[#allocation6 + $0x7d0] sm:$0xff] }
 0x13e   :  { %3579 = vmatpush1.bf16.msra.mxu0 %v5553_v59  ;;  %v374_v59 = vld [vmem:[#allocation6 + $0x7f0] sm:$0xff] }
 0x13f   :  { %v3313_v45 = vpop.f32.mrf.mxu1  ;;  %v3272_v49 = vpop.f32.mrf.mxu0  ;;  %3580 = vmatprep.subr.bf16.mxu0 %v5546_v36  ;;  %v5633_v36 = vcombine.low %v250_v19, %v254_v20  ;;  %v5754_v39 = vcombine.high %v370_v31, %v374_v59  ;;  %v342_v9 = vld [vmem:[#allocation6 + $0x6f0] sm:$0xff] }
 0x140   :  { %v6385_v48 = vadd.f32 %v3313_v45, %v3270_v41  ;;  %3622 = vmatpush1.bf16.msra.mxu1 %v5681_v35  ;;  %v5505_v35 = vcombine.low %v122_v17, %v126_v18  ;;  %v238_v41 = vld [vmem:[#allocation6 + $0x3b0] sm:$0xff]  ;;  %v5625_v45 = vcombine.low %v242_v55, %v246_v30 }
 0x141   :  { %v3315_v52 = vpop.f32.mrf.mxu1  ;;  %3623 = vmatprep.subr.bf16.mxu1 %v5674_v38  ;;  %v5626_v38 = vcombine.high %v242_v55, %v246_v30  ;;  %v5617_v24 = vcombine.low %v234_v40, %v238_v41  ;;  %v334_v17 = vld [vmem:[#allocation6 + $0x6b0] sm:$0xff] }
 0x142   :  { %v6387_v56 = vadd.f32 %v3315_v52, %v3272_v49  ;;  %3581 = vmatpush1.bf16.msra.mxu0 %v5545_v46  ;;  %v5753_v46 = vcombine.low %v370_v31, %v374_v59  ;;  %v5618_v49 = vcombine.high %v234_v40, %v238_v41  ;;  %v230_v52 = vld [vmem:[#allocation6 + $0x370] sm:$0xff] }
 0x143   :  { %3582 = vmatprep.subr.bf16.mxu0 %v5538_v51  ;;  %v226_v51 = vld [vmem:[#allocation6 + $0x350] sm:$0xff] }
 0x144   :  { %3624 = vmatpush1.bf16.msra.mxu1 %v5673_v50  ;;  %v5746_v50 = vcombine.high %v362_v42, %v366_v43  ;;  %v5610_v28 = vcombine.high %v226_v51, %v230_v52  ;;  %v5609_v2 = vcombine.low %v226_v51, %v230_v52  ;;  %v326_v55 = vld [vmem:[#allocation6 + $0x670] sm:$0xff] }
 0x145   :  { %3625 = vmatprep.subr.bf16.mxu1 %v5666_v53  ;;  %v354_v53 = vld [vmem:[#allocation6 + $0x750] sm:$0xff] }
 0x146   :  { %3583 = vmatpush1.bf16.msra.mxu0 %v5537_v57  ;;  %v5738_v57 = vcombine.high %v354_v53, %v358_v23  ;;  %v5737_v3 = vcombine.low %v354_v53, %v358_v23  ;;  %v318_v40 = vld [vmem:[#allocation6 + $0x630] sm:$0xff] }
 0x147   :  { %3584 = vmatprep.subr.bf16.mxu0 %v5530_v62  ;;  %v222_v62 = vld [vmem:[#allocation6 + $0x330] sm:$0xff] }
 0x148   :  { %3626 = vmatpush1.bf16.msra.mxu1 %v5665_v61  ;;  %v218_v61 = vld [vmem:[#allocation6 + $0x310] sm:$0xff] }
 0x149   :  { %3627 = vmatprep.subr.bf16.mxu1 %v5658_v0  ;;  %v346_v0 = vld [vmem:[#allocation6 + $0x710] sm:$0xff]  ;;  %v5602_v4 = vcombine.high %v218_v61, %v222_v62  ;;  %v5601_v10 = vcombine.low %v218_v61, %v222_v62 }
 0x14a   :  { %3585 = vmatpush1.bf16.msra.mxu0 %v5529_v5  ;;  %v5730_v5 = vcombine.high %v346_v0, %v350_v1  ;;  %v5729_v11 = vcombine.low %v346_v0, %v350_v1  ;;  %v566_v51 = vld [vmem:[#allocation6 + $0xdf0] sm:$0xff] }
 0x14b   :  { %3586 = vmatprep.subr.bf16.mxu0 %v5522_v7  ;;  %v214_v7 = vld [vmem:[#allocation6 + $0x2f0] sm:$0xff] }
 0x14c   :  { %3628 = vmatpush1.bf16.msra.mxu1 %v5657_v6  ;;  %v210_v6 = vld [vmem:[#allocation6 + $0x2d0] sm:$0xff] }
 0x14d   :  { %3629 = vmatprep.subr.bf16.mxu1 %v5650_v8  ;;  %v338_v8 = vld [vmem:[#allocation6 + $0x6d0] sm:$0xff]  ;;  %v5594_v12 = vcombine.high %v210_v6, %v214_v7  ;;  %v5593_v18 = vcombine.low %v210_v6, %v214_v7 }
 0x14e   :  { %3587 = vmatpush1.bf16.msra.mxu0 %v5521_v13  ;;  %v5722_v13 = vcombine.high %v338_v8, %v342_v9  ;;  %v5721_v19 = vcombine.low %v338_v8, %v342_v9  ;;  %v558_v61 = vld [vmem:[#allocation6 + $0xdb0] sm:$0xff] }
 0x14f   :  { %3588 = vmatprep.subr.bf16.mxu0 %v5514_v15  ;;  %v206_v15 = vld [vmem:[#allocation6 + $0x2b0] sm:$0xff] }
 0x150   :  { %3630 = vmatpush1.bf16.msra.mxu1 %v5649_v14  ;;  %v202_v14 = vld [vmem:[#allocation6 + $0x290] sm:$0xff] }
 0x151   :  { %3631 = vmatprep.subr.bf16.mxu1 %v5642_v16  ;;  %v330_v16 = vld [vmem:[#allocation6 + $0x690] sm:$0xff]  ;;  %v5586_v20 = vcombine.high %v202_v14, %v206_v15  ;;  %v5585_v30 = vcombine.low %v202_v14, %v206_v15 }
 0x152   :  { %3589 = vmatpush1.bf16.msra.mxu0 %v5513_v22  ;;  %v5714_v22 = vcombine.high %v330_v16, %v334_v17  ;;  %v5713_v31 = vcombine.low %v330_v16, %v334_v17  ;;  %v546_v6 = vld [vmem:[#allocation6 + $0xd50] sm:$0xff] }
 0x153   :  { %3590 = vmatprep.subr.bf16.mxu0 %v5506_v29  ;;  %v198_v29 = vld [vmem:[#allocation6 + $0x270] sm:$0xff] }
 0x154   :  { %3632 = vmatpush1.bf16.msra.mxu1 %v5641_v26  ;;  %v194_v26 = vld [vmem:[#allocation6 + $0x250] sm:$0xff] }
 0x155   :  { %3633 = vmatprep.subr.bf16.mxu1 %v5634_v54  ;;  %v322_v54 = vld [vmem:[#allocation6 + $0x650] sm:$0xff]  ;;  %v5578_v59 = vcombine.high %v194_v26, %v198_v29  ;;  %v5577_v41 = vcombine.low %v194_v26, %v198_v29 }
 0x156   :  { %3591 = vmatpush1.bf16.msra.mxu0 %v5505_v35  ;;  %v5706_v35 = vcombine.high %v322_v54, %v326_v55  ;;  %v5705_v42 = vcombine.low %v322_v54, %v326_v55  ;;  %v550_v7 = vld [vmem:[#allocation6 + $0xd70] sm:$0xff] }
 0x157   :  { %3592 = vmatprep.subr.bf16.mxu0 %v5626_v38  ;;  %v190_v38 = vld [vmem:[#allocation6 + $0x230] sm:$0xff]  ;;  %v5930_v16 = vcombine.high %v546_v6, %v550_v7  ;;  %v5929_v55 = vcombine.low %v546_v6, %v550_v7 }
 0x158   :  { %3634 = vmatpush1.bf16.msra.mxu1 %v5633_v36  ;;  %v186_v36 = vld [vmem:[#allocation6 + $0x210] sm:$0xff] }
 0x159   :  { %3635 = vmatprep.subr.bf16.mxu1 %v5754_v39  ;;  %v314_v39 = vld [vmem:[#allocation6 + $0x610] sm:$0xff]  ;;  %v5570_v43 = vcombine.high %v186_v36, %v190_v38  ;;  %v5569_v52 = vcombine.low %v186_v36, %v190_v38 }
 0x15a   :  { %3593 = vmatpush2.bf16.msra.mxu0 %v5625_v45  ;;  %v5698_v45 = vcombine.high %v314_v39, %v318_v40  ;;  %v5697_v53 = vcombine.low %v314_v39, %v318_v40  ;;  %v410_v17 = vld [vmem:[#allocation6 + $0x910] sm:$0xff] }
 0x15b   :  { %3594 = vmatprep.subr.bf16.mxu0 %v5618_v49  ;;  %v438_v49 = vld [vmem:[#allocation6 + $0x9f0] sm:$0xff] }
 0x15c   :  { %3636 = vmatpush2.bf16.msra.mxu1 %v5753_v46  ;;  %v434_v46 = vld [vmem:[#allocation6 + $0x9d0] sm:$0xff] }
 0x15d   :  { %3637 = vmatprep.subr.bf16.mxu1 %v5746_v50  ;;  %v562_v50 = vld [vmem:[#allocation6 + $0xdd0] sm:$0xff]  ;;  %v5818_v23 = vcombine.high %v434_v46, %v438_v49  ;;  %v5817_v62 = vcombine.low %v434_v46, %v438_v49 }
 0x15e   :  { %3595 = vmatpush2.bf16.msra.mxu0 %v5617_v24  ;;  %v5946_v24 = vcombine.high %v562_v50, %v566_v51  ;;  %v5945_v0 = vcombine.low %v562_v50, %v566_v51  ;;  %v402_v36 = vld [vmem:[#allocation6 + $0x8d0] sm:$0xff] }
 0x15f   :  { %3596 = vmatprep.subr.bf16.mxu0 %v5610_v28  ;;  %v430_v28 = vld [vmem:[#allocation6 + $0x9b0] sm:$0xff] }
 0x160   :  { %3638 = vmatpush2.bf16.msra.mxu1 %v5745_v27  ;;  %v426_v27 = vld [vmem:[#allocation6 + $0x990] sm:$0xff] }
 0x161   :  { %3639 = vmatprep.subr.bf16.mxu1 %v5738_v57  ;;  %v554_v57 = vld [vmem:[#allocation6 + $0xd90] sm:$0xff]  ;;  %v5810_v1 = vcombine.high %v426_v27, %v430_v28 }
 0x162   :  { %3597 = vmatpush2.bf16.msra.mxu0 %v5609_v2  ;;  %v5938_v2 = vcombine.high %v554_v57, %v558_v61  ;;  %v406_v38 = vld [vmem:[#allocation6 + $0x8f0] sm:$0xff] }
 0x163   :  { %3598 = vmatprep.subr.bf16.mxu0 %v5602_v4  ;;  %v422_v4 = vld [vmem:[#allocation6 + $0x970] sm:$0xff] }
 0x164   :  { %3640 = vmatpush2.bf16.msra.mxu1 %v5737_v3  ;;  %v418_v3 = vld [vmem:[#allocation6 + $0x950] sm:$0xff] }
 0x165   :  { %3641 = vmatprep.subr.bf16.mxu1 %v5730_v5  ;;  %v5801_v29 = vcombine.low %v418_v3, %v422_v4  ;;  %v530_v40 = vld [vmem:[#allocation6 + $0xcd0] sm:$0xff] }
 0x166   :  { %3599 = vmatpush2.bf16.msra.mxu0 %v5601_v10  ;;  %v5809_v10 = vcombine.low %v426_v27, %v430_v28  ;;  %v394_v49 = vld [vmem:[#allocation6 + $0x890] sm:$0xff] }
 0x167   :  { %3600 = vmatprep.subr.bf16.mxu0 %v5594_v12  ;;  %v5937_v12 = vcombine.low %v554_v57, %v558_v61  ;;  %v398_v50 = vld [vmem:[#allocation6 + $0x8b0] sm:$0xff] }
 0x168   :  { %3642 = vmatpush2.bf16.msra.mxu1 %v5729_v11  ;;  %v526_v51 = vld [vmem:[#allocation6 + $0xcb0] sm:$0xff] }
 0x169   :  { %3643 = vmatprep.subr.bf16.mxu1 %v5722_v13  ;;  %v5802_v13 = vcombine.high %v418_v3, %v422_v4  ;;  %v386_v27 = vld [vmem:[#allocation6 + $0x850] sm:$0xff] }
 0x16a   :  { %3601 = vmatpush2.bf16.msra.mxu0 %v5593_v18  ;;  %v414_v18 = vld [vmem:[#allocation6 + $0x930] sm:$0xff] }
 0x16b   :  { %3602 = vmatprep.subr.bf16.mxu0 %v5586_v20  ;;  %v542_v20 = vld [vmem:[#allocation6 + $0xd30] sm:$0xff] }
 0x16c   :  { %3644 = vmatpush2.bf16.msra.mxu1 %v5721_v19  ;;  %v538_v19 = vld [vmem:[#allocation6 + $0xd10] sm:$0xff] }
 0x16d   :  { %3645 = vmatprep.subr.bf16.mxu1 %v5714_v22  ;;  %v390_v28 = vld [vmem:[#allocation6 + $0x870] sm:$0xff] }
 0x16e   :  { %3603 = vmatpush2.bf16.msra.mxu0 %v5585_v30  ;;  %v5794_v30 = vcombine.high %v410_v17, %v414_v18  ;;  %v514_v57 = vld [vmem:[#allocation6 + $0xc50] sm:$0xff]  ;;  %v5769_v7 = vcombine.low %v386_v27, %v390_v28 }
 0x16f   :  { %3604 = vmatprep.subr.bf16.mxu0 %v5578_v59  ;;  %v518_v61 = vld [vmem:[#allocation6 + $0xc70] sm:$0xff] }
 0x170   :  { %3646 = vmatpush2.bf16.msra.mxu1 %v5713_v31  ;;  %v378_v3 = vld [vmem:[#allocation6 + $0x810] sm:$0xff] }
 0x171   :  { %3647 = vmatprep.subr.bf16.mxu1 %v5706_v35  ;;  %v5922_v35 = vcombine.high %v538_v19, %v542_v20  ;;  %v382_v4 = vld [vmem:[#allocation6 + $0x830] sm:$0xff] }
 0x172   :  { %3605 = vmatpush2.bf16.msra.mxu0 %v5577_v41  ;;  %v534_v41 = vld [vmem:[#allocation6 + $0xcf0] sm:$0xff] }
 0x173   :  { %3606 = vmatprep.subr.bf16.mxu0 %v5570_v43  ;;  %v5921_v43 = vcombine.low %v538_v19, %v542_v20  ;;  %v5914_v46 = vcombine.high %v530_v40, %v534_v41  ;;  %v510_v6 = vld [vmem:[#allocation6 + $0xc30] sm:$0xff] }
 0x174   :  { %3648 = vmatpush2.bf16.msra.mxu1 %v5705_v42  ;;  %v5793_v42 = vcombine.low %v410_v17, %v414_v18  ;;  %v630_v17 = vld [vmem:[#allocation6 + $0xff0] sm:$0xff]  ;;  %v5761_v18 = vcombine.low %v378_v3, %v382_v4 }
 0x175   :  { %3649 = vmatprep.subr.bf16.mxu1 %v5698_v45  ;;  %v5786_v45 = vcombine.high %v402_v36, %v406_v38 }
 0x176   :  { %3607 = vmatpush2.bf16.msra.mxu0 %v5569_v52  ;;  %v5785_v52 = vcombine.low %v402_v36, %v406_v38  ;;  %v482_v36 = vld [vmem:[#allocation6 + $0xb50] sm:$0xff] }
 0x177   :  { %3662 = vmatprep.subr.bf16.mxu0 %v5818_v23  ;;  %v5778_v23 = vcombine.high %v394_v49, %v398_v50  ;;  %v486_v38 = vld [vmem:[#allocation6 + $0xb70] sm:$0xff] }
 0x178   :  { %3650 = vmatpush2.bf16.msra.mxu1 %v5697_v53  ;;  %v5913_v53 = vcombine.low %v530_v40, %v534_v41  ;;  %v614_v40 = vld [vmem:[#allocation6 + $0xf70] sm:$0xff] }
 0x179   :  { %3705 = vmatprep.subr.bf16.mxu1 %v5946_v24  ;;  %v3352_v5 = vpop.f32.mrf.mxu0  ;;  %3609 = vmatmul.mubr.bf16.vlgmr.msra.gmra.mxu0 %v6333_v21 }
 0x17a   :  { %v3353_v8 = vadd.f32 %v3352_v5, %v6377_v60  ;;  %3663 = vmatpush1.bf16.msra.mxu0 %v5817_v62  ;;  %3694 = vmatprep.mubr.bf16.mxu0 %v6349_v32  ;;  %v5777_v62 = vcombine.low %v394_v49, %v398_v50  ;;  %v506_v5 = vld [vmem:[#allocation6 + $0xc10] sm:$0xff] }
 0x17b   :  { %v3395_v9 = vpop.f32.mrf.mxu1  ;;  %3652 = vmatmul.mubr.bf16.vlgmr.msra.gmra.mxu1 %v6341_v25  ;;  %v6392_v11 = vpop.f32.mrf.mxu0  ;;  %3664 = vmatprep.subr.bf16.mxu0 %v5810_v1  ;;  %v5770_v1 = vcombine.high %v386_v27, %v390_v28  ;;  %v478_v49 = vld [vmem:[#allocation6 + $0xb30] sm:$0xff] }
 0x17c   :  { %3706 = vmatpush1.bf16.msra.mxu1 %v5945_v0  ;;  %v6394_v14 = vadd.f32 %v3395_v9, %v3353_v8  ;;  %3737 = vmatprep.mubr.bf16.mxu1 %v6354_v33  ;;  %v5897_v8 = vcombine.low %v514_v57, %v518_v61  ;;  %v5762_v9 = vcombine.high %v378_v3, %v382_v4  ;;  %v602_v50 = vld [vmem:[#allocation6 + $0xf10] sm:$0xff] }
 0x17d   :  { %v6396_v15 = vpop.f32.mrf.mxu1  ;;  %3707 = vmatprep.subr.bf16.mxu1 %v5938_v2  ;;  %v3356_v60 = vpop.f32.mrf.mxu0  ;;  %v5898_v2 = vcombine.high %v514_v57, %v518_v61  ;;  %v470_v27 = vld [vmem:[#allocation6 + $0xaf0] sm:$0xff] }
 0x17e   :  { %v3357_v22 = vadd.f32 %v3356_v60, %v6385_v48  ;;  %3665 = vmatpush1.bf16.msra.mxu0 %v5809_v10  ;;  %v5890_v10 = vcombine.high %v506_v5, %v510_v6  ;;  %v5889_v60 = vcombine.low %v506_v5, %v510_v6  ;;  %v594_v28 = vld [vmem:[#allocation6 + $0xed0] sm:$0xff]  ;;  %vm3971_vm2 = vcmp.ge.f32.partialorder %v6394_v14, 0.0 }
 0x17f   :  { %v3399_v26 = vpop.f32.mrf.mxu1  ;;  %v3358_v54 = vpop.f32.mrf.mxu0  ;;  %3666 = vmatprep.subr.bf16.mxu0 %v5802_v13  ;;  %v502_v13 = vld [vmem:[#allocation6 + $0xbf0] sm:$0xff] }
 0x180   :  { %3708 = vmatpush1.bf16.msra.mxu1 %v5937_v12  ;;  %v6401_v31 = vadd.f32 %v3399_v26, %v3357_v22  ;;  %v3359_v59 = vadd.f32 %v3358_v54, %v6387_v56  ;;  %v522_v56 = vld [vmem:[#allocation6 + $0xc90] sm:$0xff] }
 0x181   :  { %3709 = vmatprep.subr.bf16.mxu1 %v5930_v16  ;;  %v3401_v39 = vpop.f32.mrf.mxu1  ;;  %v5906_v24 = vcombine.high %v522_v56, %v526_v51  ;;  %v5905_v0 = vcombine.low %v522_v56, %v526_v51  ;;  %v498_v12 = vld [vmem:[#allocation6 + $0xbd0] sm:$0xff]  ;;  %v5865_v51 = vcombine.low %v482_v36, %v486_v38 }
 0x182   :  { %v6404_v48 = vadd.f32 %v3401_v39, %v3359_v59  ;;  %3667 = vmatpush1.bf16.msra.mxu0 %v5801_v29  ;;  %v626_v16 = vld [vmem:[#allocation6 + $0xfd0] sm:$0xff]  ;;  %v5882_v19 = vcombine.high %v498_v12, %v502_v13  ;;  %vm3979_vm6 = vcmp.ge.f32.partialorder %v6401_v31, 0.0 }
 0x183   :  { %3668 = vmatprep.subr.bf16.mxu0 %v5794_v30  ;;  %v6010_v20 = vcombine.high %v626_v16, %v630_v17  ;;  %v490_v22 = vld [vmem:[#allocation6 + $0xb90] sm:$0xff]  ;;  %v6009_v30 = vcombine.low %v626_v16, %v630_v17 }
 0x184   :  { %3710 = vmatpush1.bf16.msra.mxu1 %v5929_v55  ;;  %v494_v26 = vld [vmem:[#allocation6 + $0xbb0] sm:$0xff]  ;;  %v5881_v55 = vcombine.low %v498_v12, %v502_v13  ;;  %vm3980_vm4 = vcmp.ge.f32.partialorder %v6404_v48, 0.0 }
 0x185   :  { %3711 = vmatprep.subr.bf16.mxu1 %v5922_v35  ;;  %v618_v29 = vld [vmem:[#allocation6 + $0xf90] sm:$0xff]  ;;  %v5874_v59 = vcombine.high %v490_v22, %v494_v26  ;;  %v5873_v41 = vcombine.low %v490_v22, %v494_v26 }
 0x186   :  { %3669 = vmatpush1.bf16.msra.mxu0 %v5793_v42  ;;  %v622_v54 = vld [vmem:[#allocation6 + $0xfb0] sm:$0xff] }
 0x187   :  { %3670 = vmatprep.subr.bf16.mxu0 %v5786_v45  ;;  %v6002_v35 = vcombine.high %v618_v29, %v622_v54  ;;  %v610_v39 = vld [vmem:[#allocation6 + $0xf50] sm:$0xff]  ;;  %v6001_v42 = vcombine.low %v618_v29, %v622_v54 }
 0x188   :  { %3712 = vmatpush1.bf16.msra.mxu1 %v5921_v43  ;;  %v5866_v43 = vcombine.high %v482_v36, %v486_v38  ;;  %v5994_v45 = vcombine.high %v610_v39, %v614_v40  ;;  %v606_v56 = vld [vmem:[#allocation6 + $0xf30] sm:$0xff]  ;;  %v183_v36 = vld [vmem:[#allocation6 + $0x1f8] sm:$0xff] }
 0x189   :  { %3713 = vmatprep.subr.bf16.mxu1 %v5914_v46  ;;  %v474_v46 = vld [vmem:[#allocation6 + $0xb10] sm:$0xff]  ;;  %v307_v38 = vld [vmem:[#allocation6 + $0x5d8] sm:$0xff] }
 0x18a   :  { %3671 = vmatpush1.bf16.msra.mxu0 %v5785_v52  ;;  %v5993_v52 = vcombine.low %v610_v39, %v614_v40  ;;  %v598_v57 = vld [vmem:[#allocation6 + $0xef0] sm:$0xff]  ;;  %v5857_v61 = vcombine.low %v474_v46, %v478_v49  ;;  %v311_v39 = vld [vmem:[#allocation6 + $0x5f8] sm:$0xff] }
 0x18b   :  { %3672 = vmatprep.subr.bf16.mxu0 %v5778_v23  ;;  %v5986_v23 = vcombine.high %v602_v50, %v606_v56  ;;  %v462_v3 = vld [vmem:[#allocation6 + $0xab0] sm:$0xff] }
 0x18c   :  { %3714 = vmatpush1.bf16.msra.mxu1 %v5913_v53  ;;  %v5858_v53 = vcombine.high %v474_v46, %v478_v49  ;;  %v586_v4 = vld [vmem:[#allocation6 + $0xe90] sm:$0xff]  ;;  %v175_v46 = vld [vmem:[#allocation6 + $0x1b8] sm:$0xff] }
 0x18d   :  { %3715 = vmatprep.subr.bf16.mxu1 %v5906_v24  ;;  %v466_v24 = vld [vmem:[#allocation6 + $0xad0] sm:$0xff]  ;;  %v299_v49 = vld [vmem:[#allocation6 + $0x598] sm:$0xff] }
 0x18e   :  { %3673 = vmatpush1.bf16.msra.mxu0 %v5777_v62  ;;  %v5985_v62 = vcombine.low %v602_v50, %v606_v56  ;;  %v590_v5 = vld [vmem:[#allocation6 + $0xeb0] sm:$0xff]  ;;  %v5849_v6 = vcombine.low %v466_v24, %v470_v27  ;;  %v303_v50 = vld [vmem:[#allocation6 + $0x5b8] sm:$0xff] }
 0x18f   :  { %3674 = vmatprep.subr.bf16.mxu0 %v5770_v1  ;;  %v5978_v1 = vcombine.high %v594_v28, %v598_v57  ;;  %v454_v12 = vld [vmem:[#allocation6 + $0xa70] sm:$0xff] }
 0x190   :  { %3716 = vmatpush1.bf16.msra.mxu1 %v5905_v0  ;;  %v5850_v0 = vcombine.high %v466_v24, %v470_v27  ;;  %v578_v13 = vld [vmem:[#allocation6 + $0xe50] sm:$0xff]  ;;  %v167_v24 = vld [vmem:[#allocation6 + $0x178] sm:$0xff] }
 0x191   :  { %3717 = vmatprep.subr.bf16.mxu1 %v5898_v2  ;;  %v458_v2 = vld [vmem:[#allocation6 + $0xa90] sm:$0xff] }
 0x192   :  { %3675 = vmatpush1.bf16.msra.mxu0 %v5769_v7  ;;  %v5977_v7 = vcombine.low %v594_v28, %v598_v57  ;;  %v582_v16 = vld [vmem:[#allocation6 + $0xe70] sm:$0xff]  ;;  %v5841_v17 = vcombine.low %v458_v2, %v462_v3  ;;  %v291_v28 = vld [vmem:[#allocation6 + $0x558] sm:$0xff] }
 0x193   :  { %3676 = vmatprep.subr.bf16.mxu0 %v5762_v9  ;;  %v5970_v9 = vcombine.high %v586_v4, %v590_v5  ;;  %v446_v22 = vld [vmem:[#allocation6 + $0xa30] sm:$0xff]  ;;  %v295_v57 = vld [vmem:[#allocation6 + $0x578] sm:$0xff] }
 0x194   :  { %3718 = vmatpush1.bf16.msra.mxu1 %v5897_v8  ;;  %v5842_v8 = vcombine.high %v458_v2, %v462_v3  ;;  %v570_v26 = vld [vmem:[#allocation6 + $0xe10] sm:$0xff]  ;;  %v5683_v2 = vcombine.low %v299_v49, %v303_v50 }
 0x195   :  { %3719 = vmatprep.subr.bf16.mxu1 %v5890_v10  ;;  %v450_v10 = vld [vmem:[#allocation6 + $0xa50] sm:$0xff] }
 0x196   :  { %3677 = vmatpush1.bf16.msra.mxu0 %v5761_v18  ;;  %v5969_v18 = vcombine.low %v586_v4, %v590_v5  ;;  %v574_v29 = vld [vmem:[#allocation6 + $0xe30] sm:$0xff]  ;;  %v5833_v54 = vcombine.low %v450_v10, %v454_v12  ;;  %v5676_v5 = vcombine.high %v291_v28, %v295_v57 }
 0x197   :  { %3678 = vmatprep.subr.bf16.mxu0 %v5882_v19  ;;  %v5962_v19 = vcombine.high %v578_v13, %v582_v16 }
 0x198   :  { %3720 = vmatpush1.bf16.msra.mxu1 %v5889_v60  ;;  %v5834_v60 = vcombine.high %v450_v10, %v454_v12  ;;  %v287_v10 = vld [vmem:[#allocation6 + $0x538] sm:$0xff] }
 0x199   :  { %3721 = vmatprep.subr.bf16.mxu1 %v6010_v20  ;;  %v442_v20 = vld [vmem:[#allocation6 + $0xa10] sm:$0xff] }
 0x19a   :  { %3679 = vmatpush2.bf16.msra.mxu0 %v5881_v55  ;;  %v5961_v55 = vcombine.low %v578_v13, %v582_v16  ;;  %v5825_v40 = vcombine.low %v442_v20, %v446_v22 }
 0x19b   :  { %3680 = vmatprep.subr.bf16.mxu0 %v5874_v59  ;;  %v5954_v59 = vcombine.high %v570_v26, %v574_v29 }
 0x19c   :  { %3722 = vmatpush2.bf16.msra.mxu1 %v6009_v30  ;;  %v5826_v30 = vcombine.high %v442_v20, %v446_v22  ;;  %v147_v22 = vld [vmem:[#allocation6 + $0xd8] sm:$0xff] }
 0x19d   :  { %3723 = vmatprep.subr.bf16.mxu1 %v6002_v35  ;;  %v179_v35 = vld [vmem:[#allocation6 + $0x1d8] sm:$0xff] }
 0x19e   :  { %3681 = vmatpush2.bf16.msra.mxu0 %v5873_v41  ;;  %v5953_v41 = vcombine.low %v570_v26, %v574_v29  ;;  %v5563_v56 = vcombine.low %v179_v35, %v183_v36  ;;  %v275_v29 = vld [vmem:[#allocation6 + $0x4d8] sm:$0xff] }
 0x19f   :  { %3682 = vmatprep.subr.bf16.mxu0 %v5866_v43  ;;  %v5692_v43 = vcombine.high %v307_v38, %v311_v39 }
 0x1a0   :  { %3724 = vmatpush2.bf16.msra.mxu1 %v6001_v42  ;;  %v5564_v42 = vcombine.high %v179_v35, %v183_v36  ;;  %v139_v35 = vld [vmem:[#allocation6 + $0x98] sm:$0xff] }
 0x1a1   :  { %3725 = vmatprep.subr.bf16.mxu1 %v5994_v45  ;;  %v171_v45 = vld [vmem:[#allocation6 + $0x198] sm:$0xff] }
 0x1a2   :  { %3683 = vmatpush2.bf16.msra.mxu0 %v5865_v51  ;;  %v5691_v51 = vcombine.low %v307_v38, %v311_v39  ;;  %v143_v36 = vld [vmem:[#allocation6 + $0xb8] sm:$0xff] }
 0x1a3   :  { %3684 = vmatprep.subr.bf16.mxu0 %v5858_v53  ;;  %v5684_v53 = vcombine.high %v299_v49, %v303_v50  ;;  %v267_v38 = vld [vmem:[#allocation6 + $0x498] sm:$0xff] }
 0x1a4   :  { %3726 = vmatpush2.bf16.msra.mxu1 %v5993_v52  ;;  %v5556_v52 = vcombine.high %v171_v45, %v175_v46  ;;  %v271_v39 = vld [vmem:[#allocation6 + $0x4b8] sm:$0xff] }
 0x1a5   :  { %3727 = vmatprep.subr.bf16.mxu1 %v5986_v23  ;;  %v163_v23 = vld [vmem:[#allocation6 + $0x158] sm:$0xff] }
 0x1a6   :  { %3685 = vmatpush2.bf16.msra.mxu0 %v5857_v61  ;;  %v5548_v3 = vcombine.high %v163_v23, %v167_v24  ;;  %v5547_v13 = vcombine.low %v163_v23, %v167_v24  ;;  %v259_v49 = vld [vmem:[#allocation6 + $0x458] sm:$0xff] }
 0x1a7   :  { %3686 = vmatprep.subr.bf16.mxu0 %v5850_v0  ;;  %v263_v50 = vld [vmem:[#allocation6 + $0x478] sm:$0xff] }
 0x1a8   :  { %3728 = vmatpush2.bf16.msra.mxu1 %v5985_v62  ;;  %v5555_v62 = vcombine.low %v171_v45, %v175_v46  ;;  %v131_v45 = vld [vmem:[#allocation6 + $0x58] sm:$0xff] }
 0x1a9   :  { %3729 = vmatprep.subr.bf16.mxu1 %v5978_v1  ;;  %v135_v46 = vld [vmem:[#allocation6 + $0x78] sm:$0xff] }
 0x1aa   :  { %3687 = vmatpush2.bf16.msra.mxu0 %v5849_v6  ;;  %v155_v6 = vld [vmem:[#allocation6 + $0x118] sm:$0xff] }
 0x1ab   :  { %3688 = vmatprep.subr.bf16.mxu0 %v5842_v8  ;;  %v123_v23 = vld [vmem:[#allocation6 + $0x18] sm:$0xff] }
 0x1ac   :  { %3730 = vmatpush2.bf16.msra.mxu1 %v5977_v7  ;;  %v159_v7 = vld [vmem:[#allocation6 + $0x138] sm:$0xff] }
 0x1ad   :  { %3731 = vmatprep.subr.bf16.mxu1 %v5970_v9  ;;  %v283_v9 = vld [vmem:[#allocation6 + $0x518] sm:$0xff] }
 0x1ae   :  { %3689 = vmatpush2.bf16.msra.mxu0 %v5841_v17  ;;  %v5668_v20 = vcombine.high %v283_v9, %v287_v10  ;;  %v127_v24 = vld [vmem:[#allocation6 + $0x38] sm:$0xff] }
 0x1af   :  { %3690 = vmatprep.subr.bf16.mxu0 %v5834_v60  ;;  %v5540_v60 = vcombine.high %v155_v6, %v159_v7 }
 0x1b0   :  { %3732 = vmatpush2.bf16.msra.mxu1 %v5969_v18  ;;  %v5675_v18 = vcombine.low %v291_v28, %v295_v57  ;;  %v255_v28 = vld [vmem:[#allocation6 + $0x438] sm:$0xff]  ;;  %v5515_v57 = vcombine.low %v131_v45, %v135_v46 }
 0x1b1   :  { %3733 = vmatprep.subr.bf16.mxu1 %v5962_v19 }
 0x1b2   :  { %3691 = vmatpush2.bf16.msra.mxu0 %v5833_v54  ;;  %v279_v54 = vld [vmem:[#allocation6 + $0x4f8] sm:$0xff] }
 0x1b3   :  { %3692 = vmatprep.subr.bf16.mxu0 %v5826_v30 }
 0x1b4   :  { %3734 = vmatpush2.bf16.msra.mxu1 %v5961_v55  ;;  %v5667_v55 = vcombine.low %v283_v9, %v287_v10 }
 0x1b5   :  { %3735 = vmatprep.subr.bf16.mxu1 %v5954_v59  ;;  %v5660_v59 = vcombine.high %v275_v29, %v279_v54 }
 0x1b6   :  { %3693 = vmatpush2.bf16.msra.mxu0 %v5825_v40 }
 0x1b7   :  { %3748 = vmatprep.subr.bf16.mxu0 %v5564_v42  ;;  %v5524_v42 = vcombine.high %v139_v35, %v143_v36 }
 0x1b8   :  { %3736 = vmatpush2.bf16.msra.mxu1 %v5953_v41  ;;  %v5659_v41 = vcombine.low %v275_v29, %v279_v54  ;;  %v227_v29 = vld [vmem:[#allocation6 + $0x358] sm:$0xff] }
 0x1b9   :  { %3791 = vmatprep.subr.bf16.mxu1 %v5692_v43  ;;  %v3438_v27 = vpop.f32.mrf.mxu0  ;;  %3695 = vmatmul.mubr.bf16.vlgmr.msra.gmra.mxu0 %v6361_v44  ;;  %v5652_v43 = vcombine.high %v267_v38, %v271_v39  ;;  %v231_v54 = vld [vmem:[#allocation6 + $0x378] sm:$0xff] }
 0x1ba   :  { %3749 = vmatpush1.bf16.msra.mxu0 %v5563_v56  ;;  %3780 = vmatprep.mubr.bf16.mxu0 %v6319_v58  ;;  %v151_v58 = vld [vmem:[#allocation6 + $0xf8] sm:$0xff]  ;;  %v5523_v56 = vcombine.low %v139_v35, %v143_v36  ;;  %v5612_v35 = vcombine.high %v227_v29, %v231_v54 }
 0x1bb   :  { %v3481_v61 = vpop.f32.mrf.mxu1  ;;  %3738 = vmatmul.mubr.bf16.vlgmr.msra.gmra.mxu1 %v6365_v47  ;;  %v6410_v1 = vpop.f32.mrf.mxu0  ;;  %3750 = vmatprep.subr.bf16.mxu0 %v5556_v52  ;;  %v5532_v30 = vcombine.high %v147_v22, %v151_v58  ;;  %v5531_v40 = vcombine.low %v147_v22, %v151_v58  ;;  %v5516_v52 = vcombine.high %v131_v45, %v135_v46 }
 0x1bc   :  { %v6408_v0 = vadd.f32 %v3481_v61, %v3438_v27  ;;  %3792 = vmatpush1.bf16.msra.mxu1 %v5691_v51  ;;  %3823 = vmatprep.mubr.bf16.mxu1 %v6327_v63  ;;  %v5539_v63 = vcombine.low %v155_v6, %v159_v7  ;;  %v5651_v51 = vcombine.low %v267_v38, %v271_v39  ;;  %v251_v27 = vld [vmem:[#allocation6 + $0x418] sm:$0xff] }
 0x1bd   :  { %v6412_v4 = vpop.f32.mrf.mxu1  ;;  %3793 = vmatprep.subr.bf16.mxu1 %v5684_v53  ;;  %v3442_v8 = vpop.f32.mrf.mxu0  ;;  %v5644_v53 = vcombine.high %v259_v49, %v263_v50  ;;  %v5643_v61 = vcombine.low %v259_v49, %v263_v50  ;;  %v371_v6 = vld [vmem:[#allocation6 + $0x7d8] sm:$0xff]  ;;  %v5635_v9 = vcombine.low %v251_v27, %v255_v28 }
 0x1be   :  { %3751 = vmatpush1.bf16.msra.mxu0 %v5555_v62  ;;  %v5508_v62 = vcombine.high %v123_v23, %v127_v24  ;;  %v375_v7 = vld [vmem:[#allocation6 + $0x7f8] sm:$0xff] }
 0x1bf   :  { %v3485_v12 = vpop.f32.mrf.mxu1  ;;  %v3444_v17 = vpop.f32.mrf.mxu0  ;;  %3752 = vmatprep.subr.bf16.mxu0 %v5548_v3  ;;  %v243_v3 = vld [vmem:[#allocation6 + $0x3d8] sm:$0xff] }
 0x1c0   :  { %v6416_v16 = vadd.f32 %v3485_v12, %v3442_v8  ;;  %3794 = vmatpush1.bf16.msra.mxu1 %v5683_v2  ;;  %v5636_v2 = vcombine.high %v251_v27, %v255_v28  ;;  %v5507_v8 = vcombine.low %v123_v23, %v127_v24  ;;  %v5756_v12 = vcombine.high %v371_v6, %v375_v7  ;;  %v219_v38 = vld [vmem:[#allocation6 + $0x318] sm:$0xff] }
 0x1c1   :  { %v3487_v19 = vpop.f32.mrf.mxu1  ;;  %3795 = vmatprep.subr.bf16.mxu1 %v5676_v5  ;;  %v247_v5 = vld [vmem:[#allocation6 + $0x3f8] sm:$0xff] }
 0x1c2   :  { %v6418_v26 = vadd.f32 %v3487_v19, %v3444_v17  ;;  %3753 = vmatpush1.bf16.msra.mxu0 %v5547_v13  ;;  %v5628_v10 = vcombine.high %v243_v3, %v247_v5  ;;  %v235_v13 = vld [vmem:[#allocation6 + $0x398] sm:$0xff]  ;;  %v5627_v19 = vcombine.low %v243_v3, %v247_v5 }
 0x1c3   :  { %3754 = vmatprep.subr.bf16.mxu0 %v5540_v60  ;;  %v239_v17 = vld [vmem:[#allocation6 + $0x3b8] sm:$0xff] }
 0x1c4   :  { %3796 = vmatpush1.bf16.msra.mxu1 %v5675_v18  ;;  %v363_v18 = vld [vmem:[#allocation6 + $0x798] sm:$0xff]  ;;  %v5620_v22 = vcombine.high %v235_v13, %v239_v17 }
 0x1c5   :  { %3797 = vmatprep.subr.bf16.mxu1 %v5668_v20  ;;  %v367_v60 = vld [vmem:[#allocation6 + $0x7b8] sm:$0xff]  ;;  %v5755_v20 = vcombine.low %v371_v6, %v375_v7 }
 0x1c6   :  { %3755 = vmatpush1.bf16.msra.mxu0 %v5539_v63  ;;  %v5748_v58 = vcombine.high %v363_v18, %v367_v60  ;;  %v355_v63 = vld [vmem:[#allocation6 + $0x758] sm:$0xff] }
 0x1c7   :  { %3756 = vmatprep.subr.bf16.mxu0 %v5532_v30  ;;  %v5619_v30 = vcombine.low %v235_v13, %v239_v17  ;;  %v223_v39 = vld [vmem:[#allocation6 + $0x338] sm:$0xff] }
 0x1c8   :  { %3798 = vmatpush1.bf16.msra.mxu1 %v5667_v55  ;;  %v359_v55 = vld [vmem:[#allocation6 + $0x778] sm:$0xff]  ;;  %v5604_v45 = vcombine.high %v219_v38, %v223_v39 }
 0x1c9   :  { %3799 = vmatprep.subr.bf16.mxu1 %v5660_v59  ;;  %v5747_v59 = vcombine.low %v363_v18, %v367_v60  ;;  %v5740_v36 = vcombine.high %v355_v63, %v359_v55  ;;  %v211_v49 = vld [vmem:[#allocation6 + $0x2d8] sm:$0xff] }
 0x1ca   :  { %3757 = vmatpush1.bf16.msra.mxu0 %v5531_v40  ;;  %v347_v40 = vld [vmem:[#allocation6 + $0x718] sm:$0xff] }
 0x1cb   :  { %3758 = vmatprep.subr.bf16.mxu0 %v5524_v42  ;;  %v5611_v42 = vcombine.low %v227_v29, %v231_v54  ;;  %v215_v50 = vld [vmem:[#allocation6 + $0x2f8] sm:$0xff] }
 0x1cc   :  { %3800 = vmatpush1.bf16.msra.mxu1 %v5659_v41  ;;  %v351_v41 = vld [vmem:[#allocation6 + $0x738] sm:$0xff]  ;;  %v5596_v23 = vcombine.high %v211_v49, %v215_v50 }
 0x1cd   :  { %3801 = vmatprep.subr.bf16.mxu1 %v5652_v43  ;;  %v5739_v43 = vcombine.low %v355_v63, %v359_v55  ;;  %v5732_v46 = vcombine.high %v347_v40, %v351_v41  ;;  %v203_v27 = vld [vmem:[#allocation6 + $0x298] sm:$0xff] }
 0x1ce   :  { %3759 = vmatpush1.bf16.msra.mxu0 %v5523_v56  ;;  %v339_v56 = vld [vmem:[#allocation6 + $0x6d8] sm:$0xff] }
 0x1cf   :  { %3760 = vmatprep.subr.bf16.mxu0 %v5516_v52  ;;  %v5603_v52 = vcombine.low %v219_v38, %v223_v39  ;;  %v207_v28 = vld [vmem:[#allocation6 + $0x2b8] sm:$0xff] }
 0x1d0   :  { %3802 = vmatpush1.bf16.msra.mxu1 %v5651_v51  ;;  %v343_v51 = vld [vmem:[#allocation6 + $0x6f8] sm:$0xff]  ;;  %v5588_v3 = vcombine.high %v203_v27, %v207_v28 }
 0x1d1   :  { %3803 = vmatprep.subr.bf16.mxu1 %v5644_v53  ;;  %v5731_v53 = vcombine.low %v347_v40, %v351_v41  ;;  %v5724_v24 = vcombine.high %v339_v56, %v343_v51  ;;  %v195_v6 = vld [vmem:[#allocation6 + $0x258] sm:$0xff] }
 0x1d2   :  { %3761 = vmatpush1.bf16.msra.mxu0 %v5515_v57  ;;  %v331_v57 = vld [vmem:[#allocation6 + $0x698] sm:$0xff] }
 0x1d3   :  { %3762 = vmatprep.subr.bf16.mxu0 %v5508_v62  ;;  %v5595_v62 = vcombine.low %v211_v49, %v215_v50  ;;  %v199_v7 = vld [vmem:[#allocation6 + $0x278] sm:$0xff] }
 0x1d4   :  { %3804 = vmatpush1.bf16.msra.mxu1 %v5643_v61  ;;  %v335_v61 = vld [vmem:[#allocation6 + $0x6b8] sm:$0xff]  ;;  %v5580_v13 = vcombine.high %v195_v6, %v199_v7 }
 0x1d5   :  { %3805 = vmatprep.subr.bf16.mxu1 %v5636_v2  ;;  %v5723_v2 = vcombine.low %v339_v56, %v343_v51  ;;  %v5716_v5 = vcombine.high %v331_v57, %v335_v61  ;;  %v187_v18 = vld [vmem:[#allocation6 + $0x218] sm:$0xff] }
 0x1d6   :  { %3763 = vmatpush1.bf16.msra.mxu0 %v5507_v8  ;;  %v323_v8 = vld [vmem:[#allocation6 + $0x658] sm:$0xff] }
 0x1d7   :  { %3764 = vmatprep.subr.bf16.mxu0 %v5628_v10  ;;  %v5587_v10 = vcombine.low %v203_v27, %v207_v28  ;;  %v191_v60 = vld [vmem:[#allocation6 + $0x238] sm:$0xff] }
 0x1d8   :  { %3806 = vmatpush1.bf16.msra.mxu1 %v5635_v9  ;;  %v327_v9 = vld [vmem:[#allocation6 + $0x678] sm:$0xff]  ;;  %v5572_v29 = vcombine.high %v187_v18, %v191_v60 }
 0x1d9   :  { %3807 = vmatprep.subr.bf16.mxu1 %v5756_v12  ;;  %v5715_v12 = vcombine.low %v331_v57, %v335_v61  ;;  %v5708_v17 = vcombine.high %v323_v8, %v327_v9  ;;  %v435_v63 = vld [vmem:[#allocation6 + $0x9d8] sm:$0xff] }
 0x1da   :  { %3765 = vmatpush2.bf16.msra.mxu0 %v5627_v19  ;;  %v315_v19 = vld [vmem:[#allocation6 + $0x618] sm:$0xff] }
 0x1db   :  { %3766 = vmatprep.subr.bf16.mxu0 %v5620_v22  ;;  %v5579_v22 = vcombine.low %v195_v6, %v199_v7  ;;  %v439_v55 = vld [vmem:[#allocation6 + $0x9f8] sm:$0xff] }
 0x1dc   :  { %3808 = vmatpush2.bf16.msra.mxu1 %v5755_v20  ;;  %v319_v20 = vld [vmem:[#allocation6 + $0x638] sm:$0xff]  ;;  %v5820_v38 = vcombine.high %v435_v63, %v439_v55 }
 0x1dd   :  { %3809 = vmatprep.subr.bf16.mxu1 %v5748_v58  ;;  %v5707_v58 = vcombine.low %v323_v8, %v327_v9  ;;  %v5700_v54 = vcombine.high %v315_v19, %v319_v20  ;;  %v427_v40 = vld [vmem:[#allocation6 + $0x998] sm:$0xff] }
 0x1de   :  { %3767 = vmatpush2.bf16.msra.mxu0 %v5619_v30  ;;  %v563_v30 = vld [vmem:[#allocation6 + $0xdd8] sm:$0xff] }
 0x1df   :  { %3768 = vmatprep.subr.bf16.mxu0 %v5612_v35  ;;  %v5571_v35 = vcombine.low %v187_v18, %v191_v60  ;;  %v431_v41 = vld [vmem:[#allocation6 + $0x9b8] sm:$0xff] }
 0x1e0   :  { %3810 = vmatpush2.bf16.msra.mxu1 %v5747_v59  ;;  %v567_v59 = vld [vmem:[#allocation6 + $0xdf8] sm:$0xff]  ;;  %v5812_v49 = vcombine.high %v427_v40, %v431_v41  ;;  %v5811_v27 = vcombine.low %v427_v40, %v431_v41 }
 0x1e1   :  { %3811 = vmatprep.subr.bf16.mxu1 %v5740_v36  ;;  %v5699_v36 = vcombine.low %v315_v19, %v319_v20  ;;  %v5948_v39 = vcombine.high %v563_v30, %v567_v59  ;;  %v419_v56 = vld [vmem:[#allocation6 + $0x958] sm:$0xff] }
 0x1e2   :  { %3769 = vmatpush2.bf16.msra.mxu0 %v5611_v42  ;;  %v555_v42 = vld [vmem:[#allocation6 + $0xd98] sm:$0xff] }
 0x1e3   :  { %3770 = vmatprep.subr.bf16.mxu0 %v5604_v45  ;;  %v5819_v45 = vcombine.low %v435_v63, %v439_v55  ;;  %v423_v51 = vld [vmem:[#allocation6 + $0x978] sm:$0xff] }
 0x1e4   :  { %3812 = vmatpush2.bf16.msra.mxu1 %v5739_v43  ;;  %v559_v43 = vld [vmem:[#allocation6 + $0xdb8] sm:$0xff]  ;;  %v5804_v61 = vcombine.high %v419_v56, %v423_v51 }
 0x1e5   :  { %3813 = vmatprep.subr.bf16.mxu1 %v5732_v46  ;;  %v5947_v46 = vcombine.low %v563_v30, %v567_v59  ;;  %v5940_v50 = vcombine.high %v555_v42, %v559_v43  ;;  %v5939_v57 = vcombine.low %v555_v42, %v559_v43  ;;  %v543_v6 = vld [vmem:[#allocation6 + $0xd38] sm:$0xff] }
 0x1e6   :  { %3771 = vmatpush2.bf16.msra.mxu0 %v5603_v52  ;;  %v403_v9 = vld [vmem:[#allocation6 + $0x8d8] sm:$0xff] }
 0x1e7   :  { %3772 = vmatprep.subr.bf16.mxu0 %v5596_v23  ;;  %v551_v23 = vld [vmem:[#allocation6 + $0xd78] sm:$0xff] }
 0x1e8   :  { %3814 = vmatpush2.bf16.msra.mxu1 %v5731_v53  ;;  %v547_v53 = vld [vmem:[#allocation6 + $0xd58] sm:$0xff] }
 0x1e9   :  { %3815 = vmatprep.subr.bf16.mxu1 %v5724_v24  ;;  %v395_v60 = vld [vmem:[#allocation6 + $0x898] sm:$0xff] }
 0x1ea   :  { %3773 = vmatpush2.bf16.msra.mxu0 %v5595_v62  ;;  %v399_v19 = vld [vmem:[#allocation6 + $0x8b8] sm:$0xff] }
 0x1eb   :  { %3774 = vmatprep.subr.bf16.mxu0 %v5588_v3  ;;  %v411_v3 = vld [vmem:[#allocation6 + $0x918] sm:$0xff] }
 0x1ec   :  { %3816 = vmatpush2.bf16.msra.mxu1 %v5723_v2  ;;  %v5932_v2 = vcombine.high %v547_v53, %v551_v23  ;;  %v523_v20 = vld [vmem:[#allocation6 + $0xc98] sm:$0xff] }
 0x1ed   :  { %3817 = vmatprep.subr.bf16.mxu1 %v5716_v5  ;;  %v415_v5 = vld [vmem:[#allocation6 + $0x938] sm:$0xff] }
 0x1ee   :  { %3775 = vmatpush2.bf16.msra.mxu0 %v5587_v10  ;;  %v5796_v7 = vcombine.high %v411_v3, %v415_v5  ;;  %v407_v10 = vld [vmem:[#allocation6 + $0x8f8] sm:$0xff] }
 0x1ef   :  { %3776 = vmatprep.subr.bf16.mxu0 %v5580_v13  ;;  %v535_v13 = vld [vmem:[#allocation6 + $0xcf8] sm:$0xff]  ;;  %v5788_v18 = vcombine.high %v403_v9, %v407_v10 }
 0x1f0   :  { %3818 = vmatpush2.bf16.msra.mxu1 %v5715_v12  ;;  %v531_v12 = vld [vmem:[#allocation6 + $0xcd8] sm:$0xff] }
 0x1f1   :  { %3819 = vmatprep.subr.bf16.mxu1 %v5708_v17  ;;  %v5795_v17 = vcombine.low %v411_v3, %v415_v5  ;;  %v387_v55 = vld [vmem:[#allocation6 + $0x858] sm:$0xff] }
 0x1f2   :  { %3777 = vmatpush2.bf16.msra.mxu0 %v5579_v22  ;;  %v527_v22 = vld [vmem:[#allocation6 + $0xcb8] sm:$0xff] }
 0x1f3   :  { %3778 = vmatprep.subr.bf16.mxu0 %v5572_v29  ;;  %v5915_v29 = vcombine.low %v531_v12, %v535_v13  ;;  %v5908_v63 = vcombine.high %v523_v20, %v527_v22  ;;  %v391_v30 = vld [vmem:[#allocation6 + $0x878] sm:$0xff] }
 0x1f4   :  { %3820 = vmatpush2.bf16.msra.mxu1 %v5707_v58  ;;  %v5787_v58 = vcombine.low %v403_v9, %v407_v10  ;;  %v515_v59 = vld [vmem:[#allocation6 + $0xc58] sm:$0xff] }
 0x1f5   :  { %3821 = vmatprep.subr.bf16.mxu1 %v5700_v54  ;;  %v5780_v54 = vcombine.high %v395_v60, %v399_v19  ;;  %v379_v41 = vld [vmem:[#allocation6 + $0x818] sm:$0xff] }
 0x1f6   :  { %3779 = vmatpush2.bf16.msra.mxu0 %v5571_v35  ;;  %v519_v35 = vld [vmem:[#allocation6 + $0xc78] sm:$0xff] }
 0x1f7   :  { %3834 = vmatprep.subr.bf16.mxu0 %v5820_v38  ;;  %v5907_v38 = vcombine.low %v523_v20, %v527_v22  ;;  %v5900_v40 = vcombine.high %v515_v59, %v519_v35  ;;  %v383_v42 = vld [vmem:[#allocation6 + $0x838] sm:$0xff] }
 0x1f8   :  { %3822 = vmatpush2.bf16.msra.mxu1 %v5699_v36  ;;  %v5779_v36 = vcombine.low %v395_v60, %v399_v19  ;;  %v507_v43 = vld [vmem:[#allocation6 + $0xc18] sm:$0xff] }
 0x1f9   :  { %3877 = vmatprep.subr.bf16.mxu1 %v5948_v39  ;;  %v3524_v52 = vpop.f32.mrf.mxu0  ;;  %3781 = vmatmul.mubr.bf16.vlgmr.msra.gmra.mxu0 %v6333_v21  ;;  %v539_v21 = vld [vmem:[#allocation6 + $0xd18] sm:$0xff]  ;;  %v5772_v39 = vcombine.high %v387_v55, %v391_v30 }
 0x1fa   :  { %v3525_v24 = vadd.f32 %v3524_v52, %v6408_v0  ;;  %3835 = vmatpush1.bf16.msra.mxu0 %v5819_v45  ;;  %3866 = vmatprep.mubr.bf16.mxu0 %v6349_v32  ;;  %v5931_v0 = vcombine.low %v547_v53, %v551_v23  ;;  %v5924_v8 = vcombine.high %v539_v21, %v543_v6  ;;  %v511_v45 = vld [vmem:[#allocation6 + $0xc38] sm:$0xff] }
 0x1fb   :  { %3824 = vmatmul.mubr.bf16.vlgmr.msra.gmra.mxu1 %v6341_v25  ;;  %v3567_v28 = vpop.f32.mrf.mxu1  ;;  %3836 = vmatprep.subr.bf16.mxu0 %v5812_v49  ;;  %v5803_v25 = vcombine.low %v419_v56, %v423_v51  ;;  %v5923_v32 = vcombine.low %v539_v21, %v543_v6  ;;  %v5899_v49 = vcombine.low %v515_v59, %v519_v35  ;;  %v499_v51 = vld [vmem:[#allocation6 + $0xbd8] sm:$0xff] }
 0x1fc   :  { %3878 = vmatpush1.bf16.msra.mxu1 %v5947_v46  ;;  %v6423_v62 = vadd.f32 %v3567_v28, %v3525_v24  ;;  %3909 = vmatprep.mubr.bf16.mxu1 %v6354_v33  ;;  %v5916_v33 = vcombine.high %v531_v12, %v535_v13  ;;  %v5771_v46 = vcombine.low %v387_v55, %v391_v30  ;;  %v503_v52 = vld [vmem:[#allocation6 + $0xbf8] sm:$0xff] }
 0x1fd   :  { %3879 = vmatprep.subr.bf16.mxu1 %v5940_v50  ;;  %v5764_v50 = vcombine.high %v379_v41, %v383_v42  ;;  %v5892_v56 = vcombine.high %v507_v43, %v511_v45  ;;  %v627_v53 = vld [vmem:[#allocation6 + $0xfd8] sm:$0xff]  ;;  %v5763_v24 = vcombine.low %v379_v41, %v383_v42  ;;  %v5884_v28 = vcombine.high %v499_v51, %v503_v52 }
 0x1fe   :  { %3837 = vmatpush1.bf16.msra.mxu0 %v5811_v27  ;;  %v631_v23 = vld [vmem:[#allocation6 + $0xff8] sm:$0xff]  ;;  %v5891_v27 = vcombine.low %v507_v43, %v511_v45  ;;  %v5883_v21 = vcombine.low %v499_v51, %v503_v52  ;;  %vm3973_vm3 = vcmp.ge.f32.partialorder %v6423_v62, 0.0 }
 0x1ff   :  { %3838 = vmatprep.subr.bf16.mxu0 %v5804_v61  ;;  %v491_v61 = vld [vmem:[#allocation6 + $0xb98] sm:$0xff]  ;;  %v6011_v6 = vcombine.low %v627_v53, %v631_v23 }
 0x200   :  { %3880 = vmatpush1.bf16.msra.mxu1 %v5939_v57  ;;  %v6012_v57 = vcombine.high %v627_v53, %v631_v23  ;;  %v619_v3 = vld [vmem:[#allocation6 + $0xf98] sm:$0xff] }
 0x201   :  { %3881 = vmatprep.subr.bf16.mxu1 %v5932_v2  ;;  %v495_v2 = vld [vmem:[#allocation6 + $0xbb8] sm:$0xff] }
 0x202   :  { %3839 = vmatpush1.bf16.msra.mxu0 %v5803_v25  ;;  %v623_v5 = vld [vmem:[#allocation6 + $0xfb8] sm:$0xff]  ;;  %v5876_v25 = vcombine.high %v491_v61, %v495_v2  ;;  %v5875_v12 = vcombine.low %v491_v61, %v495_v2 }
 0x203   :  { %3840 = vmatprep.subr.bf16.mxu0 %v5796_v7  ;;  %v483_v7 = vld [vmem:[#allocation6 + $0xb58] sm:$0xff]  ;;  %v6003_v13 = vcombine.low %v619_v3, %v623_v5 }
 0x204   :  { %3882 = vmatpush1.bf16.msra.mxu1 %v5931_v0  ;;  %v6004_v0 = vcombine.high %v619_v3, %v623_v5  ;;  %v611_v9 = vld [vmem:[#allocation6 + $0xf58] sm:$0xff]  ;;  %v3484_v3 = vadd.f32 %v6412_v4, %v6410_v1  ;;  %v4208_v4 = vld [vmem:[#allocation8 + $0x5e8] sm:$0xff] }
 0x205   :  { %3883 = vmatprep.subr.bf16.mxu1 %v5924_v8  ;;  %v487_v8 = vld [vmem:[#allocation6 + $0xb78] sm:$0xff] }
 0x206   :  { %3841 = vmatpush1.bf16.msra.mxu0 %v5795_v17  ;;  %v615_v10 = vld [vmem:[#allocation6 + $0xf78] sm:$0xff]  ;;  %v5868_v17 = vcombine.high %v483_v7, %v487_v8  ;;  %v5867_v20 = vcombine.low %v483_v7, %v487_v8 }
 0x207   :  { %3842 = vmatprep.subr.bf16.mxu0 %v5788_v18  ;;  %v475_v18 = vld [vmem:[#allocation6 + $0xb18] sm:$0xff]  ;;  %v5995_v22 = vcombine.low %v611_v9, %v615_v10 }
 0x208   :  { %3884 = vmatpush1.bf16.msra.mxu1 %v5923_v32  ;;  %v5996_v32 = vcombine.high %v611_v9, %v615_v10  ;;  %v603_v60 = vld [vmem:[#allocation6 + $0xf18] sm:$0xff]  ;;  %v3569_v9 = vpop.f32.mrf.mxu1 }
 0x209   :  { %3885 = vmatprep.subr.bf16.mxu1 %v5916_v33  ;;  %v479_v33 = vld [vmem:[#allocation6 + $0xb38] sm:$0xff] }
 0x20a   :  { %3843 = vmatpush1.bf16.msra.mxu0 %v5787_v58  ;;  %v607_v19 = vld [vmem:[#allocation6 + $0xf38] sm:$0xff]  ;;  %v5860_v58 = vcombine.high %v475_v18, %v479_v33  ;;  %v5859_v59 = vcombine.low %v475_v18, %v479_v33  ;;  %v4207_v18 = vld [vmem:[#allocation8 + $0x5e0] sm:$0xff] }
 0x20b   :  { %3844 = vmatprep.subr.bf16.mxu0 %v5780_v54  ;;  %v467_v54 = vld [vmem:[#allocation6 + $0xad8] sm:$0xff]  ;;  %v5987_v35 = vcombine.low %v603_v60, %v607_v19 }
 0x20c   :  { %3886 = vmatpush1.bf16.msra.mxu1 %v5915_v29  ;;  %v5988_v29 = vcombine.high %v603_v60, %v607_v19  ;;  %v595_v55 = vld [vmem:[#allocation6 + $0xed8] sm:$0xff]  ;;  %v4204_v60 = vld [vmem:[#allocation8 + $0x5c8] sm:$0xff]  ;;  %v4075_v19 = vld [vmem:[#allocation8 + $0x1c0] sm:$0xff] }
 0x20d   :  { %3887 = vmatprep.subr.bf16.mxu1 %v5908_v63  ;;  %v471_v63 = vld [vmem:[#allocation6 + $0xaf8] sm:$0xff] }
 0x20e   :  { %3845 = vmatpush1.bf16.msra.mxu0 %v5779_v36  ;;  %v599_v30 = vld [vmem:[#allocation6 + $0xef8] sm:$0xff]  ;;  %v5852_v36 = vcombine.high %v467_v54, %v471_v63  ;;  %v5851_v43 = vcombine.low %v467_v54, %v471_v63  ;;  %v4068_v54 = vld [vmem:[#allocation8 + $0x188] sm:$0xff] }
 0x20f   :  { %3846 = vmatprep.subr.bf16.mxu0 %v5772_v39  ;;  %v459_v39 = vld [vmem:[#allocation6 + $0xa98] sm:$0xff]  ;;  %v5979_v45 = vcombine.low %v595_v55, %v599_v30  ;;  %v4196_v63 = vld [vmem:[#allocation8 + $0x588] sm:$0xff] }
 0x210   :  { %3888 = vmatpush1.bf16.msra.mxu1 %v5907_v38  ;;  %v5980_v38 = vcombine.high %v595_v55, %v599_v30  ;;  %v587_v41 = vld [vmem:[#allocation6 + $0xe98] sm:$0xff]  ;;  %v4067_v55 = vld [vmem:[#allocation8 + $0x180] sm:$0xff] }
 0x211   :  { %3889 = vmatprep.subr.bf16.mxu1 %v5900_v40  ;;  %v463_v40 = vld [vmem:[#allocation6 + $0xab8] sm:$0xff]  ;;  %v4195_v30 = vld [vmem:[#allocation8 + $0x580] sm:$0xff] }
 0x212   :  { %3847 = vmatpush1.bf16.msra.mxu0 %v5771_v46  ;;  %v591_v42 = vld [vmem:[#allocation6 + $0xeb8] sm:$0xff]  ;;  %v5844_v46 = vcombine.high %v459_v39, %v463_v40  ;;  %v5843_v53 = vcombine.low %v459_v39, %v463_v40  ;;  %v4060_v39 = vld [vmem:[#allocation8 + $0x148] sm:$0xff] }
 0x213   :  { %3848 = vmatprep.subr.bf16.mxu0 %v5764_v50  ;;  %v451_v50 = vld [vmem:[#allocation6 + $0xa58] sm:$0xff]  ;;  %v5971_v23 = vcombine.low %v587_v41, %v591_v42  ;;  %v4188_v40 = vld [vmem:[#allocation8 + $0x548] sm:$0xff] }
 0x214   :  { %3890 = vmatpush1.bf16.msra.mxu1 %v5899_v49  ;;  %v5972_v49 = vcombine.high %v587_v41, %v591_v42  ;;  %v579_v51 = vld [vmem:[#allocation6 + $0xe58] sm:$0xff]  ;;  %v4059_v41 = vld [vmem:[#allocation8 + $0x140] sm:$0xff] }
 0x215   :  { %3891 = vmatprep.subr.bf16.mxu1 %v5892_v56  ;;  %v455_v56 = vld [vmem:[#allocation6 + $0xa78] sm:$0xff]  ;;  %v4187_v42 = vld [vmem:[#allocation8 + $0x540] sm:$0xff] }
 0x216   :  { %3849 = vmatpush1.bf16.msra.mxu0 %v5763_v24  ;;  %v583_v52 = vld [vmem:[#allocation6 + $0xe78] sm:$0xff]  ;;  %v5836_v24 = vcombine.high %v451_v50, %v455_v56 }
 0x217   :  { %3850 = vmatprep.subr.bf16.mxu0 %v5884_v28  ;;  %v3526_v28 = vpop.f32.mrf.mxu0  ;;  %v443_v61 = vld [vmem:[#allocation6 + $0xa18] sm:$0xff]  ;;  %v5963_v7 = vcombine.low %v579_v51, %v583_v52 }
 0x218   :  { %3892 = vmatpush1.bf16.msra.mxu1 %v5891_v27  ;;  %v3312_v27 = vadd.f32 %v6381_v37, %v6379_v34  ;;  %v447_v2 = vld [vmem:[#allocation6 + $0xa38] sm:$0xff] }
 0x219   :  { %3893 = vmatprep.subr.bf16.mxu1 %v6012_v57  ;;  %v5964_v57 = vcombine.high %v579_v51, %v583_v52  ;;  %v571_v5 = vld [vmem:[#allocation6 + $0xe18] sm:$0xff]  ;;  %v5828_v8 = vcombine.high %v443_v61, %v447_v2  ;;  %v5827_v10 = vcombine.low %v443_v61, %v447_v2  ;;  %v4051_v51 = vld [vmem:[#allocation8 + $0x100] sm:$0xff] }
 0x21a   :  { %3851 = vmatpush2.bf16.msra.mxu0 %v5883_v21  ;;  %v575_v21 = vld [vmem:[#allocation6 + $0xe38] sm:$0xff]  ;;  %v4179_v52 = vld [vmem:[#allocation8 + $0x500] sm:$0xff] }
 0x21b   :  { %3852 = vmatprep.subr.bf16.mxu0 %v5876_v25  ;;  %v5835_v25 = vcombine.low %v451_v50, %v455_v56  ;;  %v5956_v34 = vcombine.high %v571_v5, %v575_v21  ;;  %v5955_v1 = vcombine.low %v571_v5, %v575_v21  ;;  %v4052_v50 = vld [vmem:[#allocation8 + $0x108] sm:$0xff]  ;;  %v4043_v61 = vld [vmem:[#allocation8 + $0xc0] sm:$0xff] }
 0x21c   :  { %3894 = vmatpush2.bf16.msra.mxu1 %v6011_v6  ;;  %v3355_v6 = vadd.f32 %v6392_v11, %v3312_v27  ;;  %v4080_v11 = vld [vmem:[#allocation8 + $0x1e8] sm:$0xff]  ;;  %v4175_v27 = vld [vmem:[#allocation8 + $0x4e0] sm:$0xff] }
 0x21d   :  { %3895 = vmatprep.subr.bf16.mxu1 %v6004_v0  ;;  %v3527_v0 = vadd.f32 %v3526_v28, %v3484_v3  ;;  %v4180_v56 = vld [vmem:[#allocation8 + $0x508] sm:$0xff]  ;;  %v4171_v2 = vld [vmem:[#allocation8 + $0x4c0] sm:$0xff] }
 0x21e   :  { %3853 = vmatpush2.bf16.msra.mxu0 %v5875_v12  ;;  %v3398_v37 = vadd.f32 %v6396_v15, %v3355_v6  ;;  %v4076_v15 = vld [vmem:[#allocation8 + $0x1c8] sm:$0xff]  ;;  %v4039_v21 = vld [vmem:[#allocation8 + $0xa0] sm:$0xff] }
 0x21f   :  { %3854 = vmatprep.subr.bf16.mxu0 %v5868_v17  ;;  %v3570_v12 = vadd.f32 %v3569_v9, %v3527_v0  ;;  %v4044_v28 = vld [vmem:[#allocation8 + $0xc8] sm:$0xff]  ;;  %v4167_v6 = vld [vmem:[#allocation8 + $0x4a0] sm:$0xff] }
 0x220   :  { %3896 = vmatpush2.bf16.msra.mxu1 %v6003_v13  ;;  %v3988_v13 = vmul.f32 0.1, %v3398_v37  ;;  %vm3972_vm0 = vcmp.ge.f32.partialorder %v3398_v37, 0.0  ;;  %v4040_v3 = vld [vmem:[#allocation8 + $0xa8] sm:$0xff]  ;;  %v4031_v9 = vld [vmem:[#allocation8 + $0x60] sm:$0xff] }
 0x221   :  { %3897 = vmatprep.subr.bf16.mxu1 %v5996_v32  ;;  %v3990_v17 = vmul.f32 0.1, %v3570_v12  ;;  %v4079_v32 = vld [vmem:[#allocation8 + $0x1e0] sm:$0xff]  ;;  %vm3974_vm1 = vcmp.ge.f32.partialorder %v3570_v12, 0.0  ;;  %v4168_v5 = vld [vmem:[#allocation8 + $0x4a8] sm:$0xff] }
 0x222   :  { %3855 = vmatpush2.bf16.msra.mxu0 %v5867_v20  ;;  %v6435_v33 = vsel %vm3972_vm0, %v3398_v37, %v3988_v13  ;;  %v4164_v0 = vld [vmem:[#allocation8 + $0x488] sm:$0xff] }
 0x223   :  { %3856 = vmatprep.subr.bf16.mxu0 %v5860_v58  ;;  %v6438_v20 = vsel %vm3974_vm1, %v3570_v12, %v3990_v17  ;;  %v4072_v58 = vld [vmem:[#allocation8 + $0x1a8] sm:$0xff] }
 0x224   :  { %3898 = vmatpush2.bf16.msra.mxu1 %v5995_v22  ;;  %v4203_v22 = vld [vmem:[#allocation8 + $0x5c0] sm:$0xff]  ;;  %v4160_v37 = vld [vmem:[#allocation8 + $0x468] sm:$0xff] }
 0x225   :  { %3899 = vmatprep.subr.bf16.mxu1 %v5988_v29  ;;  %v4200_v29 = vld [vmem:[#allocation8 + $0x5a8] sm:$0xff] }
 0x226   :  { %3857 = vmatpush2.bf16.msra.mxu0 %v5859_v59  ;;  %v4064_v59 = vld [vmem:[#allocation8 + $0x168] sm:$0xff] }
 0x227   :  { %3858 = vmatprep.subr.bf16.mxu0 %v5852_v36  ;;  %v4063_v36 = vld [vmem:[#allocation8 + $0x160] sm:$0xff]  ;;  %v4028_v12 = vld [vmem:[#allocation8 + $0x48] sm:$0xff] }
 0x228   :  { %3900 = vmatpush2.bf16.msra.mxu1 %v5987_v35  ;;  %v4192_v35 = vld [vmem:[#allocation8 + $0x568] sm:$0xff] }
 0x229   :  { %3901 = vmatprep.subr.bf16.mxu1 %v5980_v38  ;;  %v4191_v38 = vld [vmem:[#allocation8 + $0x560] sm:$0xff]  ;;  %v4024_v13 = vld [vmem:[#allocation8 + $0x28] sm:$0xff] }
 0x22a   :  { %3859 = vmatpush2.bf16.msra.mxu0 %v5851_v43  ;;  %v4056_v43 = vld [vmem:[#allocation8 + $0x128] sm:$0xff] }
 0x22b   :  { %3860 = vmatprep.subr.bf16.mxu0 %v5844_v46  ;;  %v4055_v46 = vld [vmem:[#allocation8 + $0x120] sm:$0xff]  ;;  %v4152_v17 = vld [vmem:[#allocation8 + $0x428] sm:$0xff] }
 0x22c   :  { %3902 = vmatpush2.bf16.msra.mxu1 %v5979_v45  ;;  %v4184_v45 = vld [vmem:[#allocation8 + $0x528] sm:$0xff] }
 0x22d   :  { %3903 = vmatprep.subr.bf16.mxu1 %v5972_v49  ;;  %v4183_v49 = vld [vmem:[#allocation8 + $0x520] sm:$0xff] }
 0x22e   :  { %3861 = vmatpush2.bf16.msra.mxu0 %v5843_v53  ;;  %v4048_v53 = vld [vmem:[#allocation8 + $0xe8] sm:$0xff] }
 0x22f   :  { %3862 = vmatprep.subr.bf16.mxu0 %v5836_v24  ;;  %v4047_v24 = vld [vmem:[#allocation8 + $0xe0] sm:$0xff] }
 0x230   :  { %3904 = vmatpush2.bf16.msra.mxu1 %v5971_v23  ;;  %v4176_v23 = vld [vmem:[#allocation8 + $0x4e8] sm:$0xff] }
 0x231   :  { %3905 = vmatprep.subr.bf16.mxu1 %v5964_v57  ;;  %v4172_v57 = vld [vmem:[#allocation8 + $0x4c8] sm:$0xff] }
 0x232   :  { %3863 = vmatpush2.bf16.msra.mxu0 %v5835_v25  ;;  %v4036_v25 = vld [vmem:[#allocation8 + $0x88] sm:$0xff] }
 0x233   :  { %3864 = vmatprep.subr.bf16.mxu0 %v5828_v8  ;;  %v4163_v8 = vld [vmem:[#allocation8 + $0x480] sm:$0xff] }
 0x234   :  { %3906 = vmatpush2.bf16.msra.mxu1 %v5963_v7  ;;  %v4035_v7 = vld [vmem:[#allocation8 + $0x80] sm:$0xff] }
 0x235   :  { %3907 = vmatprep.subr.bf16.mxu1 %v5956_v34  ;;  %v4032_v34 = vld [vmem:[#allocation8 + $0x68] sm:$0xff] }
 0x236   :  { %3865 = vmatpush2.bf16.msra.mxu0 %v5827_v10  ;;  %v4159_v10 = vld [vmem:[#allocation8 + $0x460] sm:$0xff] }
 0x237   :  { %4531 = vmatprep.subr.mxu0 %v4080_v11  ;;  %v4027_v11 = vld [vmem:[#allocation8 + $0x40] sm:$0xff] }
 0x238   :  { %3908 = vmatpush2.bf16.msra.mxu1 %v5955_v1  ;;  %v4156_v1 = vld [vmem:[#allocation8 + $0x448] sm:$0xff] }
 0x239   :  { %4608 = vmatprep.subr.mxu1 %v4208_v4  ;;  %3867 = vmatmul.mubr.bf16.vlgmr.msra.gmra.mxu0 %v6361_v44  ;;  %v4071_v44 = vld [vmem:[#allocation8 + $0x1a0] sm:$0xff] }
 0x23a   :  { %4532 = vmatpush1.msra.mxu0 %v4079_v32  ;;  %4595 = vmatprep.mubr.f32.mxu0 %v6435_v33  ;;  %v4155_v4 = vld [vmem:[#allocation8 + $0x440] sm:$0xff] }
 0x23b   :  { %3910 = vmatmul.mubr.bf16.vlgmr.msra.gmra.mxu1 %v6365_v47  ;;  %4533 = vmatprep.subr.mxu0 %v4076_v15  ;;  %v4199_v47 = vld [vmem:[#allocation8 + $0x5a0] sm:$0xff]  ;;  %v4020_v15 = vld [vmem:[#allocation8 + $0x8] sm:$0xff] }
 0x23c   :  { %4609 = vmatpush1.msra.mxu1 %v4207_v18  ;;  %4672 = vmatprep.mubr.f32.mxu1 %v6438_v20  ;;  %v4023_v32 = vld [vmem:[#allocation8 + $0x20] sm:$0xff] }
 0x23d   :  { %4610 = vmatprep.subr.mxu1 %v4204_v60  ;;  %4534 = vmatpush1.msra.mxu0 %v4075_v19  ;;  %v4151_v18 = vld [vmem:[#allocation8 + $0x420] sm:$0xff]  ;;  %v4148_v60 = vld [vmem:[#allocation8 + $0x408] sm:$0xff] }
 0x23e   :  { %4611 = vmatpush1.msra.mxu1 %v4203_v22  ;;  %4535 = vmatprep.subr.mxu0 %v4072_v58  ;;  %v4019_v19 = vld [vmem:[#allocation8] sm:$0xff]  ;;  %v4144_v58 = vld [vmem:[#allocation8 + $0x3e8] sm:$0xff] }
 0x23f   :  { %4612 = vmatprep.subr.mxu1 %v4200_v29  ;;  %4536 = vmatpush1.msra.mxu0 %v4071_v44  ;;  %v4147_v22 = vld [vmem:[#allocation8 + $0x400] sm:$0xff]  ;;  %v4272_v29 = vld [vmem:[#allocation8 + $0x7e8] sm:$0xff] }
 0x240   :  { %4613 = vmatpush1.msra.mxu1 %v4199_v47  ;;  %4537 = vmatprep.subr.mxu0 %v4068_v54  ;;  %v4143_v44 = vld [vmem:[#allocation8 + $0x3e0] sm:$0xff]  ;;  %v4140_v54 = vld [vmem:[#allocation8 + $0x3c8] sm:$0xff] }
 0x241   :  { %4614 = vmatprep.subr.mxu1 %v4196_v63  ;;  %4538 = vmatpush1.msra.mxu0 %v4067_v55  ;;  %v4271_v47 = vld [vmem:[#allocation8 + $0x7e0] sm:$0xff]  ;;  %v4268_v63 = vld [vmem:[#allocation8 + $0x7c8] sm:$0xff] }
 0x242   :  { %4615 = vmatpush1.msra.mxu1 %v4195_v30  ;;  %4539 = vmatprep.subr.mxu0 %v4064_v59  ;;  %v4139_v55 = vld [vmem:[#allocation8 + $0x3c0] sm:$0xff]  ;;  %v4136_v59 = vld [vmem:[#allocation8 + $0x3a8] sm:$0xff] }
 0x243   :  { %4616 = vmatprep.subr.mxu1 %v4192_v35  ;;  %4540 = vmatpush1.msra.mxu0 %v4063_v36  ;;  %v4267_v30 = vld [vmem:[#allocation8 + $0x7c0] sm:$0xff]  ;;  %v4264_v35 = vld [vmem:[#allocation8 + $0x7a8] sm:$0xff] }
 0x244   :  { %4617 = vmatpush1.msra.mxu1 %v4191_v38  ;;  %4541 = vmatprep.subr.mxu0 %v4060_v39  ;;  %v4135_v36 = vld [vmem:[#allocation8 + $0x3a0] sm:$0xff]  ;;  %v4132_v39 = vld [vmem:[#allocation8 + $0x388] sm:$0xff] }
 0x245   :  { %4618 = vmatprep.subr.mxu1 %v4188_v40  ;;  %4542 = vmatpush1.msra.mxu0 %v4059_v41  ;;  %v4263_v38 = vld [vmem:[#allocation8 + $0x7a0] sm:$0xff]  ;;  %v4260_v40 = vld [vmem:[#allocation8 + $0x788] sm:$0xff] }
 0x246   :  { %4619 = vmatpush1.msra.mxu1 %v4187_v42  ;;  %4543 = vmatprep.subr.mxu0 %v4056_v43  ;;  %v4131_v41 = vld [vmem:[#allocation8 + $0x380] sm:$0xff]  ;;  %v4128_v43 = vld [vmem:[#allocation8 + $0x368] sm:$0xff] }
 0x247   :  { %4620 = vmatprep.subr.mxu1 %v4184_v45  ;;  %4544 = vmatpush1.msra.mxu0 %v4055_v46  ;;  %v4259_v42 = vld [vmem:[#allocation8 + $0x780] sm:$0xff]  ;;  %v4256_v45 = vld [vmem:[#allocation8 + $0x768] sm:$0xff] }
 0x248   :  { %4621 = vmatpush1.msra.mxu1 %v4183_v49  ;;  %4545 = vmatprep.subr.mxu0 %v4052_v50  ;;  %v4127_v46 = vld [vmem:[#allocation8 + $0x360] sm:$0xff]  ;;  %v4124_v50 = vld [vmem:[#allocation8 + $0x348] sm:$0xff] }
 0x249   :  { %4622 = vmatprep.subr.mxu1 %v4180_v56  ;;  %4546 = vmatpush1.msra.mxu0 %v4051_v51  ;;  %v4255_v49 = vld [vmem:[#allocation8 + $0x760] sm:$0xff]  ;;  %v4252_v56 = vld [vmem:[#allocation8 + $0x748] sm:$0xff] }
 0x24a   :  { %4623 = vmatpush1.msra.mxu1 %v4179_v52  ;;  %4547 = vmatprep.subr.mxu0 %v4048_v53  ;;  %v4123_v51 = vld [vmem:[#allocation8 + $0x340] sm:$0xff]  ;;  %v4120_v53 = vld [vmem:[#allocation8 + $0x328] sm:$0xff] }
 0x24b   :  { %4624 = vmatprep.subr.mxu1 %v4176_v23  ;;  %4548 = vmatpush1.msra.mxu0 %v4047_v24  ;;  %v4251_v52 = vld [vmem:[#allocation8 + $0x740] sm:$0xff]  ;;  %v4248_v23 = vld [vmem:[#allocation8 + $0x728] sm:$0xff] }
 0x24c   :  { %4625 = vmatpush1.msra.mxu1 %v4175_v27  ;;  %4549 = vmatprep.subr.mxu0 %v4044_v28  ;;  %v4119_v24 = vld [vmem:[#allocation8 + $0x320] sm:$0xff]  ;;  %v3528_v27 = vpop.f32.mrf.mxu0 }
 0x24d   :  { %4626 = vmatprep.subr.mxu1 %v4172_v57  ;;  %4550 = vmatpush1.msra.mxu0 %v4043_v61  ;;  %v4247_v28 = vld [vmem:[#allocation8 + $0x720] sm:$0xff]  ;;  %v4116_v57 = vld [vmem:[#allocation8 + $0x308] sm:$0xff]  ;;  %v6441_v61 = vpop.f32.mrf.mxu1 }
 0x24e   :  { %4627 = vmatpush1.msra.mxu1 %v4171_v2  ;;  %4551 = vmatprep.subr.mxu0 %v4040_v3  ;;  %v4244_v2 = vld [vmem:[#allocation8 + $0x708] sm:$0xff]  ;;  %v4115_v3 = vld [vmem:[#allocation8 + $0x300] sm:$0xff] }
 0x24f   :  { %4628 = vmatprep.subr.mxu1 %v4168_v5  ;;  %4552 = vmatpush1.msra.mxu0 %v4039_v21  ;;  %v4243_v5 = vld [vmem:[#allocation8 + $0x700] sm:$0xff]  ;;  %v4112_v21 = vld [vmem:[#allocation8 + $0x2e8] sm:$0xff] }
 0x250   :  { %4629 = vmatpush1.msra.mxu1 %v4167_v6  ;;  %4553 = vmatprep.subr.mxu0 %v4036_v25  ;;  %v4240_v6 = vld [vmem:[#allocation8 + $0x6e8] sm:$0xff]  ;;  %v4111_v25 = vld [vmem:[#allocation8 + $0x2e0] sm:$0xff] }
 0x251   :  { %4630 = vmatprep.subr.mxu1 %v4164_v0  ;;  %4554 = vmatpush1.msra.mxu0 %v4035_v7  ;;  %v3530_v0 = vpop.f32.mrf.mxu0  ;;  %v4239_v7 = vld [vmem:[#allocation8 + $0x6e0] sm:$0xff] }
 0x252   :  { %4631 = vmatpush1.msra.mxu1 %v4163_v8  ;;  %4555 = vmatprep.subr.mxu0 %v4032_v34  ;;  %v4108_v8 = vld [vmem:[#allocation8 + $0x2c8] sm:$0xff]  ;;  %v3573_v34 = vpop.f32.mrf.mxu1 }
 0x253   :  { %4632 = vmatprep.subr.mxu1 %v4160_v37  ;;  %4556 = vmatpush1.msra.mxu0 %v4031_v9  ;;  %v4236_v37 = vld [vmem:[#allocation8 + $0x6c8] sm:$0xff]  ;;  %v4107_v9 = vld [vmem:[#allocation8 + $0x2c0] sm:$0xff] }
 0x254   :  { %4633 = vmatpush1.msra.mxu1 %v4159_v10  ;;  %4557 = vmatprep.subr.mxu0 %v4028_v12  ;;  %v6443_v10 = vpop.f32.mrf.mxu0  ;;  %v4235_v12 = vld [vmem:[#allocation8 + $0x6c0] sm:$0xff] }
 0x255   :  { %4634 = vmatprep.subr.mxu1 %v4156_v1  ;;  %4558 = vmatpush1.msra.mxu0 %v4027_v11  ;;  %v4104_v1 = vld [vmem:[#allocation8 + $0x2a8] sm:$0xff]  ;;  %v6445_v11 = vpop.f32.mrf.mxu1 }
 0x256   :  { %4635 = vmatpush1.msra.mxu1 %v4155_v4  ;;  %4559 = vmatprep.subr.mxu0 %v4024_v13  ;;  %v4232_v4 = vld [vmem:[#allocation8 + $0x6a8] sm:$0xff]  ;;  %v4103_v13 = vld [vmem:[#allocation8 + $0x2a0] sm:$0xff] }
 0x257   :  { %4636 = vmatprep.subr.mxu1 %v4152_v17  ;;  %4560 = vmatpush1.msra.mxu0 %v4023_v32  ;;  %v4231_v17 = vld [vmem:[#allocation8 + $0x6a0] sm:$0xff]  ;;  %v4100_v32 = vld [vmem:[#allocation8 + $0x288] sm:$0xff] }
 0x258   :  { %4637 = vmatpush1.msra.mxu1 %v4151_v18  ;;  %4561 = vmatprep.subr.mxu0 %v4020_v15  ;;  %v4228_v18 = vld [vmem:[#allocation8 + $0x688] sm:$0xff]  ;;  %v4099_v15 = vld [vmem:[#allocation8 + $0x280] sm:$0xff] }
 0x259   :  { %4638 = vmatprep.subr.mxu1 %v4148_v60  ;;  %4562 = vmatpush1.msra.mxu0 %v4019_v19  ;;  %v3531_v60 = vadd.f32 %v3530_v0, %v6418_v26  ;;  %v3612_v19 = vpop.f32.mrf.mxu0  ;;  %v4091_v26 = vld [vmem:[#allocation8 + $0x240] sm:$0xff] }
 0x25a   :  { %4639 = vmatpush1.msra.mxu1 %v4147_v22  ;;  %4563 = vmatprep.subr.mxu0 %v4144_v58  ;;  %v4227_v22 = vld [vmem:[#allocation8 + $0x680] sm:$0xff]  ;;  %v4096_v58 = vld [vmem:[#allocation8 + $0x268] sm:$0xff] }
 0x25b   :  { %4640 = vmatprep.subr.mxu1 %v4272_v29  ;;  %4564 = vmatpush2.msra.mxu0 %v4143_v44  ;;  %v3655_v29 = vpop.f32.mrf.mxu1  ;;  %v4224_v44 = vld [vmem:[#allocation8 + $0x668] sm:$0xff] }
 0x25c   :  { %4641 = vmatpush2.msra.mxu1 %v4271_v47  ;;  %4565 = vmatprep.subr.mxu0 %v4140_v54  ;;  %v4095_v47 = vld [vmem:[#allocation8 + $0x260] sm:$0xff] }
 0x25d   :  { %4642 = vmatprep.subr.mxu1 %v4268_v63  ;;  %4566 = vmatpush2.msra.mxu0 %v4139_v55  ;;  %v4223_v54 = vld [vmem:[#allocation8 + $0x660] sm:$0xff]  ;;  %v4092_v63 = vld [vmem:[#allocation8 + $0x248] sm:$0xff]  ;;  %v3529_v55 = vadd.f32 %v3528_v27, %v6416_v16  ;;  %v3995_v27 = vmul.f32 0.1, %v6401_v31 }
 0x25e   :  { %4643 = vmatpush2.msra.mxu1 %v4267_v30  ;;  %4567 = vmatprep.subr.mxu0 %v4136_v59  ;;  %v4220_v30 = vld [vmem:[#allocation8 + $0x648] sm:$0xff]  ;;  %v3574_v59 = vadd.f32 %v3573_v34, %v3531_v60  ;;  %v4215_v16 = vld [vmem:[#allocation8 + $0x620] sm:$0xff] }
 0x25f   :  { %4644 = vmatprep.subr.mxu1 %v4264_v35  ;;  %4568 = vmatpush2.msra.mxu0 %v4135_v36  ;;  %v6449_v35 = vpop.f32.mrf.mxu0  ;;  %v4219_v36 = vld [vmem:[#allocation8 + $0x640] sm:$0xff]  ;;  %v4456_v60 = vld [vmem:[#allocation8 + $0xda8] sm:$0xff] }
 0x260   :  { %4645 = vmatpush2.msra.mxu1 %v4263_v38  ;;  %4569 = vmatprep.subr.mxu0 %v4132_v39  ;;  %v4088_v38 = vld [vmem:[#allocation8 + $0x228] sm:$0xff]  ;;  %v6451_v39 = vpop.f32.mrf.mxu1  ;;  %vm3982_vm5 = vcmp.ge.f32.partialorder %v3574_v59, 0.0 }
 0x261   :  { %4646 = vmatprep.subr.mxu1 %v4260_v40  ;;  %4570 = vmatpush2.msra.mxu0 %v4131_v41  ;;  %v4216_v40 = vld [vmem:[#allocation8 + $0x628] sm:$0xff]  ;;  %v4087_v41 = vld [vmem:[#allocation8 + $0x220] sm:$0xff] }
 0x262   :  { %4647 = vmatpush2.msra.mxu1 %v4259_v42  ;;  %4571 = vmatprep.subr.mxu0 %v4128_v43  ;;  %v3987_v42 = vmul.f32 0.1, %v6394_v14  ;;  %v4084_v43 = vld [vmem:[#allocation8 + $0x208] sm:$0xff] }
 0x263   :  { %4648 = vmatprep.subr.mxu1 %v4256_v45  ;;  %4572 = vmatpush2.msra.mxu0 %v4127_v46  ;;  %v3989_v45 = vmul.f32 0.1, %v6423_v62  ;;  %v3572_v46 = vadd.f32 %v6441_v61, %v3529_v55  ;;  %v4448_v55 = vld [vmem:[#allocation8 + $0xd68] sm:$0xff] }
 0x264   :  { %4649 = vmatpush2.msra.mxu1 %v4255_v49  ;;  %4573 = vmatprep.subr.mxu0 %v4124_v50  ;;  %v4212_v49 = vld [vmem:[#allocation8 + $0x608] sm:$0xff]  ;;  %v4083_v50 = vld [vmem:[#allocation8 + $0x200] sm:$0xff] }
 0x265   :  { %4650 = vmatprep.subr.mxu1 %v4252_v56  ;;  %4574 = vmatpush2.msra.mxu0 %v4123_v51  ;;  %v3996_v56 = vmul.f32 0.1, %v6404_v48  ;;  %v3998_v51 = vmul.f32 0.1, %v3574_v59  ;;  %v3997_v61 = vmul.f32 0.1, %v3572_v46 }
 0x266   :  { %4651 = vmatpush2.msra.mxu1 %v4251_v52  ;;  %4575 = vmatprep.subr.mxu0 %v4120_v53  ;;  %v6459_v52 = vpop.f32.mrf.mxu0  ;;  %v4211_v53 = vld [vmem:[#allocation8 + $0x600] sm:$0xff]  ;;  %vm3981_vm7 = vcmp.ge.f32.partialorder %v3572_v46, 0.0 }
 0x267   :  { %4652 = vmatprep.subr.mxu1 %v4248_v23  ;;  %4576 = vmatpush2.msra.mxu0 %v4119_v24  ;;  %v6461_v23 = vpop.f32.mrf.mxu1  ;;  %v4336_v24 = vld [vmem:[#allocation8 + $0x9e8] sm:$0xff] }
 0x268   :  { %4653 = vmatpush2.msra.mxu1 %v4247_v28  ;;  %4577 = vmatprep.subr.mxu0 %v4116_v57  ;;  %v6470_v57 = vsel %vm3971_vm2, %v6394_v14, %v3987_v42  ;;  %v6485_v14 = vsel %vm3980_vm4, %v6404_v48, %v3996_v56  ;;  %v4463_v48 = vld [vmem:[#allocation8 + $0xde0] sm:$0xff]  ;;  %v4440_v42 = vld [vmem:[#allocation8 + $0xd28] sm:$0xff] }
 0x269   :  { %4654 = vmatprep.subr.mxu1 %v4244_v2  ;;  %4578 = vmatpush2.msra.mxu0 %v4115_v3  ;;  %v3656_v2 = vadd.f32 %v3655_v29, %v3612_v19  ;;  %v4319_v19 = vld [vmem:[#allocation8 + $0x960] sm:$0xff]  ;;  %v4316_v29 = vld [vmem:[#allocation8 + $0x948] sm:$0xff] }
 0x26a   :  { %4655 = vmatpush2.msra.mxu1 %v4243_v5  ;;  %4579 = vmatprep.subr.mxu0 %v4112_v21  ;;  %v6478_v5 = vsel %vm3973_vm3, %v6423_v62, %v3989_v45  ;;  %v4335_v21 = vld [vmem:[#allocation8 + $0x9e0] sm:$0xff]  ;;  %v4300_v45 = vld [vmem:[#allocation8 + $0x8c8] sm:$0xff] }
 0x26b   :  { %4656 = vmatprep.subr.mxu1 %v4240_v6  ;;  %4580 = vmatpush2.msra.mxu0 %v4111_v25  ;;  %v4464_v6 = vld [vmem:[#allocation8 + $0xde8] sm:$0xff]  ;;  %v6488_v25 = vsel %vm3982_vm5, %v3574_v59, %v3998_v51 }
 0x26c   :  { %4657 = vmatpush2.msra.mxu1 %v4239_v7  ;;  %4581 = vmatprep.subr.mxu0 %v4108_v8  ;;  %v4332_v7 = vld [vmem:[#allocation8 + $0x9c8] sm:$0xff]  ;;  %v4331_v8 = vld [vmem:[#allocation8 + $0x9c0] sm:$0xff] }
 0x26d   :  { %4658 = vmatprep.subr.mxu1 %v4236_v37  ;;  %4582 = vmatpush2.msra.mxu0 %v4107_v9  ;;  %v6493_v37 = vsel %vm3979_vm6, %v6401_v31, %v3995_v27  ;;  %v4328_v9 = vld [vmem:[#allocation8 + $0x9a8] sm:$0xff]  ;;  %v4323_v31 = vld [vmem:[#allocation8 + $0x980] sm:$0xff] }
 0x26e   :  { %4659 = vmatpush2.msra.mxu1 %v4235_v12  ;;  %4583 = vmatprep.subr.mxu0 %v4104_v1  ;;  %v6496_v1 = vsel %vm3981_vm7, %v3572_v46, %v3997_v61  ;;  %v4308_v59 = vld [vmem:[#allocation8 + $0x908] sm:$0xff] }
 0x26f   :  { %4660 = vmatprep.subr.mxu1 %v4232_v4  ;;  %4584 = vmatpush2.msra.mxu0 %v4103_v13  ;;  %v4327_v4 = vld [vmem:[#allocation8 + $0x9a0] sm:$0xff]  ;;  %v4460_v13 = vld [vmem:[#allocation8 + $0xdc8] sm:$0xff] }
 0x270   :  { %4661 = vmatpush2.msra.mxu1 %v4231_v17  ;;  %4585 = vmatprep.subr.mxu0 %v4100_v32  ;;  %v4324_v17 = vld [vmem:[#allocation8 + $0x988] sm:$0xff]  ;;  %v4459_v32 = vld [vmem:[#allocation8 + $0xdc0] sm:$0xff] }
 0x271   :  { %4662 = vmatprep.subr.mxu1 %v4228_v18  ;;  %4586 = vmatpush2.msra.mxu0 %v4099_v15  ;;  %v4320_v15 = vld [vmem:[#allocation8 + $0x968] sm:$0xff] }
 0x272   :  { %4663 = vmatpush2.msra.mxu1 %v4227_v22  ;;  %4587 = vmatprep.subr.mxu0 %v4096_v58  ;;  %v4455_v58 = vld [vmem:[#allocation8 + $0xda0] sm:$0xff]  ;;  %v4436_v46 = vld [vmem:[#allocation8 + $0xd08] sm:$0xff] }
 0x273   :  { %4664 = vmatprep.subr.mxu1 %v4224_v44  ;;  %4588 = vmatpush2.msra.mxu0 %v4095_v47  ;;  %v4452_v44 = vld [vmem:[#allocation8 + $0xd88] sm:$0xff]  ;;  %v4315_v47 = vld [vmem:[#allocation8 + $0x940] sm:$0xff] }
 0x274   :  { %4665 = vmatpush2.msra.mxu1 %v4223_v54  ;;  %4589 = vmatprep.subr.mxu0 %v4092_v63  ;;  %v4451_v54 = vld [vmem:[#allocation8 + $0xd80] sm:$0xff]  ;;  %v4312_v63 = vld [vmem:[#allocation8 + $0x928] sm:$0xff] }
 0x275   :  { %4666 = vmatprep.subr.mxu1 %v4220_v30  ;;  %4590 = vmatpush2.msra.mxu0 %v4091_v26  ;;  %v4311_v30 = vld [vmem:[#allocation8 + $0x920] sm:$0xff]  ;;  %v4296_v56 = vld [vmem:[#allocation8 + $0x8a8] sm:$0xff] }
 0x276   :  { %4667 = vmatpush2.msra.mxu1 %v4219_v36  ;;  %4591 = vmatprep.subr.mxu0 %v4088_v38  ;;  %v4447_v26 = vld [vmem:[#allocation8 + $0xd60] sm:$0xff]  ;;  %v4444_v36 = vld [vmem:[#allocation8 + $0xd48] sm:$0xff] }
 0x277   :  { %4668 = vmatprep.subr.mxu1 %v4216_v40  ;;  %4592 = vmatpush2.msra.mxu0 %v4087_v41  ;;  %v4307_v38 = vld [vmem:[#allocation8 + $0x900] sm:$0xff]  ;;  %v4304_v41 = vld [vmem:[#allocation8 + $0x8e8] sm:$0xff] }
 0x278   :  { %4669 = vmatpush2.msra.mxu1 %v4215_v16  ;;  %4593 = vmatprep.subr.mxu0 %v4084_v43  ;;  %v4443_v40 = vld [vmem:[#allocation8 + $0xd40] sm:$0xff]  ;;  %v4432_v51 = vld [vmem:[#allocation8 + $0xce8] sm:$0xff] }
 0x279   :  { %4670 = vmatprep.subr.mxu1 %v4212_v49  ;;  %4594 = vmatpush2.msra.mxu0 %v4083_v50  ;;  %v6465_v28 = vpop.f32.mrf.mxu0  ;;  %v4303_v16 = vld [vmem:[#allocation8 + $0x8e0] sm:$0xff]  ;;  %v4292_v27 = vld [vmem:[#allocation8 + $0x888] sm:$0xff] }
 0x27a   :  { %4671 = vmatpush2.msra.mxu1 %v4211_v53  ;;  %4596 = vmatmul.mubr.f32.vlgmr.msra.gmra.mxu0 %v6470_v57  ;;  %v4439_v43 = vld [vmem:[#allocation8 + $0xd20] sm:$0xff]  ;;  %v4428_v61 = vld [vmem:[#allocation8 + $0xcc8] sm:$0xff] }
 0x27b   :  { %v6472_v3 = vpop.f32.mrf.mxu1  ;;  %4673 = vmatmul.mubr.f32.vlgmr.msra.gmra.mxu1 %v6478_v5  ;;  %4685 = vmatprep.subr.mxu0 %v4336_v24  ;;  %v3698_v0 = vpop.f32.mrf.mxu0  ;;  %v4299_v49 = vld [vmem:[#allocation8 + $0x8c0] sm:$0xff] }
 0x27c   :  { %4601 = vmatprep.mubr.f32.mxu0 %v6485_v14  ;;  %4678 = vmatprep.mubr.f32.mxu1 %v6488_v25  ;;  %v3699_v62 = vadd.f32 %v3698_v0, %v3656_v2  ;;  %v4435_v50 = vld [vmem:[#allocation8 + $0xd00] sm:$0xff]  ;;  %v4424_v0 = vld [vmem:[#allocation8 + $0xca8] sm:$0xff] }
 0x27d   :  { %4686 = vmatpush1.msra.mxu0 %v4335_v21  ;;  %v3741_v34 = vpop.f32.mrf.mxu1  ;;  %4762 = vmatprep.subr.mxu1 %v4464_v6  ;;  %v4295_v53 = vld [vmem:[#allocation8 + $0x8a0] sm:$0xff]  ;;  %v4288_v6 = vld [vmem:[#allocation8 + $0x868] sm:$0xff] }
 0x27e   :  { %v3742_v12 = vadd.f32 %v3741_v34, %v3699_v62  ;;  %4687 = vmatprep.subr.mxu0 %v4332_v7  ;;  %4602 = vmatmul.mubr.f32.gmra.mxu0 %v6493_v37  ;;  %v4431_v24 = vld [vmem:[#allocation8 + $0xce0] sm:$0xff]  ;;  %v4420_v34 = vld [vmem:[#allocation8 + $0xc88] sm:$0xff] }
 0x27f   :  { %4688 = vmatpush1.msra.mxu0 %v4331_v8  ;;  %4679 = vmatmul.mubr.f32.gmra.mxu1 %v6496_v1  ;;  %v4291_v2 = vld [vmem:[#allocation8 + $0x880] sm:$0xff]  ;;  %v4284_v8 = vld [vmem:[#allocation8 + $0x848] sm:$0xff] }
 0x280   :  { %v3992_v18 = vmul.f32 0.1, %v3742_v12  ;;  %4689 = vmatprep.subr.mxu0 %v4328_v9  ;;  %4763 = vmatpush1.msra.mxu1 %v4463_v48  ;;  %vm3976_vm8 = vcmp.ge.f32.partialorder %v3742_v12, 0.0  ;;  %v4427_v21 = vld [vmem:[#allocation8 + $0xcc0] sm:$0xff] }
 0x281   :  { %4690 = vmatpush1.msra.mxu0 %v4327_v4  ;;  %4764 = vmatprep.subr.mxu1 %v4460_v13  ;;  %v4287_v7 = vld [vmem:[#allocation8 + $0x860] sm:$0xff]  ;;  %v4416_v4 = vld [vmem:[#allocation8 + $0xc68] sm:$0xff] }
 0x282   :  { %4691 = vmatprep.subr.mxu0 %v4324_v17  ;;  %v6499_v22 = vsel %vm3976_vm8, %v3742_v12, %v3992_v18  ;;  %4765 = vmatpush1.msra.mxu1 %v4459_v32  ;;  %v4423_v62 = vld [vmem:[#allocation8 + $0xca0] sm:$0xff]  ;;  %v4280_v12 = vld [vmem:[#allocation8 + $0x828] sm:$0xff] }
 0x283   :  { %4692 = vmatpush1.msra.mxu0 %v4323_v31  ;;  %4749 = vmatprep.mubr.f32.mxu0 %v6499_v22  ;;  %v4283_v9 = vld [vmem:[#allocation8 + $0x840] sm:$0xff]  ;;  %v4276_v32 = vld [vmem:[#allocation8 + $0x808] sm:$0xff] }
 0x284   :  { %4693 = vmatprep.subr.mxu0 %v4320_v15  ;;  %4766 = vmatprep.subr.mxu1 %v4456_v60  ;;  %v4419_v48 = vld [vmem:[#allocation8 + $0xc80] sm:$0xff]  ;;  %v4412_v18 = vld [vmem:[#allocation8 + $0xc48] sm:$0xff] }
 0x285   :  { %4694 = vmatpush1.msra.mxu0 %v4319_v19  ;;  %4767 = vmatpush1.msra.mxu1 %v4455_v58  ;;  %v4279_v13 = vld [vmem:[#allocation8 + $0x820] sm:$0xff]  ;;  %v4400_v60 = vld [vmem:[#allocation8 + $0xbe8] sm:$0xff] }
 0x286   :  { %4695 = vmatprep.subr.mxu0 %v4316_v29  ;;  %4768 = vmatprep.subr.mxu1 %v4452_v44  ;;  %v4415_v17 = vld [vmem:[#allocation8 + $0xc60] sm:$0xff]  ;;  %v4408_v19 = vld [vmem:[#allocation8 + $0xc28] sm:$0xff] }
 0x287   :  { %4696 = vmatpush1.msra.mxu0 %v4315_v47  ;;  %4769 = vmatpush1.msra.mxu1 %v4451_v54  ;;  %v4275_v31 = vld [vmem:[#allocation8 + $0x800] sm:$0xff]  ;;  %v4396_v44 = vld [vmem:[#allocation8 + $0xbc8] sm:$0xff] }
 0x288   :  { %4697 = vmatprep.subr.mxu0 %v4312_v63  ;;  %4770 = vmatprep.subr.mxu1 %v4448_v55  ;;  %v4411_v15 = vld [vmem:[#allocation8 + $0xc40] sm:$0xff]  ;;  %v4404_v47 = vld [vmem:[#allocation8 + $0xc08] sm:$0xff] }
 0x289   :  { %4698 = vmatpush1.msra.mxu0 %v4311_v30  ;;  %4771 = vmatpush1.msra.mxu1 %v4447_v26  ;;  %v4399_v58 = vld [vmem:[#allocation8 + $0xbe0] sm:$0xff]  ;;  %v4392_v55 = vld [vmem:[#allocation8 + $0xba8] sm:$0xff] }
 0x28a   :  { %4699 = vmatprep.subr.mxu0 %v4308_v59  ;;  %4772 = vmatprep.subr.mxu1 %v4444_v36  ;;  %v4407_v29 = vld [vmem:[#allocation8 + $0xc20] sm:$0xff]  ;;  %v4528_v30 = vld [vmem:[#allocation8 + $0xfe8] sm:$0xff] }
 0x28b   :  { %4700 = vmatpush1.msra.mxu0 %v4307_v38  ;;  %4773 = vmatpush1.msra.mxu1 %v4443_v40  ;;  %v4395_v54 = vld [vmem:[#allocation8 + $0xbc0] sm:$0xff]  ;;  %v4388_v36 = vld [vmem:[#allocation8 + $0xb88] sm:$0xff] }
 0x28c   :  { %4701 = vmatprep.subr.mxu0 %v4304_v41  ;;  %4774 = vmatprep.subr.mxu1 %v4440_v42  ;;  %v4403_v63 = vld [vmem:[#allocation8 + $0xc00] sm:$0xff]  ;;  %v4524_v38 = vld [vmem:[#allocation8 + $0xfc8] sm:$0xff] }
 0x28d   :  { %4702 = vmatpush1.msra.mxu0 %v4303_v16  ;;  %4775 = vmatpush1.msra.mxu1 %v4439_v43  ;;  %v4391_v26 = vld [vmem:[#allocation8 + $0xba0] sm:$0xff]  ;;  %v4384_v42 = vld [vmem:[#allocation8 + $0xb68] sm:$0xff] }
 0x28e   :  { %4703 = vmatprep.subr.mxu0 %v4300_v45  ;;  %4776 = vmatprep.subr.mxu1 %v4436_v46  ;;  %v4527_v59 = vld [vmem:[#allocation8 + $0xfe0] sm:$0xff]  ;;  %v4520_v16 = vld [vmem:[#allocation8 + $0xfa8] sm:$0xff] }
 0x28f   :  { %4704 = vmatpush1.msra.mxu0 %v4299_v49  ;;  %4777 = vmatpush1.msra.mxu1 %v4435_v50  ;;  %v4387_v40 = vld [vmem:[#allocation8 + $0xb80] sm:$0xff]  ;;  %v4380_v46 = vld [vmem:[#allocation8 + $0xb48] sm:$0xff] }
 0x290   :  { %4705 = vmatprep.subr.mxu0 %v4296_v56  ;;  %4778 = vmatprep.subr.mxu1 %v4432_v51  ;;  %v4523_v41 = vld [vmem:[#allocation8 + $0xfc0] sm:$0xff]  ;;  %v4516_v49 = vld [vmem:[#allocation8 + $0xf88] sm:$0xff] }
 0x291   :  { %4706 = vmatpush1.msra.mxu0 %v4295_v53  ;;  %4779 = vmatpush1.msra.mxu1 %v4431_v24  ;;  %v4383_v43 = vld [vmem:[#allocation8 + $0xb60] sm:$0xff]  ;;  %v4376_v51 = vld [vmem:[#allocation8 + $0xb28] sm:$0xff] }
 0x292   :  { %4707 = vmatprep.subr.mxu0 %v4292_v27  ;;  %4780 = vmatprep.subr.mxu1 %v4428_v61  ;;  %v4519_v45 = vld [vmem:[#allocation8 + $0xfa0] sm:$0xff]  ;;  %v4512_v53 = vld [vmem:[#allocation8 + $0xf68] sm:$0xff] }
 0x293   :  { %4708 = vmatpush1.msra.mxu0 %v4291_v2  ;;  %4781 = vmatpush1.msra.mxu1 %v4427_v21  ;;  %v4379_v50 = vld [vmem:[#allocation8 + $0xb40] sm:$0xff]  ;;  %v4372_v61 = vld [vmem:[#allocation8 + $0xb08] sm:$0xff] }
 0x294   :  { %4709 = vmatprep.subr.mxu0 %v4288_v6  ;;  %4782 = vmatprep.subr.mxu1 %v4424_v0  ;;  %v4515_v56 = vld [vmem:[#allocation8 + $0xf80] sm:$0xff]  ;;  %v4508_v2 = vld [vmem:[#allocation8 + $0xf48] sm:$0xff]  ;;  %v3700_v0 = vpop.f32.mrf.mxu0 }
 0x295   :  { %4710 = vmatpush1.msra.mxu0 %v4287_v7  ;;  %4783 = vmatpush1.msra.mxu1 %v4423_v62  ;;  %v4375_v24 = vld [vmem:[#allocation8 + $0xb20] sm:$0xff]  ;;  %v4368_v7 = vld [vmem:[#allocation8 + $0xae8] sm:$0xff] }
 0x296   :  { %4711 = vmatprep.subr.mxu0 %v4284_v8  ;;  %4784 = vmatprep.subr.mxu1 %v4420_v34  ;;  %v4511_v27 = vld [vmem:[#allocation8 + $0xf60] sm:$0xff]  ;;  %v4504_v62 = vld [vmem:[#allocation8 + $0xf28] sm:$0xff] }
 0x297   :  { %4712 = vmatpush1.msra.mxu0 %v4283_v9  ;;  %4785 = vmatpush1.msra.mxu1 %v4419_v48  ;;  %v4371_v21 = vld [vmem:[#allocation8 + $0xb00] sm:$0xff]  ;;  %v4364_v9 = vld [vmem:[#allocation8 + $0xac8] sm:$0xff] }
 0x298   :  { %4713 = vmatprep.subr.mxu0 %v4280_v12  ;;  %4786 = vmatprep.subr.mxu1 %v4416_v4  ;;  %v4507_v6 = vld [vmem:[#allocation8 + $0xf40] sm:$0xff]  ;;  %v4500_v48 = vld [vmem:[#allocation8 + $0xf08] sm:$0xff] }
 0x299   :  { %4714 = vmatpush1.msra.mxu0 %v4279_v13  ;;  %4787 = vmatpush1.msra.mxu1 %v4415_v17  ;;  %v4367_v8 = vld [vmem:[#allocation8 + $0xae0] sm:$0xff]  ;;  %v3654_v13 = vadd.f32 %v6445_v11, %v6443_v10  ;;  %v3702_v17 = vpop.f32.mrf.mxu0 }
 0x29a   :  { %4715 = vmatprep.subr.mxu0 %v4276_v32  ;;  %4788 = vmatprep.subr.mxu1 %v4412_v18  ;;  %v4503_v34 = vld [vmem:[#allocation8 + $0xf20] sm:$0xff]  ;;  %v4360_v32 = vld [vmem:[#allocation8 + $0xaa8] sm:$0xff] }
 0x29b   :  { %4716 = vmatpush1.msra.mxu0 %v4275_v31  ;;  %4789 = vmatpush1.msra.mxu1 %v4411_v15  ;;  %v4363_v12 = vld [vmem:[#allocation8 + $0xac0] sm:$0xff]  ;;  %v4496_v18 = vld [vmem:[#allocation8 + $0xee8] sm:$0xff]  ;;  %v3660_v31 = vadd.f32 %v6461_v23, %v6459_v52 }
 0x29c   :  { %4717 = vmatprep.subr.mxu0 %v4400_v60  ;;  %4790 = vmatprep.subr.mxu1 %v4408_v19  ;;  %v4499_v4 = vld [vmem:[#allocation8 + $0xf00] sm:$0xff]  ;;  %v3697_v19 = vadd.f32 %v6465_v28, %v3654_v13  ;;  %v4352_v52 = vld [vmem:[#allocation8 + $0xa68] sm:$0xff]  ;;  %v4210_v13 = vld [vmem:[#allocation8 + $0x5f8] sm:$0xff] }
 0x29d   :  { %4718 = vmatpush2.msra.mxu0 %v4399_v58  ;;  %4791 = vmatpush1.msra.mxu1 %v4407_v29  ;;  %v4359_v15 = vld [vmem:[#allocation8 + $0xaa0] sm:$0xff]  ;;  %v3743_v58 = vpop.f32.mrf.mxu1  ;;  %v4356_v29 = vld [vmem:[#allocation8 + $0xa88] sm:$0xff]  ;;  %v3703_v10 = vadd.f32 %v3702_v17, %v3660_v31  ;;  %v4065_v17 = vld [vmem:[#allocation8 + $0x170] sm:$0xff] }
 0x29e   :  { %4719 = vmatprep.subr.mxu0 %v4396_v44  ;;  %4792 = vmatprep.subr.mxu1 %v4404_v47  ;;  %v4495_v60 = vld [vmem:[#allocation8 + $0xee0] sm:$0xff]  ;;  %v4492_v44 = vld [vmem:[#allocation8 + $0xec8] sm:$0xff]  ;;  %v4058_v31 = vld [vmem:[#allocation8 + $0x138] sm:$0xff] }
 0x29f   :  { %4720 = vmatpush2.msra.mxu0 %v4395_v54  ;;  %4793 = vmatpush1.msra.mxu1 %v4403_v63  ;;  %v4355_v11 = vld [vmem:[#allocation8 + $0xa80] sm:$0xff]  ;;  %v3658_v54 = vadd.f32 %v6451_v39, %v6449_v35  ;;  %v4488_v23 = vld [vmem:[#allocation8 + $0xea8] sm:$0xff] }
 0x2a0   :  { %4721 = vmatprep.subr.mxu0 %v4392_v55  ;;  %4794 = vmatprep.subr.mxu1 %v4528_v30  ;;  %v4491_v47 = vld [vmem:[#allocation8 + $0xec0] sm:$0xff]  ;;  %v3740_v55 = vadd.f32 %v6472_v3, %v3697_v19  ;;  %v4344_v39 = vld [vmem:[#allocation8 + $0xa28] sm:$0xff]  ;;  %v4053_v19 = vld [vmem:[#allocation8 + $0x110] sm:$0xff] }
 0x2a1   :  { %4722 = vmatpush2.msra.mxu0 %v4391_v26  ;;  %4795 = vmatpush2.msra.mxu1 %v4527_v59  ;;  %v4351_v63 = vld [vmem:[#allocation8 + $0xa60] sm:$0xff]  ;;  %v3701_v30 = vadd.f32 %v3700_v0, %v3658_v54  ;;  %v3745_v26 = vpop.f32.mrf.mxu1  ;;  %v4348_v59 = vld [vmem:[#allocation8 + $0xa48] sm:$0xff]  ;;  %v4037_v54 = vld [vmem:[#allocation8 + $0x90] sm:$0xff] }
 0x2a2   :  { %4723 = vmatprep.subr.mxu0 %v4388_v36  ;;  %4796 = vmatprep.subr.mxu1 %v4524_v38  ;;  %v4487_v28 = vld [vmem:[#allocation8 + $0xea0] sm:$0xff]  ;;  %v4484_v36 = vld [vmem:[#allocation8 + $0xe88] sm:$0xff]  ;;  %v3746_v38 = vadd.f32 %v3745_v26, %v3703_v10  ;;  %v3991_v3 = vmul.f32 0.1, %v3740_v55  ;;  %vm3975_vm9 = vcmp.ge.f32.partialorder %v3740_v55, 0.0  ;;  %v4042_v10 = vld [vmem:[#allocation8 + $0xb8] sm:$0xff] }
 0x2a3   :  { %4724 = vmatpush2.msra.mxu0 %v4387_v40  ;;  %4797 = vmatpush2.msra.mxu1 %v4523_v41  ;;  %v4347_v40 = vld [vmem:[#allocation8 + $0xa40] sm:$0xff]  ;;  %v4480_v41 = vld [vmem:[#allocation8 + $0xe68] sm:$0xff]  ;;  %v4022_v26 = vld [vmem:[#allocation8 + $0x18] sm:$0xff] }
 0x2a4   :  { %4725 = vmatprep.subr.mxu0 %v4384_v42  ;;  %4798 = vmatprep.subr.mxu1 %v4520_v16  ;;  %v4483_v35 = vld [vmem:[#allocation8 + $0xe80] sm:$0xff]  ;;  %vm3984_vm10 = vcmp.ge.f32.partialorder %v3746_v38, 0.0 }
 0x2a5   :  { %4726 = vmatpush2.msra.mxu0 %v4383_v43  ;;  %4799 = vmatpush2.msra.mxu1 %v4519_v45  ;;  %v4343_v42 = vld [vmem:[#allocation8 + $0xa20] sm:$0xff]  ;;  %v3744_v43 = vadd.f32 %v3743_v58, %v3701_v30  ;;  %v4340_v45 = vld [vmem:[#allocation8 + $0xa08] sm:$0xff]  ;;  %v4049_v58 = vld [vmem:[#allocation8 + $0xf0] sm:$0xff] }
 0x2a6   :  { %4727 = vmatprep.subr.mxu0 %v4380_v46  ;;  %4800 = vmatprep.subr.mxu1 %v4516_v49  ;;  %v4479_v16 = vld [vmem:[#allocation8 + $0xe60] sm:$0xff]  ;;  %v4476_v46 = vld [vmem:[#allocation8 + $0xe48] sm:$0xff]  ;;  %v4000_v49 = vmul.f32 0.1, %v3746_v38  ;;  %v4025_v30 = vld [vmem:[#allocation8 + $0x30] sm:$0xff] }
 0x2a7   :  { %4728 = vmatpush2.msra.mxu0 %v4379_v50  ;;  %4801 = vmatpush2.msra.mxu1 %v4515_v56  ;;  %v4339_v50 = vld [vmem:[#allocation8 + $0xa00] sm:$0xff]  ;;  %vm3983_vm11 = vcmp.ge.f32.partialorder %v3744_v43, 0.0 }
 0x2a8   :  { %4729 = vmatprep.subr.mxu0 %v4376_v51  ;;  %4802 = vmatprep.subr.mxu1 %v4512_v53  ;;  %v4475_v56 = vld [vmem:[#allocation8 + $0xe40] sm:$0xff]  ;;  %v4082_v51 = vld [vmem:[#allocation8 + $0x1f8] sm:$0xff]  ;;  %v4081_v53 = vld [vmem:[#allocation8 + $0x1f0] sm:$0xff] }
 0x2a9   :  { %4730 = vmatpush2.msra.mxu0 %v4375_v24  ;;  %4803 = vmatpush2.msra.mxu1 %v4511_v27  ;;  %v6510_v24 = vsel %vm3975_vm9, %v3740_v55, %v3991_v3  ;;  %v3999_v27 = vmul.f32 0.1, %v3744_v43  ;;  %v4471_v0 = vld [vmem:[#allocation8 + $0xe20] sm:$0xff]  ;;  %v4026_v55 = vld [vmem:[#allocation8 + $0x38] sm:$0xff] }
 0x2aa   :  { %4731 = vmatprep.subr.mxu0 %v4372_v61  ;;  %4804 = vmatprep.subr.mxu1 %v4508_v2  ;;  %v4078_v61 = vld [vmem:[#allocation8 + $0x1d8] sm:$0xff]  ;;  %v4472_v2 = vld [vmem:[#allocation8 + $0xe28] sm:$0xff] }
 0x2ab   :  { %4732 = vmatpush2.msra.mxu0 %v4371_v21  ;;  %4805 = vmatpush2.msra.mxu1 %v4507_v6  ;;  %v6513_v21 = vsel %vm3984_vm10, %v3746_v38, %v4000_v49  ;;  %v4077_v6 = vld [vmem:[#allocation8 + $0x1d0] sm:$0xff]  ;;  %v4130_v3 = vld [vmem:[#allocation8 + $0x378] sm:$0xff] }
 0x2ac   :  { %4733 = vmatprep.subr.mxu0 %v4368_v7  ;;  %4806 = vmatprep.subr.mxu1 %v4504_v62  ;;  %v4074_v7 = vld [vmem:[#allocation8 + $0x1b8] sm:$0xff]  ;;  %v4073_v62 = vld [vmem:[#allocation8 + $0x1b0] sm:$0xff] }
 0x2ad   :  { %4734 = vmatpush2.msra.mxu0 %v4367_v8  ;;  %4807 = vmatpush2.msra.mxu1 %v4503_v34  ;;  %v6516_v8 = vsel %vm3983_vm11, %v3744_v43, %v3999_v27  ;;  %v4070_v34 = vld [vmem:[#allocation8 + $0x198] sm:$0xff]  ;;  %v4145_v38 = vld [vmem:[#allocation8 + $0x3f0] sm:$0xff] }
 0x2ae   :  { %4735 = vmatprep.subr.mxu0 %v4364_v9  ;;  %4808 = vmatprep.subr.mxu1 %v4500_v48  ;;  %v4468_v9 = vld [vmem:[#allocation8 + $0xe08] sm:$0xff]  ;;  %v4069_v48 = vld [vmem:[#allocation8 + $0x190] sm:$0xff]  ;;  %v4122_v49 = vld [vmem:[#allocation8 + $0x338] sm:$0xff] }
 0x2af   :  { %4736 = vmatpush2.msra.mxu0 %v4363_v12  ;;  %4809 = vmatpush2.msra.mxu1 %v4499_v4  ;;  %v4467_v12 = vld [vmem:[#allocation8 + $0xe00] sm:$0xff]  ;;  %v4066_v4 = vld [vmem:[#allocation8 + $0x178] sm:$0xff]  ;;  %v4129_v43 = vld [vmem:[#allocation8 + $0x370] sm:$0xff] }
 0x2b0   :  { %4737 = vmatprep.subr.mxu0 %v4360_v32  ;;  %4810 = vmatprep.subr.mxu1 %v4496_v18  ;;  %v4062_v32 = vld [vmem:[#allocation8 + $0x158] sm:$0xff]  ;;  %v4061_v18 = vld [vmem:[#allocation8 + $0x150] sm:$0xff] }
 0x2b1   :  { %4738 = vmatpush2.msra.mxu0 %v4359_v15  ;;  %4811 = vmatpush2.msra.mxu1 %v4495_v60  ;;  %v4057_v15 = vld [vmem:[#allocation8 + $0x130] sm:$0xff]  ;;  %v4054_v60 = vld [vmem:[#allocation8 + $0x118] sm:$0xff] }
 0x2b2   :  { %4739 = vmatprep.subr.mxu0 %v4356_v29  ;;  %4812 = vmatprep.subr.mxu1 %v4492_v44  ;;  %v4046_v29 = vld [vmem:[#allocation8 + $0xd8] sm:$0xff]  ;;  %v4045_v44 = vld [vmem:[#allocation8 + $0xd0] sm:$0xff] }
 0x2b3   :  { %4740 = vmatpush2.msra.mxu0 %v4355_v11  ;;  %4813 = vmatpush2.msra.mxu1 %v4491_v47  ;;  %v4041_v11 = vld [vmem:[#allocation8 + $0xb0] sm:$0xff]  ;;  %v4038_v47 = vld [vmem:[#allocation8 + $0x98] sm:$0xff] }
 0x2b4   :  { %4741 = vmatprep.subr.mxu0 %v4352_v52  ;;  %4814 = vmatprep.subr.mxu1 %v4488_v23  ;;  %v4034_v52 = vld [vmem:[#allocation8 + $0x78] sm:$0xff]  ;;  %v4033_v23 = vld [vmem:[#allocation8 + $0x70] sm:$0xff] }
 0x2b5   :  { %4742 = vmatpush2.msra.mxu0 %v4351_v63  ;;  %4815 = vmatpush2.msra.mxu1 %v4487_v28  ;;  %v4030_v63 = vld [vmem:[#allocation8 + $0x58] sm:$0xff]  ;;  %v4029_v28 = vld [vmem:[#allocation8 + $0x50] sm:$0xff] }
 0x2b6   :  { %4743 = vmatprep.subr.mxu0 %v4348_v59  ;;  %4816 = vmatprep.subr.mxu1 %v4484_v36  ;;  %v4021_v59 = vld [vmem:[#allocation8 + $0x10] sm:$0xff]  ;;  %v4146_v36 = vld [vmem:[#allocation8 + $0x3f8] sm:$0xff] }
 0x2b7   :  { %4744 = vmatpush2.msra.mxu0 %v4347_v40  ;;  %4817 = vmatpush2.msra.mxu1 %v4483_v35  ;;  %v4142_v40 = vld [vmem:[#allocation8 + $0x3d8] sm:$0xff]  ;;  %v4141_v35 = vld [vmem:[#allocation8 + $0x3d0] sm:$0xff] }
 0x2b8   :  { %4745 = vmatprep.subr.mxu0 %v4344_v39  ;;  %4818 = vmatprep.subr.mxu1 %v4480_v41  ;;  %v4138_v39 = vld [vmem:[#allocation8 + $0x3b8] sm:$0xff]  ;;  %v4137_v41 = vld [vmem:[#allocation8 + $0x3b0] sm:$0xff] }
 0x2b9   :  { %4746 = vmatpush2.msra.mxu0 %v4343_v42  ;;  %4819 = vmatpush2.msra.mxu1 %v4479_v16  ;;  %v4134_v42 = vld [vmem:[#allocation8 + $0x398] sm:$0xff]  ;;  %v4133_v16 = vld [vmem:[#allocation8 + $0x390] sm:$0xff] }
 0x2ba   :  { %4747 = vmatprep.subr.mxu0 %v4340_v45  ;;  %4820 = vmatprep.subr.mxu1 %v4476_v46  ;;  %v4126_v45 = vld [vmem:[#allocation8 + $0x358] sm:$0xff]  ;;  %v4125_v46 = vld [vmem:[#allocation8 + $0x350] sm:$0xff] }
 0x2bb   :  { %4748 = vmatpush2.msra.mxu0 %v4339_v50  ;;  %4821 = vmatpush2.msra.mxu1 %v4475_v56  ;;  %v4121_v50 = vld [vmem:[#allocation8 + $0x330] sm:$0xff]  ;;  %v4118_v56 = vld [vmem:[#allocation8 + $0x318] sm:$0xff] }
 0x2bc   :  { %4750 = vmatmul.mubr.f32.vlgmr.msra.gmra.mxu0 %v6510_v24  ;;  %4839 = vmatprep.subr.mxu0 %v4082_v51  ;;  %v4117_v51 = vld [vmem:[#allocation8 + $0x310] sm:$0xff] }
 0x2bd   :  { %4755 = vmatprep.mubr.f32.mxu0 %v6513_v21  ;;  %4840 = vmatpush1.msra.mxu0 %v4081_v53  ;;  %v4114_v53 = vld [vmem:[#allocation8 + $0x2f8] sm:$0xff]  ;;  %v4113_v27 = vld [vmem:[#allocation8 + $0x2f0] sm:$0xff] }
 0x2be   :  { %4841 = vmatprep.subr.mxu0 %v4078_v61  ;;  %4822 = vmatprep.subr.mxu1 %v4472_v2  ;;  %v3782_v61 = vpop.f32.mrf.mxu0  ;;  %v4110_v2 = vld [vmem:[#allocation8 + $0x2d8] sm:$0xff] }
 0x2bf   :  { %4842 = vmatpush1.msra.mxu0 %v4077_v6  ;;  %4823 = vmatpush2.msra.mxu1 %v4471_v0  ;;  %v3825_v6 = vpop.f32.mrf.mxu1  ;;  %v4109_v0 = vld [vmem:[#allocation8 + $0x2d0] sm:$0xff] }
 0x2c0   :  { %4756 = vmatmul.mubr.f32.gmra.mxu0 %v6516_v8  ;;  %4843 = vmatprep.subr.mxu0 %v4074_v7  ;;  %v4106_v7 = vld [vmem:[#allocation8 + $0x2b8] sm:$0xff] }
 0x2c1   :  { %4844 = vmatpush1.msra.mxu0 %v4073_v62  ;;  %4903 = vmatprep.mubr.f32.mxu0 %v6435_v33  ;;  %v4050_v33 = vld [vmem:[#allocation8 + $0xf8] sm:$0xff]  ;;  %v4105_v62 = vld [vmem:[#allocation8 + $0x2b0] sm:$0xff] }
 0x2c2   :  { %4845 = vmatprep.subr.mxu0 %v4070_v34  ;;  %4824 = vmatprep.subr.mxu1 %v4468_v9  ;;  %v3784_v34 = vpop.f32.mrf.mxu0  ;;  %v4102_v9 = vld [vmem:[#allocation8 + $0x298] sm:$0xff] }
 0x2c3   :  { %4846 = vmatpush1.msra.mxu0 %v4069_v48  ;;  %4825 = vmatpush2.msra.mxu1 %v4467_v12  ;;  %v3827_v48 = vpop.f32.mrf.mxu1  ;;  %v4101_v12 = vld [vmem:[#allocation8 + $0x290] sm:$0xff] }
 0x2c4   :  { %4847 = vmatprep.subr.mxu0 %v4066_v4  ;;  %4916 = vmatprep.subr.mxu1 %v4210_v13  ;;  %v4098_v4 = vld [vmem:[#allocation8 + $0x278] sm:$0xff]  ;;  %v4097_v13 = vld [vmem:[#allocation8 + $0x270] sm:$0xff] }
 0x2c5   :  { %4848 = vmatpush1.msra.mxu0 %v4065_v17  ;;  %v3786_v17 = vpop.f32.mrf.mxu0 }
 0x2c6   :  { %4849 = vmatprep.subr.mxu0 %v4062_v32  ;;  %v4094_v32 = vld [vmem:[#allocation8 + $0x258] sm:$0xff] }
 0x2c7   :  { %4850 = vmatpush1.msra.mxu0 %v4061_v18  ;;  %v3829_v18 = vpop.f32.mrf.mxu1 }
 0x2c8   :  { %4851 = vmatprep.subr.mxu0 %v4058_v31  ;;  %v4093_v31 = vld [vmem:[#allocation8 + $0x250] sm:$0xff] }
 0x2c9   :  { %4852 = vmatpush1.msra.mxu0 %v4057_v15  ;;  %v4090_v15 = vld [vmem:[#allocation8 + $0x238] sm:$0xff] }
 0x2ca   :  { %4853 = vmatprep.subr.mxu0 %v4054_v60  ;;  %v4089_v60 = vld [vmem:[#allocation8 + $0x230] sm:$0xff] }
 0x2cb   :  { %4854 = vmatpush1.msra.mxu0 %v4053_v19  ;;  %v3788_v19 = vpop.f32.mrf.mxu0 }
 0x2cc   :  { %4855 = vmatprep.subr.mxu0 %v4050_v33  ;;  %v4086_v33 = vld [vmem:[#allocation8 + $0x218] sm:$0xff] }
 0x2cd   :  { %4856 = vmatpush1.msra.mxu0 %v4049_v58  ;;  %v3826_v58 = vadd.f32 %v3825_v6, %v3782_v61  ;;  %v4209_v61 = vld [vmem:[#allocation8 + $0x5f0] sm:$0xff]  ;;  %v4206_v6 = vld [vmem:[#allocation8 + $0x5d8] sm:$0xff] }
 0x2ce   :  { %4857 = vmatprep.subr.mxu0 %v4046_v29  ;;  %v3831_v29 = vpop.f32.mrf.mxu1 }
 0x2cf   :  { %4858 = vmatpush1.msra.mxu0 %v4045_v44  ;;  %v4085_v44 = vld [vmem:[#allocation8 + $0x210] sm:$0xff] }
 0x2d0   :  { %4859 = vmatprep.subr.mxu0 %v4042_v10 }
 0x2d1   :  { %4860 = vmatpush1.msra.mxu0 %v4041_v11  ;;  %v4338_v11 = vld [vmem:[#allocation8 + $0x9f8] sm:$0xff] }
 0x2d2   :  { %4861 = vmatprep.subr.mxu0 %v4038_v47  ;;  %v3828_v47 = vadd.f32 %v3827_v48, %v3784_v34  ;;  %v4314_v34 = vld [vmem:[#allocation8 + $0x938] sm:$0xff] }
 0x2d3   :  { %4862 = vmatpush1.msra.mxu0 %v4037_v54 }
 0x2d4   :  { %4863 = vmatprep.subr.mxu0 %v4034_v52 }
 0x2d5   :  { %4864 = vmatpush1.msra.mxu0 %v4033_v23  ;;  %v4337_v23 = vld [vmem:[#allocation8 + $0x9f0] sm:$0xff] }
 0x2d6   :  { %4865 = vmatprep.subr.mxu0 %v4030_v63 }
 0x2d7   :  { %4866 = vmatpush1.msra.mxu0 %v4029_v28  ;;  %v4334_v28 = vld [vmem:[#allocation8 + $0x9d8] sm:$0xff] }
 0x2d8   :  { %4867 = vmatprep.subr.mxu0 %v4026_v55  ;;  %v3830_v55 = vadd.f32 %v3829_v18, %v3786_v17  ;;  %v4309_v17 = vld [vmem:[#allocation8 + $0x910] sm:$0xff]  ;;  %v4198_v18 = vld [vmem:[#allocation8 + $0x598] sm:$0xff] }
 0x2d9   :  { %4868 = vmatpush1.msra.mxu0 %v4025_v30 }
 0x2da   :  { %4869 = vmatprep.subr.mxu0 %v4022_v26 }
 0x2db   :  { %4870 = vmatpush1.msra.mxu0 %v4021_v59 }
 0x2dc   :  { %4871 = vmatprep.subr.mxu0 %v4146_v36  ;;  %v4333_v36 = vld [vmem:[#allocation8 + $0x9d0] sm:$0xff] }
 0x2dd   :  { %4872 = vmatpush2.msra.mxu0 %v4145_v38 }
 0x2de   :  { %4873 = vmatprep.subr.mxu0 %v4142_v40  ;;  %v4330_v40 = vld [vmem:[#allocation8 + $0x9b8] sm:$0xff] }
 0x2df   :  { %4874 = vmatpush2.msra.mxu0 %v4141_v35  ;;  %v3832_v35 = vadd.f32 %v3831_v29, %v3788_v19  ;;  %v4194_v19 = vld [vmem:[#allocation8 + $0x578] sm:$0xff]  ;;  %v4301_v29 = vld [vmem:[#allocation8 + $0x8d0] sm:$0xff] }
 0x2e0   :  { %4875 = vmatprep.subr.mxu0 %v4138_v39 }
 0x2e1   :  { %4876 = vmatpush2.msra.mxu0 %v4137_v41 }
 0x2e2   :  { %4877 = vmatprep.subr.mxu0 %v4134_v42 }
 0x2e3   :  { %4878 = vmatpush2.msra.mxu0 %v4133_v16  ;;  %v4329_v16 = vld [vmem:[#allocation8 + $0x9b0] sm:$0xff] }
 0x2e4   :  { %4879 = vmatprep.subr.mxu0 %v4130_v3 }
 0x2e5   :  { %4880 = vmatpush2.msra.mxu0 %v4129_v43 }
 0x2e6   :  { %4881 = vmatprep.subr.mxu0 %v4126_v45  ;;  %v4326_v45 = vld [vmem:[#allocation8 + $0x998] sm:$0xff] }
 0x2e7   :  { %4882 = vmatpush2.msra.mxu0 %v4125_v46 }
 0x2e8   :  { %4883 = vmatprep.subr.mxu0 %v4122_v49 }
 0x2e9   :  { %4884 = vmatpush2.msra.mxu0 %v4121_v50 }
 0x2ea   :  { %4885 = vmatprep.subr.mxu0 %v4118_v56  ;;  %v4322_v56 = vld [vmem:[#allocation8 + $0x978] sm:$0xff] }
 0x2eb   :  { %4886 = vmatpush2.msra.mxu0 %v4117_v51 }
 0x2ec   :  { %4887 = vmatprep.subr.mxu0 %v4114_v53  ;;  %v4321_v53 = vld [vmem:[#allocation8 + $0x970] sm:$0xff] }
 0x2ed   :  { %4888 = vmatpush2.msra.mxu0 %v4113_v27 }
 0x2ee   :  { %4889 = vmatprep.subr.mxu0 %v4110_v2 }
 0x2ef   :  { %4890 = vmatpush2.msra.mxu0 %v4109_v0 }
 0x2f0   :  { %4891 = vmatprep.subr.mxu0 %v4106_v7  ;;  %v4205_v7 = vld [vmem:[#allocation8 + $0x5d0] sm:$0xff] }
 0x2f1   :  { %4892 = vmatpush2.msra.mxu0 %v4105_v62 }
 0x2f2   :  { %4893 = vmatprep.subr.mxu0 %v4102_v9  ;;  %v4313_v9 = vld [vmem:[#allocation8 + $0x930] sm:$0xff] }
 0x2f3   :  { %4894 = vmatpush2.msra.mxu0 %v4101_v12  ;;  %v4202_v12 = vld [vmem:[#allocation8 + $0x5b8] sm:$0xff] }
 0x2f4   :  { %4895 = vmatprep.subr.mxu0 %v4098_v4  ;;  %v4310_v4 = vld [vmem:[#allocation8 + $0x918] sm:$0xff] }
 0x2f5   :  { %4896 = vmatpush2.msra.mxu0 %v4097_v13  ;;  %v4201_v13 = vld [vmem:[#allocation8 + $0x5b0] sm:$0xff] }
 0x2f6   :  { %4897 = vmatprep.subr.mxu0 %v4094_v32 }
 0x2f7   :  { %4898 = vmatpush2.msra.mxu0 %v4093_v31  ;;  %v4306_v31 = vld [vmem:[#allocation8 + $0x8f8] sm:$0xff] }
 0x2f8   :  { %4899 = vmatprep.subr.mxu0 %v4090_v15  ;;  %v4197_v15 = vld [vmem:[#allocation8 + $0x590] sm:$0xff] }
 0x2f9   :  { %4900 = vmatpush2.msra.mxu0 %v4089_v60  ;;  %v3868_v10 = vpop.f32.mrf.mxu0  ;;  %v4305_v60 = vld [vmem:[#allocation8 + $0x8f0] sm:$0xff] }
 0x2fa   :  { %4901 = vmatprep.subr.mxu0 %v4086_v33  ;;  %v3869_v54 = vadd.f32 %v3868_v10, %v3826_v58  ;;  %v4302_v33 = vld [vmem:[#allocation8 + $0x8d8] sm:$0xff]  ;;  %v4193_v58 = vld [vmem:[#allocation8 + $0x570] sm:$0xff] }
 0x2fb   :  { %v3911_v52 = vpop.f32.mrf.mxu1  ;;  %4902 = vmatpush2.msra.mxu0 %v4085_v44  ;;  %v3870_v63 = vpop.f32.mrf.mxu0  ;;  %v4190_v44 = vld [vmem:[#allocation8 + $0x558] sm:$0xff] }
 0x2fc   :  { %v3912_v30 = vadd.f32 %v3911_v52, %v3869_v54  ;;  %4904 = vmatmul.mubr.f32.vlgmr.msra.gmra.mxu0 %v6470_v57  ;;  %4993 = vmatprep.subr.mxu0 %v4338_v11  ;;  %v3871_v26 = vadd.f32 %v3870_v63, %v3828_v47  ;;  %v4298_v10 = vld [vmem:[#allocation8 + $0x8b8] sm:$0xff]  ;;  %v4189_v11 = vld [vmem:[#allocation8 + $0x550] sm:$0xff] }
 0x2fd   :  { %v3913_v59 = vpop.f32.mrf.mxu1  ;;  %4909 = vmatprep.mubr.f32.mxu0 %v6485_v14  ;;  %4994 = vmatpush1.msra.mxu0 %v4337_v23  ;;  %v3872_v38 = vpop.f32.mrf.mxu0  ;;  %v4325_v14 = vld [vmem:[#allocation8 + $0x990] sm:$0xff]  ;;  %v4186_v54 = vld [vmem:[#allocation8 + $0x538] sm:$0xff] }
 0x2fe   :  { %v3914_v39 = vadd.f32 %v3913_v59, %v3871_v26  ;;  %4995 = vmatprep.subr.mxu0 %v4334_v28  ;;  %v3873_v41 = vadd.f32 %v3872_v38, %v3830_v55  ;;  %v3993_v3 = vmul.f32 0.1, %v3912_v30  ;;  %vm3977_vm12 = vcmp.ge.f32.partialorder %v3912_v30, 0.0  ;;  %v4297_v47 = vld [vmem:[#allocation8 + $0x8b0] sm:$0xff]  ;;  %v4294_v52 = vld [vmem:[#allocation8 + $0x898] sm:$0xff] }
 0x2ff   :  { %v3915_v42 = vpop.f32.mrf.mxu1  ;;  %4996 = vmatpush1.msra.mxu0 %v4333_v36  ;;  %v3874_v43 = vpop.f32.mrf.mxu0  ;;  %v4185_v23 = vld [vmem:[#allocation8 + $0x530] sm:$0xff]  ;;  %v4182_v63 = vld [vmem:[#allocation8 + $0x518] sm:$0xff] }
 0x300   :  { %v3994_v57 = vmul.f32 0.1, %v3914_v39  ;;  %4910 = vmatmul.mubr.f32.gmra.mxu0 %v6493_v37  ;;  %4997 = vmatprep.subr.mxu0 %v4330_v40  ;;  %v3875_v46 = vadd.f32 %v3874_v43, %v3832_v35  ;;  %v3916_v49 = vadd.f32 %v3915_v42, %v3873_v41  ;;  %vm3978_vm13 = vcmp.ge.f32.partialorder %v3914_v39, 0.0  ;;  %v4318_v37 = vld [vmem:[#allocation8 + $0x958] sm:$0xff]  ;;  %v4181_v55 = vld [vmem:[#allocation8 + $0x510] sm:$0xff] }
 0x301   :  { %4998 = vmatpush1.msra.mxu0 %v4329_v16  ;;  %5057 = vmatprep.mubr.f32.mxu0 %v6499_v22  ;;  %v3917_v50 = vpop.f32.mrf.mxu1  ;;  %v6527_v2 = vsel %vm3977_vm12, %v3912_v30, %v3993_v3  ;;  %v4317_v22 = vld [vmem:[#allocation8 + $0x950] sm:$0xff]  ;;  %v4290_v28 = vld [vmem:[#allocation8 + $0x878] sm:$0xff] }
 0x302   :  { %v3918_v51 = vadd.f32 %v3917_v50, %v3875_v46  ;;  %4999 = vmatprep.subr.mxu0 %v4326_v45  ;;  %v6524_v27 = vsel %vm3978_vm13, %v3914_v39, %v3994_v57  ;;  %v4001_v62 = vmul.f32 0.1, %v3916_v49  ;;  %vm3985_vm15 = vcmp.ge.f32.partialorder %v3916_v49, 0.0  ;;  %v4289_v30 = vld [vmem:[#allocation8 + $0x870] sm:$0xff]  ;;  %v4178_v26 = vld [vmem:[#allocation8 + $0x4f8] sm:$0xff] }
 0x303   :  { %5000 = vmatpush1.msra.mxu0 %v4325_v14  ;;  %4826 = vmatprep.mubr.f32.mxu1 %v6524_v27  ;;  %v4286_v59 = vld [vmem:[#allocation8 + $0x858] sm:$0xff]  ;;  %v4177_v36 = vld [vmem:[#allocation8 + $0x4f0] sm:$0xff] }
 0x304   :  { %v4002_v0 = vmul.f32 0.1, %v3918_v51  ;;  %5001 = vmatprep.subr.mxu0 %v4322_v56  ;;  %4827 = vmatmul.mubr.f32.vlgmr.msra.gmra.mxu1 %v6527_v2  ;;  %vm3986_vm14 = vcmp.ge.f32.partialorder %v3918_v51, 0.0  ;;  %v6534_v32 = vsel %vm3985_vm15, %v3916_v49, %v4001_v62  ;;  %v4285_v38 = vld [vmem:[#allocation8 + $0x850] sm:$0xff]  ;;  %v4174_v40 = vld [vmem:[#allocation8 + $0x4d8] sm:$0xff] }
 0x305   :  { %5002 = vmatpush1.msra.mxu0 %v4321_v53  ;;  %4917 = vmatpush1.msra.mxu1 %v4209_v61  ;;  %v4282_v35 = vld [vmem:[#allocation8 + $0x838] sm:$0xff]  ;;  %v4173_v39 = vld [vmem:[#allocation8 + $0x4d0] sm:$0xff] }
 0x306   :  { %5003 = vmatprep.subr.mxu0 %v4318_v37  ;;  %4918 = vmatprep.subr.mxu1 %v4206_v6  ;;  %v6531_v48 = vsel %vm3986_vm14, %v3918_v51, %v4002_v0  ;;  %v4281_v41 = vld [vmem:[#allocation8 + $0x830] sm:$0xff]  ;;  %v4170_v42 = vld [vmem:[#allocation8 + $0x4b8] sm:$0xff] }
 0x307   :  { %5004 = vmatpush1.msra.mxu0 %v4317_v22  ;;  %4919 = vmatpush1.msra.mxu1 %v4205_v7  ;;  %v4278_v16 = vld [vmem:[#allocation8 + $0x818] sm:$0xff]  ;;  %v4169_v3 = vld [vmem:[#allocation8 + $0x4b0] sm:$0xff] }
 0x308   :  { %5005 = vmatprep.subr.mxu0 %v4314_v34  ;;  %4832 = vmatprep.mubr.f32.mxu1 %v6531_v48  ;;  %v4277_v43 = vld [vmem:[#allocation8 + $0x810] sm:$0xff]  ;;  %v4166_v45 = vld [vmem:[#allocation8 + $0x498] sm:$0xff] }
 0x309   :  { %5006 = vmatpush1.msra.mxu0 %v4313_v9  ;;  %4920 = vmatprep.subr.mxu1 %v4202_v12  ;;  %v4402_v57 = vld [vmem:[#allocation8 + $0xbf8] sm:$0xff]  ;;  %v4165_v46 = vld [vmem:[#allocation8 + $0x490] sm:$0xff] }
 0x30a   :  { %5007 = vmatprep.subr.mxu0 %v4310_v4  ;;  %4833 = vmatmul.mubr.f32.gmra.mxu1 %v6534_v32  ;;  %v4401_v14 = vld [vmem:[#allocation8 + $0xbf0] sm:$0xff]  ;;  %v4162_v49 = vld [vmem:[#allocation8 + $0x478] sm:$0xff] }
 0x30b   :  { %4921 = vmatpush1.msra.mxu1 %v4201_v13  ;;  %5008 = vmatpush1.msra.mxu0 %v4309_v17  ;;  %v4398_v50 = vld [vmem:[#allocation8 + $0xbd8] sm:$0xff]  ;;  %v4161_v56 = vld [vmem:[#allocation8 + $0x470] sm:$0xff] }
 0x30c   :  { %4922 = vmatprep.subr.mxu1 %v4198_v18  ;;  %4980 = vmatprep.mubr.f32.mxu1 %v6438_v20  ;;  %v4293_v20 = vld [vmem:[#allocation8 + $0x890] sm:$0xff]  ;;  %v4158_v53 = vld [vmem:[#allocation8 + $0x458] sm:$0xff] }
 0x30d   :  { %5009 = vmatprep.subr.mxu0 %v4306_v31  ;;  %4923 = vmatpush1.msra.mxu1 %v4197_v15  ;;  %v4397_v51 = vld [vmem:[#allocation8 + $0xbd0] sm:$0xff]  ;;  %v4394_v61 = vld [vmem:[#allocation8 + $0xbb8] sm:$0xff] }
 0x30e   :  { %5010 = vmatpush1.msra.mxu0 %v4305_v60  ;;  %4924 = vmatprep.subr.mxu1 %v4194_v19  ;;  %v4157_v37 = vld [vmem:[#allocation8 + $0x450] sm:$0xff]  ;;  %v4154_v0 = vld [vmem:[#allocation8 + $0x438] sm:$0xff] }
 0x30f   :  { %5011 = vmatprep.subr.mxu0 %v4302_v33  ;;  %4925 = vmatpush1.msra.mxu1 %v4193_v58  ;;  %v4393_v6 = vld [vmem:[#allocation8 + $0xbb0] sm:$0xff]  ;;  %v4390_v22 = vld [vmem:[#allocation8 + $0xb98] sm:$0xff] }
 0x310   :  { %5012 = vmatpush1.msra.mxu0 %v4301_v29  ;;  %4926 = vmatprep.subr.mxu1 %v4190_v44  ;;  %v4153_v7 = vld [vmem:[#allocation8 + $0x430] sm:$0xff]  ;;  %v4150_v34 = vld [vmem:[#allocation8 + $0x418] sm:$0xff] }
 0x311   :  { %5013 = vmatprep.subr.mxu0 %v4298_v10  ;;  %4927 = vmatpush1.msra.mxu1 %v4189_v11  ;;  %v4389_v62 = vld [vmem:[#allocation8 + $0xb90] sm:$0xff]  ;;  %v4386_v9 = vld [vmem:[#allocation8 + $0xb78] sm:$0xff] }
 0x312   :  { %5014 = vmatpush1.msra.mxu0 %v4297_v47  ;;  %4928 = vmatprep.subr.mxu1 %v4186_v54  ;;  %v4149_v12 = vld [vmem:[#allocation8 + $0x410] sm:$0xff]  ;;  %v4274_v13 = vld [vmem:[#allocation8 + $0x7f8] sm:$0xff] }
 0x313   :  { %5015 = vmatprep.subr.mxu0 %v4294_v52  ;;  %4929 = vmatpush1.msra.mxu1 %v4185_v23  ;;  %v4385_v4 = vld [vmem:[#allocation8 + $0xb70] sm:$0xff]  ;;  %v4382_v17 = vld [vmem:[#allocation8 + $0xb58] sm:$0xff] }
 0x314   :  { %5016 = vmatpush1.msra.mxu0 %v4293_v20  ;;  %4930 = vmatprep.subr.mxu1 %v4182_v63  ;;  %v4273_v18 = vld [vmem:[#allocation8 + $0x7f0] sm:$0xff]  ;;  %v4270_v15 = vld [vmem:[#allocation8 + $0x7d8] sm:$0xff] }
 0x315   :  { %5017 = vmatprep.subr.mxu0 %v4290_v28  ;;  %4931 = vmatpush1.msra.mxu1 %v4181_v55  ;;  %v4381_v31 = vld [vmem:[#allocation8 + $0xb50] sm:$0xff]  ;;  %v4378_v60 = vld [vmem:[#allocation8 + $0xb38] sm:$0xff] }
 0x316   :  { %5018 = vmatpush1.msra.mxu0 %v4289_v30  ;;  %4932 = vmatprep.subr.mxu1 %v4178_v26  ;;  %v4269_v19 = vld [vmem:[#allocation8 + $0x7d0] sm:$0xff]  ;;  %v4266_v58 = vld [vmem:[#allocation8 + $0x7b8] sm:$0xff] }
 0x317   :  { %5019 = vmatprep.subr.mxu0 %v4286_v59  ;;  %4933 = vmatpush1.msra.mxu1 %v4177_v36  ;;  %v4377_v33 = vld [vmem:[#allocation8 + $0xb30] sm:$0xff]  ;;  %v4374_v29 = vld [vmem:[#allocation8 + $0xb18] sm:$0xff] }
 0x318   :  { %5020 = vmatpush1.msra.mxu0 %v4285_v38  ;;  %4934 = vmatprep.subr.mxu1 %v4174_v40  ;;  %v4265_v44 = vld [vmem:[#allocation8 + $0x7b0] sm:$0xff]  ;;  %v4262_v11 = vld [vmem:[#allocation8 + $0x798] sm:$0xff] }
 0x319   :  { %5021 = vmatprep.subr.mxu0 %v4282_v35  ;;  %4935 = vmatpush1.msra.mxu1 %v4173_v39  ;;  %v4373_v10 = vld [vmem:[#allocation8 + $0xb10] sm:$0xff]  ;;  %v4370_v47 = vld [vmem:[#allocation8 + $0xaf8] sm:$0xff] }
 0x31a   :  { %5022 = vmatpush1.msra.mxu0 %v4281_v41  ;;  %4936 = vmatprep.subr.mxu1 %v4170_v42  ;;  %v4261_v54 = vld [vmem:[#allocation8 + $0x790] sm:$0xff]  ;;  %v4258_v23 = vld [vmem:[#allocation8 + $0x778] sm:$0xff] }
 0x31b   :  { %5023 = vmatprep.subr.mxu0 %v4278_v16  ;;  %4937 = vmatpush1.msra.mxu1 %v4169_v3  ;;  %v4369_v52 = vld [vmem:[#allocation8 + $0xaf0] sm:$0xff]  ;;  %v4366_v20 = vld [vmem:[#allocation8 + $0xad8] sm:$0xff] }
 0x31c   :  { %5024 = vmatpush1.msra.mxu0 %v4277_v43  ;;  %4938 = vmatprep.subr.mxu1 %v4166_v45  ;;  %v4257_v63 = vld [vmem:[#allocation8 + $0x770] sm:$0xff]  ;;  %v4254_v55 = vld [vmem:[#allocation8 + $0x758] sm:$0xff] }
 0x31d   :  { %5025 = vmatprep.subr.mxu0 %v4402_v57  ;;  %4939 = vmatpush1.msra.mxu1 %v4165_v46  ;;  %v4365_v28 = vld [vmem:[#allocation8 + $0xad0] sm:$0xff]  ;;  %v4362_v30 = vld [vmem:[#allocation8 + $0xab8] sm:$0xff] }
 0x31e   :  { %5026 = vmatpush2.msra.mxu0 %v4401_v14  ;;  %4940 = vmatprep.subr.mxu1 %v4162_v49  ;;  %v4253_v26 = vld [vmem:[#allocation8 + $0x750] sm:$0xff]  ;;  %v4250_v36 = vld [vmem:[#allocation8 + $0x738] sm:$0xff] }
 0x31f   :  { %5027 = vmatprep.subr.mxu0 %v4398_v50  ;;  %4941 = vmatpush1.msra.mxu1 %v4161_v56  ;;  %v4361_v59 = vld [vmem:[#allocation8 + $0xab0] sm:$0xff]  ;;  %v4358_v38 = vld [vmem:[#allocation8 + $0xa98] sm:$0xff] }
 0x320   :  { %5028 = vmatpush2.msra.mxu0 %v4397_v51  ;;  %4942 = vmatprep.subr.mxu1 %v4158_v53  ;;  %v4249_v40 = vld [vmem:[#allocation8 + $0x730] sm:$0xff]  ;;  %v4246_v39 = vld [vmem:[#allocation8 + $0x718] sm:$0xff] }
 0x321   :  { %5029 = vmatprep.subr.mxu0 %v4394_v61  ;;  %4943 = vmatpush1.msra.mxu1 %v4157_v37  ;;  %v4357_v35 = vld [vmem:[#allocation8 + $0xa90] sm:$0xff]  ;;  %v4354_v41 = vld [vmem:[#allocation8 + $0xa78] sm:$0xff] }
 0x322   :  { %5030 = vmatpush2.msra.mxu0 %v4393_v6  ;;  %4944 = vmatprep.subr.mxu1 %v4154_v0  ;;  %v4245_v42 = vld [vmem:[#allocation8 + $0x710] sm:$0xff]  ;;  %v4242_v3 = vld [vmem:[#allocation8 + $0x6f8] sm:$0xff] }
 0x323   :  { %5031 = vmatprep.subr.mxu0 %v4390_v22  ;;  %4945 = vmatpush1.msra.mxu1 %v4153_v7  ;;  %v4353_v16 = vld [vmem:[#allocation8 + $0xa70] sm:$0xff]  ;;  %v4350_v43 = vld [vmem:[#allocation8 + $0xa58] sm:$0xff] }
 0x324   :  { %5032 = vmatpush2.msra.mxu0 %v4389_v62  ;;  %4946 = vmatprep.subr.mxu1 %v4150_v34  ;;  %v4241_v45 = vld [vmem:[#allocation8 + $0x6f0] sm:$0xff]  ;;  %v4238_v46 = vld [vmem:[#allocation8 + $0x6d8] sm:$0xff] }
 0x325   :  { %5033 = vmatprep.subr.mxu0 %v4386_v9  ;;  %4947 = vmatpush1.msra.mxu1 %v4149_v12  ;;  %v4349_v57 = vld [vmem:[#allocation8 + $0xa50] sm:$0xff]  ;;  %v4346_v14 = vld [vmem:[#allocation8 + $0xa38] sm:$0xff] }
 0x326   :  { %5034 = vmatpush2.msra.mxu0 %v4385_v4  ;;  %4948 = vmatprep.subr.mxu1 %v4274_v13  ;;  %v4237_v49 = vld [vmem:[#allocation8 + $0x6d0] sm:$0xff]  ;;  %v4234_v56 = vld [vmem:[#allocation8 + $0x6b8] sm:$0xff] }
 0x327   :  { %5035 = vmatprep.subr.mxu0 %v4382_v17  ;;  %4949 = vmatpush2.msra.mxu1 %v4273_v18  ;;  %v4345_v50 = vld [vmem:[#allocation8 + $0xa30] sm:$0xff]  ;;  %v4342_v51 = vld [vmem:[#allocation8 + $0xa18] sm:$0xff] }
 0x328   :  { %5036 = vmatpush2.msra.mxu0 %v4381_v31  ;;  %4950 = vmatprep.subr.mxu1 %v4270_v15  ;;  %v4233_v53 = vld [vmem:[#allocation8 + $0x6b0] sm:$0xff]  ;;  %v4230_v37 = vld [vmem:[#allocation8 + $0x698] sm:$0xff] }
 0x329   :  { %5037 = vmatprep.subr.mxu0 %v4378_v60  ;;  %4951 = vmatpush2.msra.mxu1 %v4269_v19  ;;  %v4341_v61 = vld [vmem:[#allocation8 + $0xa10] sm:$0xff]  ;;  %v4226_v0 = vld [vmem:[#allocation8 + $0x678] sm:$0xff] }
 0x32a   :  { %5038 = vmatpush2.msra.mxu0 %v4377_v33  ;;  %4952 = vmatprep.subr.mxu1 %v4266_v58  ;;  %v4229_v6 = vld [vmem:[#allocation8 + $0x690] sm:$0xff]  ;;  %v4222_v7 = vld [vmem:[#allocation8 + $0x658] sm:$0xff] }
 0x32b   :  { %5039 = vmatprep.subr.mxu0 %v4374_v29  ;;  %4953 = vmatpush2.msra.mxu1 %v4265_v44  ;;  %v4225_v22 = vld [vmem:[#allocation8 + $0x670] sm:$0xff]  ;;  %v4218_v34 = vld [vmem:[#allocation8 + $0x638] sm:$0xff] }
 0x32c   :  { %5040 = vmatpush2.msra.mxu0 %v4373_v10  ;;  %4954 = vmatprep.subr.mxu1 %v4262_v11  ;;  %v4221_v62 = vld [vmem:[#allocation8 + $0x650] sm:$0xff]  ;;  %v4214_v12 = vld [vmem:[#allocation8 + $0x618] sm:$0xff] }
 0x32d   :  { %5041 = vmatprep.subr.mxu0 %v4370_v47  ;;  %4955 = vmatpush2.msra.mxu1 %v4261_v54  ;;  %v4217_v9 = vld [vmem:[#allocation8 + $0x630] sm:$0xff]  ;;  %v4466_v13 = vld [vmem:[#allocation8 + $0xdf8] sm:$0xff] }
 0x32e   :  { %5042 = vmatpush2.msra.mxu0 %v4369_v52  ;;  %4956 = vmatprep.subr.mxu1 %v4258_v23  ;;  %v4213_v4 = vld [vmem:[#allocation8 + $0x610] sm:$0xff]  ;;  %v4462_v17 = vld [vmem:[#allocation8 + $0xdd8] sm:$0xff] }
 0x32f   :  { %5043 = vmatprep.subr.mxu0 %v4366_v20  ;;  %4957 = vmatpush2.msra.mxu1 %v4257_v63  ;;  %v4458_v18 = vld [vmem:[#allocation8 + $0xdb8] sm:$0xff]  ;;  %v4453_v15 = vld [vmem:[#allocation8 + $0xd90] sm:$0xff] }
 0x330   :  { %5044 = vmatpush2.msra.mxu0 %v4365_v28  ;;  %4958 = vmatprep.subr.mxu1 %v4254_v55  ;;  %v4454_v31 = vld [vmem:[#allocation8 + $0xd98] sm:$0xff]  ;;  %v4441_v58 = vld [vmem:[#allocation8 + $0xd30] sm:$0xff] }
 0x331   :  { %5045 = vmatprep.subr.mxu0 %v4362_v30  ;;  %4959 = vmatpush2.msra.mxu1 %v4253_v26  ;;  %v4450_v60 = vld [vmem:[#allocation8 + $0xd78] sm:$0xff]  ;;  %v4433_v10 = vld [vmem:[#allocation8 + $0xcf0] sm:$0xff] }
 0x332   :  { %5046 = vmatpush2.msra.mxu0 %v4361_v59  ;;  %4960 = vmatprep.subr.mxu1 %v4250_v36  ;;  %v4446_v19 = vld [vmem:[#allocation8 + $0xd58] sm:$0xff]  ;;  %v4429_v11 = vld [vmem:[#allocation8 + $0xcd0] sm:$0xff] }
 0x333   :  { %5047 = vmatprep.subr.mxu0 %v4358_v38  ;;  %4961 = vmatpush2.msra.mxu1 %v4249_v40  ;;  %v4442_v33 = vld [vmem:[#allocation8 + $0xd38] sm:$0xff]  ;;  %v4425_v54 = vld [vmem:[#allocation8 + $0xcb0] sm:$0xff] }
 0x334   :  { %5048 = vmatpush2.msra.mxu0 %v4357_v35  ;;  %4962 = vmatprep.subr.mxu1 %v4246_v39  ;;  %v4438_v29 = vld [vmem:[#allocation8 + $0xd18] sm:$0xff]  ;;  %v4421_v23 = vld [vmem:[#allocation8 + $0xc90] sm:$0xff] }
 0x335   :  { %5049 = vmatprep.subr.mxu0 %v4354_v41  ;;  %4963 = vmatpush2.msra.mxu1 %v4245_v42  ;;  %v4434_v44 = vld [vmem:[#allocation8 + $0xcf8] sm:$0xff]  ;;  %v4417_v63 = vld [vmem:[#allocation8 + $0xc70] sm:$0xff] }
 0x336   :  { %5050 = vmatpush2.msra.mxu0 %v4353_v16  ;;  %4964 = vmatprep.subr.mxu1 %v4242_v3  ;;  %v4426_v47 = vld [vmem:[#allocation8 + $0xcb8] sm:$0xff]  ;;  %v4413_v55 = vld [vmem:[#allocation8 + $0xc50] sm:$0xff] }
 0x337   :  { %5051 = vmatprep.subr.mxu0 %v4350_v43  ;;  %4965 = vmatpush2.msra.mxu1 %v4241_v45  ;;  %v4422_v52 = vld [vmem:[#allocation8 + $0xc98] sm:$0xff]  ;;  %v4409_v26 = vld [vmem:[#allocation8 + $0xc30] sm:$0xff] }
 0x338   :  { %5052 = vmatpush2.msra.mxu0 %v4349_v57  ;;  %4966 = vmatprep.subr.mxu1 %v4238_v46  ;;  %v4418_v20 = vld [vmem:[#allocation8 + $0xc78] sm:$0xff]  ;;  %v4405_v36 = vld [vmem:[#allocation8 + $0xc10] sm:$0xff] }
 0x339   :  { %5053 = vmatprep.subr.mxu0 %v4346_v14  ;;  %4967 = vmatpush2.msra.mxu1 %v4237_v49  ;;  %v4414_v28 = vld [vmem:[#allocation8 + $0xc58] sm:$0xff]  ;;  %v4529_v40 = vld [vmem:[#allocation8 + $0xff0] sm:$0xff] }
 0x33a   :  { %5054 = vmatpush2.msra.mxu0 %v4345_v50  ;;  %4968 = vmatprep.subr.mxu1 %v4234_v56  ;;  %v4410_v30 = vld [vmem:[#allocation8 + $0xc38] sm:$0xff]  ;;  %v4525_v39 = vld [vmem:[#allocation8 + $0xfd0] sm:$0xff] }
 0x33b   :  { %5055 = vmatprep.subr.mxu0 %v4342_v51  ;;  %4969 = vmatpush2.msra.mxu1 %v4233_v53  ;;  %v4406_v59 = vld [vmem:[#allocation8 + $0xc18] sm:$0xff]  ;;  %v4521_v42 = vld [vmem:[#allocation8 + $0xfb0] sm:$0xff] }
 0x33c   :  { %5056 = vmatpush2.msra.mxu0 %v4341_v61  ;;  %4970 = vmatprep.subr.mxu1 %v4230_v37  ;;  %v4530_v38 = vld [vmem:[#allocation8 + $0xff8] sm:$0xff]  ;;  %v4517_v3 = vld [vmem:[#allocation8 + $0xf90] sm:$0xff] }
 0x33d   :  { %5058 = vmatmul.mubr.f32.vlgmr.msra.gmra.mxu0 %v6510_v24  ;;  %4971 = vmatpush2.msra.mxu1 %v4229_v6  ;;  %v4465_v24 = vld [vmem:[#allocation8 + $0xdf0] sm:$0xff]  ;;  %v4526_v35 = vld [vmem:[#allocation8 + $0xfd8] sm:$0xff] }
 0x33e   :  { %5063 = vmatprep.mubr.f32.mxu0 %v6513_v21  ;;  %4972 = vmatprep.subr.mxu1 %v4226_v0  ;;  %v4461_v21 = vld [vmem:[#allocation8 + $0xdd0] sm:$0xff]  ;;  %v4522_v41 = vld [vmem:[#allocation8 + $0xfb8] sm:$0xff] }
 0x33f   :  { %4973 = vmatpush2.msra.mxu1 %v4225_v22  ;;  %v4518_v16 = vld [vmem:[#allocation8 + $0xf98] sm:$0xff]  ;;  %v4513_v45 = vld [vmem:[#allocation8 + $0xf70] sm:$0xff] }
 0x340   :  { %4974 = vmatprep.subr.mxu1 %v4222_v7  ;;  %v4514_v43 = vld [vmem:[#allocation8 + $0xf78] sm:$0xff]  ;;  %v4509_v46 = vld [vmem:[#allocation8 + $0xf50] sm:$0xff] }
 0x341   :  { %5064 = vmatmul.mubr.f32.gmra.mxu0 %v6516_v8  ;;  %4975 = vmatpush2.msra.mxu1 %v4221_v62  ;;  %v4457_v8 = vld [vmem:[#allocation8 + $0xdb0] sm:$0xff]  ;;  %v4510_v57 = vld [vmem:[#allocation8 + $0xf58] sm:$0xff] }
 0x342   :  { %4976 = vmatprep.subr.mxu1 %v4218_v34  ;;  %v4506_v14 = vld [vmem:[#allocation8 + $0xf38] sm:$0xff]  ;;  %v4505_v49 = vld [vmem:[#allocation8 + $0xf30] sm:$0xff] }
 0x343   :  { %4977 = vmatpush2.msra.mxu1 %v4217_v9  ;;  %v4502_v50 = vld [vmem:[#allocation8 + $0xf18] sm:$0xff]  ;;  %v4501_v56 = vld [vmem:[#allocation8 + $0xf10] sm:$0xff] }
 0x344   :  { %4978 = vmatprep.subr.mxu1 %v4214_v12  ;;  %v4498_v51 = vld [vmem:[#allocation8 + $0xef8] sm:$0xff]  ;;  %v4497_v53 = vld [vmem:[#allocation8 + $0xef0] sm:$0xff] }
 0x345   :  { %4979 = vmatpush2.msra.mxu1 %v4213_v4  ;;  %v4494_v61 = vld [vmem:[#allocation8 + $0xed8] sm:$0xff]  ;;  %v4493_v37 = vld [vmem:[#allocation8 + $0xed0] sm:$0xff] }
 0x346   :  { %4981 = vmatmul.mubr.f32.vlgmr.msra.gmra.mxu1 %v6478_v5  ;;  %5070 = vmatprep.subr.mxu1 %v4466_v13  ;;  %v4449_v5 = vld [vmem:[#allocation8 + $0xd70] sm:$0xff]  ;;  %v4490_v6 = vld [vmem:[#allocation8 + $0xeb8] sm:$0xff] }
 0x347   :  { %4986 = vmatprep.mubr.f32.mxu1 %v6488_v25  ;;  %5071 = vmatpush1.msra.mxu1 %v4465_v24  ;;  %v4445_v25 = vld [vmem:[#allocation8 + $0xd50] sm:$0xff]  ;;  %v4486_v22 = vld [vmem:[#allocation8 + $0xe98] sm:$0xff] }
 0x348   :  { %5072 = vmatprep.subr.mxu1 %v4462_v17  ;;  %v4489_v0 = vld [vmem:[#allocation8 + $0xeb0] sm:$0xff]  ;;  %v4482_v62 = vld [vmem:[#allocation8 + $0xe78] sm:$0xff] }
 0x349   :  { %5073 = vmatpush1.msra.mxu1 %v4461_v21  ;;  %v4485_v7 = vld [vmem:[#allocation8 + $0xe90] sm:$0xff]  ;;  %v4478_v9 = vld [vmem:[#allocation8 + $0xe58] sm:$0xff]  ;;  %v4597_v21 = vpop.f32.mrf.mxu0 }
 0x34a   :  { %4987 = vmatmul.mubr.f32.gmra.mxu1 %v6496_v1  ;;  %5074 = vmatprep.subr.mxu1 %v4458_v18  ;;  %v4437_v1 = vld [vmem:[#allocation8 + $0xd10] sm:$0xff]  ;;  %v4474_v4 = vld [vmem:[#allocation8 + $0xe38] sm:$0xff] }
 0x34b   :  { %5075 = vmatpush1.msra.mxu1 %v4457_v8  ;;  %5134 = vmatprep.mubr.f32.mxu1 %v6524_v27  ;;  %v4430_v27 = vld [vmem:[#allocation8 + $0xcd8] sm:$0xff]  ;;  %v4481_v34 = vld [vmem:[#allocation8 + $0xe70] sm:$0xff]  ;;  %v4599_v18 = vpop.f32.mrf.mxu0  ;;  %v4674_v8 = vpop.f32.mrf.mxu1 }
 0x34c   :  { %5076 = vmatprep.subr.mxu1 %v4454_v31  ;;  %v4477_v12 = vld [vmem:[#allocation8 + $0xe50] sm:$0xff]  ;;  %v4470_v24 = vld [vmem:[#allocation8 + $0xe18] sm:$0xff] }
 0x34d   :  { %5077 = vmatpush1.msra.mxu1 %v4453_v15  ;;  %v4473_v13 = vld [vmem:[#allocation8 + $0xe30] sm:$0xff]  ;;  %v4603_v31 = vpop.f32.mrf.mxu0  ;;  %v4676_v15 = vpop.f32.mrf.mxu1 }
 0x34e   :  { %5078 = vmatprep.subr.mxu1 %v4450_v60  ;;  %v4469_v17 = vld [vmem:[#allocation8 + $0xe10] sm:$0xff] }
 0x34f   :  { %5079 = vmatpush1.msra.mxu1 %v4449_v5  ;;  %v4605_v60 = vpop.f32.mrf.mxu0 }
 0x350   :  { %5080 = vmatprep.subr.mxu1 %v4446_v19  ;;  %v4680_v19 = vpop.f32.mrf.mxu1 }
 0x351   :  { %5081 = vmatpush1.msra.mxu1 %v4445_v25 }
 0x352   :  { %5082 = vmatprep.subr.mxu1 %v4442_v33  ;;  %v4675_v33 = vadd.f32 %v4674_v8, %v4597_v21 }
 0x353   :  { %5083 = vmatpush1.msra.mxu1 %v4441_v58  ;;  %v4682_v58 = vpop.f32.mrf.mxu1 }
 0x354   :  { %5084 = vmatprep.subr.mxu1 %v4438_v29  ;;  %v4677_v29 = vadd.f32 %v4676_v15, %v4599_v18 }
 0x355   :  { %5085 = vmatpush1.msra.mxu1 %v4437_v1 }
 0x356   :  { %5086 = vmatprep.subr.mxu1 %v4434_v44 }
 0x357   :  { %5087 = vmatpush1.msra.mxu1 %v4433_v10 }
 0x358   :  { %5088 = vmatprep.subr.mxu1 %v4430_v27 }
 0x359   :  { %5089 = vmatpush1.msra.mxu1 %v4429_v11 }
 0x35a   :  { %5090 = vmatprep.subr.mxu1 %v4426_v47 }
 0x35b   :  { %5091 = vmatpush1.msra.mxu1 %v4425_v54  ;;  %v4683_v54 = vadd.f32 %v4682_v58, %v4605_v60 }
 0x35c   :  { %5092 = vmatprep.subr.mxu1 %v4422_v52 }
 0x35d   :  { %5093 = vmatpush1.msra.mxu1 %v4421_v23 }
 0x35e   :  { %5094 = vmatprep.subr.mxu1 %v4418_v20 }
 0x35f   :  { %5095 = vmatpush1.msra.mxu1 %v4417_v63 }
 0x360   :  { %5096 = vmatprep.subr.mxu1 %v4414_v28 }
 0x361   :  { %5097 = vmatpush1.msra.mxu1 %v4413_v55 }
 0x362   :  { %5098 = vmatprep.subr.mxu1 %v4410_v30  ;;  %v5216_v30 = vld [vmem:[#allocation9 + $0xf8] sm:$0xff] }
 0x363   :  { %5099 = vmatpush1.msra.mxu1 %v4409_v26  ;;  %v5248_v26 = vld [vmem:[#allocation9 + $0x1f8] sm:$0xff]  ;;  %6013 = vmatprep.subr.mxu0 %v5216_v30 }
 0x364   :  { %5100 = vmatprep.subr.mxu1 %v4406_v59  ;;  %v5200_v59 = vld [vmem:[#allocation9 + $0x78] sm:$0xff] }
 0x365   :  { %5101 = vmatpush1.msra.mxu1 %v4405_v36  ;;  %v5232_v36 = vld [vmem:[#allocation9 + $0x178] sm:$0xff]  ;;  %6014 = vmatpush3.msra.mxu0 %v5200_v59 }
 0x366   :  { %5102 = vmatprep.subr.mxu1 %v4530_v38  ;;  %v5215_v38 = vld [vmem:[#allocation9 + $0xf0] sm:$0xff] }
 0x367   :  { %5103 = vmatpush2.msra.mxu1 %v4529_v40  ;;  %v5247_v40 = vld [vmem:[#allocation9 + $0x1f0] sm:$0xff]  ;;  %6015 = vmatprep.subr.mxu0 %v5215_v38 }
 0x368   :  { %5104 = vmatprep.subr.mxu1 %v4526_v35  ;;  %v5199_v35 = vld [vmem:[#allocation9 + $0x70] sm:$0xff] }
 0x369   :  { %5105 = vmatpush2.msra.mxu1 %v4525_v39  ;;  %v5231_v39 = vld [vmem:[#allocation9 + $0x170] sm:$0xff]  ;;  %6016 = vmatpush3.msra.mxu0 %v5199_v35 }
 0x36a   :  { %5106 = vmatprep.subr.mxu1 %v4522_v41  ;;  %v5214_v41 = vld [vmem:[#allocation9 + $0xe8] sm:$0xff] }
 0x36b   :  { %5107 = vmatpush2.msra.mxu1 %v4521_v42  ;;  %v5246_v42 = vld [vmem:[#allocation9 + $0x1e8] sm:$0xff]  ;;  %6017 = vmatprep.subr.mxu0 %v5214_v41 }
 0x36c   :  { %5108 = vmatprep.subr.mxu1 %v4518_v16  ;;  %v5198_v16 = vld [vmem:[#allocation9 + $0x68] sm:$0xff] }
 0x36d   :  { %5109 = vmatpush2.msra.mxu1 %v4517_v3  ;;  %v5230_v3 = vld [vmem:[#allocation9 + $0x168] sm:$0xff]  ;;  %6018 = vmatpush3.msra.mxu0 %v5198_v16  ;;  %v5209_v16 = vld [vmem:[#allocation9 + $0xc0] sm:$0xff] }
 0x36e   :  { %5110 = vmatprep.subr.mxu1 %v4514_v43  ;;  %v5213_v43 = vld [vmem:[#allocation9 + $0xe0] sm:$0xff]  ;;  %v5194_v41 = vld [vmem:[#allocation9 + $0x48] sm:$0xff] }
 0x36f   :  { %5111 = vmatpush2.msra.mxu1 %v4513_v45  ;;  %v5245_v45 = vld [vmem:[#allocation9 + $0x1e0] sm:$0xff]  ;;  %6019 = vmatprep.subr.mxu0 %v5213_v43 }
 0x370   :  { %5112 = vmatprep.subr.mxu1 %v4510_v57  ;;  %v5197_v57 = vld [vmem:[#allocation9 + $0x60] sm:$0xff] }
 0x371   :  { %5113 = vmatpush2.msra.mxu1 %v4509_v46  ;;  %v5229_v46 = vld [vmem:[#allocation9 + $0x160] sm:$0xff]  ;;  %6020 = vmatpush3.msra.mxu0 %v5197_v57  ;;  %v5208_v57 = vld [vmem:[#allocation9 + $0xb8] sm:$0xff] }
 0x372   :  { %5114 = vmatprep.subr.mxu1 %v4506_v14  ;;  %v5212_v14 = vld [vmem:[#allocation9 + $0xd8] sm:$0xff]  ;;  %v5193_v43 = vld [vmem:[#allocation9 + $0x40] sm:$0xff] }
 0x373   :  { %5115 = vmatpush2.msra.mxu1 %v4505_v49  ;;  %v5244_v49 = vld [vmem:[#allocation9 + $0x1d8] sm:$0xff]  ;;  %6021 = vmatprep.subr.mxu0 %v5212_v14 }
 0x374   :  { %5116 = vmatprep.subr.mxu1 %v4502_v50  ;;  %v5196_v50 = vld [vmem:[#allocation9 + $0x58] sm:$0xff] }
 0x375   :  { %5117 = vmatpush2.msra.mxu1 %v4501_v56  ;;  %v5228_v56 = vld [vmem:[#allocation9 + $0x158] sm:$0xff]  ;;  %6022 = vmatpush3.msra.mxu0 %v5196_v50  ;;  %v5207_v50 = vld [vmem:[#allocation9 + $0xb0] sm:$0xff] }
 0x376   :  { %5118 = vmatprep.subr.mxu1 %v4498_v51  ;;  %v5211_v51 = vld [vmem:[#allocation9 + $0xd0] sm:$0xff]  ;;  %v5192_v14 = vld [vmem:[#allocation9 + $0x38] sm:$0xff] }
 0x377   :  { %5119 = vmatpush2.msra.mxu1 %v4497_v53  ;;  %v5243_v53 = vld [vmem:[#allocation9 + $0x1d0] sm:$0xff]  ;;  %6023 = vmatprep.subr.mxu0 %v5211_v51 }
 0x378   :  { %5120 = vmatprep.subr.mxu1 %v4494_v61  ;;  %v5195_v61 = vld [vmem:[#allocation9 + $0x50] sm:$0xff] }
 0x379   :  { %5121 = vmatpush2.msra.mxu1 %v4493_v37  ;;  %v5227_v37 = vld [vmem:[#allocation9 + $0x150] sm:$0xff]  ;;  %6024 = vmatpush3.msra.mxu0 %v5195_v61  ;;  %v5206_v61 = vld [vmem:[#allocation9 + $0xa8] sm:$0xff] }
 0x37a   :  { %5122 = vmatprep.subr.mxu1 %v4490_v6  ;;  %v5210_v6 = vld [vmem:[#allocation9 + $0xc8] sm:$0xff]  ;;  %v5191_v51 = vld [vmem:[#allocation9 + $0x30] sm:$0xff] }
 0x37b   :  { %5123 = vmatpush2.msra.mxu1 %v4489_v0  ;;  %v5242_v0 = vld [vmem:[#allocation9 + $0x1c8] sm:$0xff]  ;;  %6025 = vmatprep.subr.mxu0 %v5210_v6 }
 0x37c   :  { %5124 = vmatprep.subr.mxu1 %v4486_v22  ;;  %v4751_v5 = vpop.f32.mrf.mxu0  ;;  %6026 = vmatpush3.msra.mxu0 %v5194_v41  ;;  %v5190_v6 = vld [vmem:[#allocation9 + $0x28] sm:$0xff] }
 0x37d   :  { %5125 = vmatpush2.msra.mxu1 %v4485_v7  ;;  %v4752_v1 = vadd.f32 %v4751_v5, %v4675_v33  ;;  %6027 = vmatprep.subr.mxu0 %v5209_v16 }
 0x37e   :  { %5126 = vmatprep.subr.mxu1 %v4482_v62  ;;  %v4753_v25 = vpop.f32.mrf.mxu0  ;;  %6028 = vmatpush3.msra.mxu0 %v5193_v43 }
 0x37f   :  { %5127 = vmatpush2.msra.mxu1 %v4481_v34  ;;  %6029 = vmatprep.subr.mxu0 %v5208_v57 }
 0x380   :  { %5128 = vmatprep.subr.mxu1 %v4478_v9  ;;  %v4757_v44 = vpop.f32.mrf.mxu0  ;;  %6030 = vmatpush3.msra.mxu0 %v5192_v14  ;;  %v5439_v14 = vlaneseq }
 0x381   :  { %5129 = vmatpush2.msra.mxu1 %v4477_v12  ;;  %6031 = vmatprep.subr.mxu0 %v5207_v50 }
 0x382   :  { %5130 = vmatprep.subr.mxu1 %v4474_v4  ;;  %v4759_v47 = vpop.f32.mrf.mxu0  ;;  %6032 = vmatpush3.msra.mxu0 %v5191_v51 }
 0x383   :  { %5131 = vmatpush2.msra.mxu1 %v4473_v13  ;;  %v4760_v20 = vadd.f32 %v4759_v47, %v4683_v54  ;;  %6033 = vmatprep.subr.mxu0 %v5206_v61 }
 0x384   :  { %5132 = vmatprep.subr.mxu1 %v4470_v24  ;;  %6034 = vmatpush3.msra.mxu0 %v5190_v6 }
 0x385   :  { %5133 = vmatpush2.msra.mxu1 %v4469_v17 }
 0x386   :  { %5135 = vmatmul.mubr.f32.vlgmr.msra.gmra.mxu1 %v6527_v2  ;;  %v4754_v2 = vadd.f32 %v4753_v25, %v4677_v29  ;;  %6051 = vmatprep.subr.mxu1 %v5248_v26 }
 0x387   :  { %5140 = vmatprep.mubr.f32.mxu1 %v6531_v48  ;;  %6052 = vmatpush3.msra.mxu1 %v5232_v36 }
 0x388   :  { %6053 = vmatprep.subr.mxu1 %v5247_v40 }
 0x389   :  { %6054 = vmatpush3.msra.mxu1 %v5231_v39 }
 0x38a   :  { %5141 = vmatmul.mubr.f32.gmra.mxu1 %v6534_v32  ;;  %v4681_v32 = vadd.f32 %v4680_v19, %v4603_v31  ;;  %6055 = vmatprep.subr.mxu1 %v5246_v42  ;;  %v5226_v42 = vld [vmem:[#allocation9 + $0x148] sm:$0xff] }
 0x38b   :  { %6056 = vmatpush3.msra.mxu1 %v5230_v3  ;;  %v5241_v3 = vld [vmem:[#allocation9 + $0x1c0] sm:$0xff] }
 0x38c   :  { %v4758_v52 = vadd.f32 %v4757_v44, %v4681_v32  ;;  %6057 = vmatprep.subr.mxu1 %v5245_v45  ;;  %v5225_v45 = vld [vmem:[#allocation9 + $0x140] sm:$0xff] }
 0x38d   :  { %6058 = vmatpush3.msra.mxu1 %v5229_v46  ;;  %v5240_v46 = vld [vmem:[#allocation9 + $0x1b8] sm:$0xff] }
 0x38e   :  { %6059 = vmatprep.subr.mxu1 %v5244_v49  ;;  %v5224_v49 = vld [vmem:[#allocation9 + $0x138] sm:$0xff] }
 0x38f   :  { %6060 = vmatpush3.msra.mxu1 %v5228_v56  ;;  %v5239_v56 = vld [vmem:[#allocation9 + $0x1b0] sm:$0xff] }
 0x390   :  { %6061 = vmatprep.subr.mxu1 %v5243_v53  ;;  %v5223_v53 = vld [vmem:[#allocation9 + $0x130] sm:$0xff] }
 0x391   :  { %6062 = vmatpush3.msra.mxu1 %v5227_v37  ;;  %v5238_v37 = vld [vmem:[#allocation9 + $0x1a8] sm:$0xff] }
 0x392   :  { %6063 = vmatprep.subr.mxu1 %v5242_v0  ;;  %v5222_v0 = vld [vmem:[#allocation9 + $0x128] sm:$0xff] }
 0x393   :  { %6064 = vmatpush3.msra.mxu1 %v5226_v42 }
 0x394   :  { %6065 = vmatprep.subr.mxu1 %v5241_v3 }
 0x395   :  { %6066 = vmatpush3.msra.mxu1 %v5225_v45 }
 0x396   :  { %6067 = vmatprep.subr.mxu1 %v5240_v46 }
 0x397   :  { %6068 = vmatpush3.msra.mxu1 %v5224_v49  ;;  %v5440_v49 = vand.u32 127, %v5439_v14 }
 0x398   :  { %6069 = vmatprep.subr.mxu1 %v5239_v56 }
 0x399   :  { %6070 = vmatpush3.msra.mxu1 %v5223_v53  ;;  %vm5441_vm0 = vcmp.lt.s32.totalorder %v5440_v49, 12 }
 0x39a   :  { %6071 = vmatprep.subr.mxu1 %v5238_v37 }
 0x39b   :  { %6072 = vmatpush3.msra.mxu1 %v5222_v0 }
 0x3bc   :  { %v4905_v22 = vpop.f32.mrf.mxu0 }
 0x3be   :  { %v4907_v7 = vpop.f32.mrf.mxu0 }
 0x3c0   :  { %v4911_v62 = vpop.f32.mrf.mxu0 }
 0x3c2   :  { %v4913_v9 = vpop.f32.mrf.mxu0 }
 0x3c4   :  { %v4828_v10 = vpop.f32.mrf.mxu1 }
 0x3c5   :  { %v6548_v27 = vadd.f32 %v4828_v10, %v4752_v1 }
 0x3c6   :  { %v4830_v48 = vpop.f32.mrf.mxu1 }
 0x3c7   :  { %5147 = vst [vmem:[#allocation11] sm:$0xff] %v6548_v27  ;;  %v6551_v11 = vadd.f32 %v4830_v48, %v4754_v2  ;;  %v5155_v60 = vmul.f32 %v6548_v27, %v6548_v27 }
 0x3c9   :  { %5148 = vst [vmem:[#allocation11 + $0x8] sm:$0xff] %v6551_v11  ;;  %v5156_v18 = vmul.f32 %v6551_v11, %v6551_v11 }
 0x3ca   :  { %v4834_v23 = vpop.f32.mrf.mxu1 }
 0x3cb   :  { %v6554_v63 = vadd.f32 %v4834_v23, %v4758_v52  ;;  %v5163_v1 = vadd.f32 %v5156_v18, %v5155_v60  ;;  %v5219_v18 = vld [vmem:[#allocation9 + $0x110] sm:$0xff]  ;;  %v5218_v60 = vld [vmem:[#allocation9 + $0x108] sm:$0xff] }
 0x3cc   :  { %v4836_v28 = vpop.f32.mrf.mxu1 }
 0x3cd   :  { %5151 = vst [vmem:[#allocation11 + $0x20] sm:$0xff] %v6554_v63  ;;  %v6557_v55 = vadd.f32 %v4836_v28, %v4760_v20  ;;  %v5159_v32 = vmul.f32 %v6554_v63, %v6554_v63 }
 0x3cf   :  { %5152 = vst [vmem:[#allocation11 + $0x28] sm:$0xff] %v6557_v55  ;;  %v5160_v44 = vmul.f32 %v6557_v55, %v6557_v55 }
 0x3d1   :  { %v5168_v38 = vadd.f32 %v5160_v44, %v5159_v32 }
 0x3fd   :  { %v5059_v4 = vpop.f32.mrf.mxu0 }
 0x3ff   :  { %v5061_v17 = vpop.f32.mrf.mxu0 }
 0x401   :  { %v5065_v5 = vpop.f32.mrf.mxu0 }
 0x403   :  { %v5067_v47 = vpop.f32.mrf.mxu0 }
 0x406   :  { %v4982_v34 = vpop.f32.mrf.mxu1 }
 0x407   :  { %v4983_v24 = vadd.f32 %v4982_v34, %v4905_v22  ;;  %v5205_v22 = vld [vmem:[#allocation9 + $0xa0] sm:$0xff] }
 0x408   :  { %v4984_v12 = vpop.f32.mrf.mxu1  ;;  %v5221_v34 = vld [vmem:[#allocation9 + $0x120] sm:$0xff]  ;;  %6035 = vmatprep.subr.mxu0 %v5205_v22 }
 0x409   :  { %v4985_v21 = vadd.f32 %v4984_v12, %v4907_v7  ;;  %v5060_v15 = vadd.f32 %v5059_v4, %v4983_v24  ;;  %v5237_v7 = vld [vmem:[#allocation9 + $0x1a0] sm:$0xff]  ;;  %v5236_v12 = vld [vmem:[#allocation9 + $0x198] sm:$0xff]  ;;  %v5203_v24 = vld [vmem:[#allocation9 + $0x90] sm:$0xff] }
 0x40a   :  { %v4988_v13 = vpop.f32.mrf.mxu1  ;;  %6073 = vmatprep.subr.mxu1 %v5237_v7  ;;  %v5188_v4 = vld [vmem:[#allocation9 + $0x18] sm:$0xff] }
 0x40b   :  { %v4989_v31 = vadd.f32 %v4988_v13, %v4911_v62  ;;  %v5062_v58 = vadd.f32 %v5061_v17, %v4985_v21  ;;  %v5189_v62 = vld [vmem:[#allocation9 + $0x20] sm:$0xff]  ;;  %v5220_v13 = vld [vmem:[#allocation9 + $0x118] sm:$0xff]  ;;  %6074 = vmatpush3.msra.mxu1 %v5221_v34  ;;  %v5235_v17 = vld [vmem:[#allocation9 + $0x190] sm:$0xff] }
 0x40c   :  { %v4990_v8 = vpop.f32.mrf.mxu1  ;;  %6036 = vmatpush3.msra.mxu0 %v5189_v62  ;;  %6075 = vmatprep.subr.mxu1 %v5236_v12  ;;  %v5187_v21 = vld [vmem:[#allocation9 + $0x10] sm:$0xff] }
 0x40d   :  { %v4991_v25 = vadd.f32 %v4990_v8, %v4913_v9  ;;  %v5066_v2 = vadd.f32 %v5065_v5, %v4989_v31  ;;  %v5204_v9 = vld [vmem:[#allocation9 + $0x98] sm:$0xff]  ;;  %6076 = vmatpush3.msra.mxu1 %v5220_v13  ;;  %v5202_v8 = vld [vmem:[#allocation9 + $0x88] sm:$0xff]  ;;  %v5201_v5 = vld [vmem:[#allocation9 + $0x80] sm:$0xff] }
 0x40e   :  { %6037 = vmatprep.subr.mxu0 %v5204_v9  ;;  %v5234_v31 = vld [vmem:[#allocation9 + $0x188] sm:$0xff]  ;;  %6077 = vmatprep.subr.mxu1 %v5235_v17 }
 0x40f   :  { %v5068_v23 = vadd.f32 %v5067_v47, %v4991_v25  ;;  %6038 = vmatpush3.msra.mxu0 %v5188_v4  ;;  %6078 = vmatpush3.msra.mxu1 %v5219_v18  ;;  %v5185_v25 = vld [vmem:[#allocation9] sm:$0xff] }
 0x410   :  { %6039 = vmatprep.subr.mxu0 %v5203_v24  ;;  %6079 = vmatprep.subr.mxu1 %v5234_v31 }
 0x411   :  { %6040 = vmatpush3.msra.mxu0 %v5187_v21  ;;  %6080 = vmatpush3.msra.mxu1 %v5218_v60 }
 0x412   :  { %6041 = vmatprep.subr.mxu0 %v5202_v8 }
 0x446   :  { %v5136_v19 = vpop.f32.mrf.mxu1 }
 0x447   :  { %v6564_v33 = vadd.f32 %v5136_v19, %v5060_v15  ;;  %v5186_v15 = vld [vmem:[#allocation9 + $0x8] sm:$0xff]  ;;  %v5233_v19 = vld [vmem:[#allocation9 + $0x180] sm:$0xff] }
 0x448   :  { %v5138_v29 = vpop.f32.mrf.mxu1  ;;  %6042 = vmatpush3.msra.mxu0 %v5186_v15  ;;  %6081 = vmatprep.subr.mxu1 %v5233_v19 }
 0x449   :  { %5149 = vst [vmem:[#allocation11 + $0x10] sm:$0xff] %v6564_v33  ;;  %v6569_v10 = vadd.f32 %v5138_v29, %v5062_v58  ;;  %v5157_v48 = vmul.f32 %v6564_v33, %v6564_v33  ;;  %6043 = vmatprep.subr.mxu0 %v5201_v5  ;;  %v5217_v58 = vld [vmem:[#allocation9 + $0x100] sm:$0xff] }
 0x44a   :  { %v5142_v54 = vpop.f32.mrf.mxu1  ;;  %6044 = vmatpush3.msra.mxu0 %v5185_v25  ;;  %6082 = vmatpush3.msra.mxu1 %v5217_v58 }
 0x44b   :  { %5150 = vst [vmem:[#allocation11 + $0x18] sm:$0xff] %v6569_v10  ;;  %v6576_v52 = vadd.f32 %v5142_v54, %v5066_v2  ;;  %v5158_v20 = vmul.f32 %v6569_v10, %v6569_v10  ;;  %v5164_v28 = vadd.f32 %v5163_v1, %v5157_v48 }
 0x44c   :  { %v5144_v30 = vpop.f32.mrf.mxu1 }
 0x44d   :  { %5153 = vst [vmem:[#allocation11 + $0x30] sm:$0xff] %v6576_v52  ;;  %v5161_v26 = vmul.f32 %v6576_v52, %v6576_v52  ;;  %v6583_v59 = vadd.f32 %v5144_v30, %v5068_v23  ;;  %v5165_v36 = vadd.f32 %v5164_v28, %v5158_v20 }
 0x44f   :  { %5154 = vst [vmem:[#allocation11 + $0x38] sm:$0xff] %v6583_v59  ;;  %5166 = vadd.xlane.f32.xlu0 %v5165_v36  ;;  %v5162_v40 = vmul.f32 %v6583_v59, %v6583_v59  ;;  %v5169_v35 = vadd.f32 %v5168_v38, %v5161_v26 }
 0x451   :  { %v5170_v39 = vadd.f32 %v5169_v35, %v5162_v40 }
 0x453   :  { %5171 = vadd.xlane.f32.xlu0 %v5170_v39 }
 0x4d8   :  { %v5167_v29 = vpop.xlane.xlu0 %5166 }
 0x4d9   :  { %v5173_v1 = vmax.f32 %v5167_v29, 1e-24 }
 0x4db   :  { %6099 = vrsqrt.f32 %v5173_v1 }
 0x4dc   :  { %v5172_v44 = vpop.xlane.xlu0 %5171 }
 0x4dd   :  { %v5174_v2 = vmax.f32 %v5172_v44, 1e-24 }
 0x4df   :  { %6101 = vrsqrt.f32 %v5174_v2 }
 0x4e8   :  { %v6100_v48 = vpop.eup %6099 }
 0x4e9   :  { %v5178_v32 = vmul.f32 %v6100_v48, %v6551_v11  ;;  %v5180_v47 = vmul.f32 %v6100_v48, %v6569_v10  ;;  %v5177_v54 = vmul.f32 %v6100_v48, %v6548_v27  ;;  %v5179_v23 = vmul.f32 %v6100_v48, %v6564_v33 }
 0x4eb   :  { %5313 = vmatprep.mubr.f32.mxu0 %v5178_v32  ;;  %5388 = vmatprep.mubr.f32.mxu1 %v5180_v47 }
 0x4ec   :  { %v6102_v20 = vpop.eup %6101  ;;  %5314 = vmatmul.mubr.f32.vlgmr.msra.gmra.mxu0 %v5177_v54  ;;  %5389 = vmatmul.mubr.f32.vlgmr.msra.gmra.mxu1 %v5179_v23 }
 0x4ed   :  { %v5182_v28 = vmul.f32 %v6102_v20, %v6557_v55  ;;  %v5184_v30 = vmul.f32 %v6102_v20, %v6583_v59  ;;  %v5181_v26 = vmul.f32 %v6102_v20, %v6554_v63  ;;  %v5183_v36 = vmul.f32 %v6102_v20, %v6576_v52 }
 0x4ef   :  { %5318 = vmatprep.mubr.f32.mxu0 %v5182_v28  ;;  %5393 = vmatprep.mubr.f32.mxu1 %v5184_v30 }
 0x4f0   :  { %5319 = vmatmul.mubr.f32.gmra.mxu0 %v5181_v26  ;;  %5394 = vmatmul.mubr.f32.gmra.mxu1 %v5183_v36 }
 0x5ac   :  { %v6045_v27 = vpop.f32.mrf.mxu0  ;;  %v6083_v11 = vpop.f32.mrf.mxu1 }
 0x5ae   :  { %v6046_v33 = vpop.f32.mrf.mxu0  ;;  %v6084_v10 = vpop.f32.mrf.mxu1 }
 0x5af   :  { %v6047_v38 = vadd.f32 %v6046_v33, %v6045_v27  ;;  %v6085_v40 = vadd.f32 %v6084_v10, %v6083_v11 }
 0x5b0   :  { %v6048_v35 = vpop.f32.mrf.mxu0  ;;  %v6086_v39 = vpop.f32.mrf.mxu1 }
 0x5b1   :  { %v5391_v41 = vadd.f32 %v6085_v40, %v6047_v38 }
 0x5b2   :  { %v6049_v55 = vpop.f32.mrf.mxu0  ;;  %v6087_v42 = vpop.f32.mrf.mxu1 }
 0x5b3   :  { %v5399_v59 = vmul.f32 0.1, %v5391_v41  ;;  %v6050_v16 = vadd.f32 %v6049_v55, %v6048_v35  ;;  %v6088_v63 = vadd.f32 %v6087_v42, %v6086_v39 }
 0x5b5   :  { %v5433_v3 = vmul.f32 10.0, %v5399_v59  ;;  %v5396_v52 = vadd.f32 %v6088_v63, %v6050_v16 }
 0x5b7   :  { %v5435_v43 = vmul.f32 1.442695, %v5433_v3  ;;  %v5400_v45 = vmul.f32 0.1, %v5396_v52 }
 0x5b9   :  { %6103 = vpow2.f32 %v5435_v43  ;;  %v5434_v57 = vmul.f32 10.0, %v5400_v45 }
 0x5bb   :  { %v5437_v46 = vmul.f32 1.442695, %v5434_v57 }
 0x5bd   :  { %6105 = vpow2.f32 %v5437_v46 }
 0x5c6   :  { %v6104_v50 = vpop.eup %6103 }
 0x5c7   :  { %v5442_v56 = vsel %vm5441_vm0, %v6104_v50, 0.0 }
 0x5c8   :  { %5444 = vadd.xlane.f32.xlu1 %v5442_v56 }
 0x5ca   :  { %v6106_v51 = vpop.eup %6105 }
 0x5cb   :  { %v5443_v53 = vsel %vm5441_vm0, %v6106_v51, 0.0 }
 0x5cc   :  { %5446 = vadd.xlane.f32.xlu1 %v5443_v53 }
 0x5cd   :  { %6210 = shalt.err (!%p6207_p10)
}
 0x5ce   :  { %5469 = dma.vmem_to_hbm [thread:$0]  %s5464_s3, 1024, %s6612_s4, [#allocation5], %s6251_s23, %s6251_s23, %s6252_s24   ;;  %v5401_v61 = vmul.f32 %v5399_v59, %v5399_v59  ;;  %v5402_v6 = vmul.f32 %v5400_v45, %v5400_v45  ;;  %v5421_v8 = vmul.f32 0.5403023, %v5399_v59  ;;  %v5422_v5 = vmul.f32 0.5403023, %v5400_v45 }
 0x5cf   :  { %s6258_s4 = smov [#allocation12]  }
 0x5d0   :  { %v5403_v37 = vsub.f32 1.0, %v5401_v61  ;;  %v5404_v22 = vsub.f32 1.0, %v5402_v6  ;;  %s5475_s18 = sshll.u32 %s6258_s4, 4  ;;  %s5476_s18 = int_to_ptr.vmem [resolvable:$true] %s5475_s18 }
 0x5d1   :  { %s6219_s19 = scalar_lea.vmem %s5476_s18, 256  ;;  %p6224_p12 = scmp.lt.s32.totalorder %s5476_s18, %s5476_s18 }
 0x5d2   :  { %v5405_v0 = vmax.f32 %v5403_v37, 0.0  ;;  %v5406_v7 = vmax.f32 %v5404_v22, 0.0  ;;  %p6220_p11 = scmp.ne.s32.totalorder %s5476_s18, %s6219_s19  ;;  %p6225_p13 = scmp.lt.s32.totalorder %s6219_s19, %s6219_s19 }
 0x5d4   :  { %6107 = vrsqrt.f32 %v5405_v0  ;;  %vm5409_vm1 = vcmp.eq.f32.partialorder %v5405_v0, inf  ;;  %v5412_v4 = vand.u32 2147483648, %v5405_v0  ;;  %vm5411_vm2 = vcmp.eq.f32.partialorder %v5405_v0, 0.0  ;;  %p6226_p0 = por %p6225_p13, %p6224_p12 }
 0x5d5   :  { %6109 = vrsqrt.f32 %v5406_v7  ;;  %vm5416_vm3 = vcmp.eq.f32.partialorder %v5406_v7, inf  ;;  %v5419_v18 = vand.u32 2147483648, %v5406_v7  ;;  %vm5418_vm4 = vcmp.eq.f32.partialorder %v5406_v7, 0.0 }
 0x5d6   :  { %p6227_p1 = pnand %p6226_p0, %p6220_p11 }
 0x5e1   :  { %v6108_v62 = vpop.eup %6107 }
 0x5e2   :  { %v5408_v34 = vmul.f32 %v6108_v62, %v5405_v0  ;;  %v6110_v9 = vpop.eup %6109 }
 0x5e3   :  { %v5415_v13 = vmul.f32 %v6110_v9, %v5406_v7 }
 0x5e4   :  { %v5410_v12 = vsel %vm5409_vm1, %v5405_v0, %v5408_v34 }
 0x5e5   :  { %v5413_v24 = vsel %vm5411_vm2, %v5412_v4, %v5410_v12  ;;  %v5417_v17 = vsel %vm5416_vm3, %v5406_v7, %v5415_v13 }
 0x5e6   :  { %v5423_v21 = vmul.f32 0.84147096, %v5413_v24  ;;  %v5420_v31 = vsel %vm5418_vm4, %v5419_v18, %v5417_v17 }
 0x5e7   :  { %v5424_v60 = vmul.f32 0.84147096, %v5420_v31 }
 0x5e8   :  { %v5425_v15 = vsub.f32 %v5421_v8, %v5423_v21 }
 0x5e9   :  { %v5426_v25 = vsub.f32 %v5422_v5, %v5424_v60 }
 0x5ea   :  { %v5427_v19 = vmul.f32 10.0, %v5425_v15 }
 0x5eb   :  { %v5428_v29 = vmul.f32 10.0, %v5426_v25 }
 0x5ec   :  { %v5429_v58 = vmul.f32 1.442695, %v5427_v19 }
 0x5ed   :  { %v5431_v1 = vmul.f32 1.442695, %v5428_v29 }
 0x5ee   :  { %6111 = vpow2.f32 %v5429_v58 }
 0x5ef   :  { %6113 = vpow2.f32 %v5431_v1 }
 0x5fb   :  { %v6112_v48 = vpop.eup %6111 }
 0x5fc   :  { %v6114_v23 = vpop.eup %6113 }
 0x651   :  { %v5445_v44 = vpop.xlane.xlu1 %5444 }
 0x652   :  { %v5448_v2 = vsub.f32 %v5445_v44, %v6104_v50 }
 0x654   :  { %v5450_v32 = vadd.f32 %v6112_v48, %v5448_v2 }
 0x655   :  { %v5447_v47 = vpop.xlane.xlu1 %5446 }
 0x656   :  { %6115 = vrcp.f32 %v5450_v32  ;;  %v5449_v54 = vsub.f32 %v5447_v47, %v6106_v51 }
 0x658   :  { %v5451_v20 = vadd.f32 %v6114_v23, %v5449_v54 }
 0x65a   :  { %6117 = vrcp.f32 %v5451_v20 }
 0x663   :  { %v6116_v28 = vpop.eup %6115 }
 0x664   :  { %v5453_v30 = vmul.f32 %v6116_v28, %v6112_v48 }
 0x666   :  { %5456 = vst [vmem:[#allocation12] sm:$0xff] %v5453_v30 }
 0x667   :  { %v6118_v26 = vpop.eup %6117 }
 0x668   :  { %v5455_v36 = vmul.f32 %v6118_v26, %v6114_v23 }
 0x66a   :  { %5457 = vst [vmem:[#allocation12 + $0x8] sm:$0xff] %v5455_v36 }
 0x66b   :  { %6230 = shalt.err (!%p6227_p1)
}
 0x66c   :  { %5481 = dma.vmem_to_hbm [thread:$0]  %s5476_s18, 256, %s6613_s5, [#allocation13], %s6255_s11, %s6255_s11, %s6256_s12  }
 0x66d   :  { %6245 = dma.done.wait [#allocation5], 1024  }
 0x66e   :  { %6246 = vsyncadd [#allocation5], 4294966272 }
 0x66f   :  { %6247 = dma.done.wait [#allocation13], 256  }
 0x670   :  { %6248 = vsyncadd [#allocation13], 4294967040 }
 0x671   :  { %5488 = vsyncpa [#allocation4], 1 }
 0x672   :  { %5489 = vsyncpa [#allocation7], 1 }
 0x673   :  { %5490 = vsyncpa [#allocation10], 1 }
 0x674   :  { %5491 = vsyncpa [#allocation5], 1 }
 0x675   :  { %5492 = vsyncpa [#allocation13], 1 }

</bundles_post_ra>
